<compile_context>
chip_gen: v6e
topology: v6e:2x2x1
jax: 0.10.0
libtpu: 0.0.40
codegen_flags: <defaults>
</compile_context>

<pallas_src>
import jax
import jax.numpy as jnp
from jax.experimental import pallas as pl
from jax.experimental.pallas import tpu as pltpu

HIDDEN_DIM = 180          # torch module's hidden_dim
HIDDEN_PAD = 256          # lane/MXU aligned padding of the hidden dim
NUM_BLOCKS = 5            # num_layers=7 -> 5 residual blocks
NUM_CLASSES = 6
CLASSES_PAD = 128         # lane-dense output store; wrapper slices back to 6


def _round_up(a: int, m: int) -> int:
    return (a + m - 1) // m * m


def _mlp_residual_kernel(x_ref, w0_ref, b0_ref, wa_ref, ba_ref, wb_ref, bb_ref,
                         wf_ref, bf_ref, o_ref):
    cdt = w0_ref.dtype  # matmul-input dtype (f32 or bf16); accumulation is always f32

    # Input layer + ReLU.  x_ref is already cast to `cdt` in the wrapper.
    h = jnp.dot(x_ref[...], w0_ref[...], preferred_element_type=jnp.float32)
    h = jnp.maximum(h + b0_ref[...], 0.0)

    # 5 residual blocks: h = ReLU(h + Linear2(ReLU(Linear1(h)))).
    # Static unroll (only 10 matmuls); weight stacks are indexed with static ints.
    for i in range(NUM_BLOCKS):
        t = jnp.dot(h.astype(cdt), wa_ref[i], preferred_element_type=jnp.float32)
        t = jnp.maximum(t + ba_ref[i], 0.0)
        t = jnp.dot(t.astype(cdt), wb_ref[i], preferred_element_type=jnp.float32)
        t = t + bb_ref[i]
        h = jnp.maximum(h + t, 0.0)

    # Output layer, lane-dense (TB, 128) store; padded classes are exactly 0 + bf(=0).
    out = jnp.dot(h.astype(cdt), wf_ref[...], preferred_element_type=jnp.float32)
    o_ref[...] = out + bf_ref[...]


def _pad_params(params, d_pad, weight_dtype):
    """Zero-pad params to MXU-friendly shapes. Zero padding keeps numerics exact."""
    w0, b0, wa, ba, wb, bb, wf, bf = params
    d_in = w0.shape[0]
    f32 = jnp.float32

    w0p = jnp.zeros((d_pad, HIDDEN_PAD), weight_dtype).at[:d_in, :HIDDEN_DIM].set(
        w0.astype(weight_dtype))
    b0p = jnp.zeros((1, HIDDEN_PAD), f32).at[0, :HIDDEN_DIM].set(b0)

    wap = jnp.zeros((NUM_BLOCKS, HIDDEN_PAD, HIDDEN_PAD), weight_dtype).at[
        :, :HIDDEN_DIM, :HIDDEN_DIM].set(wa.astype(weight_dtype))
    bap = jnp.zeros((NUM_BLOCKS, 1, HIDDEN_PAD), f32).at[:, 0, :HIDDEN_DIM].set(ba)
    wbp = jnp.zeros((NUM_BLOCKS, HIDDEN_PAD, HIDDEN_PAD), weight_dtype).at[
        :, :HIDDEN_DIM, :HIDDEN_DIM].set(wb.astype(weight_dtype))
    bbp = jnp.zeros((NUM_BLOCKS, 1, HIDDEN_PAD), f32).at[:, 0, :HIDDEN_DIM].set(bb)

    wfp = jnp.zeros((HIDDEN_PAD, CLASSES_PAD), weight_dtype).at[
        :HIDDEN_DIM, :NUM_CLASSES].set(wf.astype(weight_dtype))
    bfp = jnp.zeros((1, CLASSES_PAD), f32).at[0, :NUM_CLASSES].set(bf)
    return (w0p, b0p, wap, bap, wbp, bbp, wfp, bfp)


def mlp_classifier_deep_residual(x_img, params, *, weight_dtype=jnp.float32, tb_max=256):
    """x_img: (B, 3, H, W) float32 -> (B, NUM_CLASSES) float32 logits."""
    b = x_img.shape[0]
    x = x_img.reshape(b, -1).astype(jnp.float32)   # matches torch x.view(b, -1)
    d_in = x.shape[1]
    d_pad = _round_up(d_in, 128)                   # lane-aligned K for the first matmul

    itemsize = jnp.dtype(weight_dtype).itemsize
    # Largest batch tile (multiple of 8) whose double-buffered x tile stays modest,
    # so the resident set fits v5e's 16 MiB / v7x's 32 MiB scoped-VMEM defaults.
    tb = tb_max
    while tb > 8 and 2 * tb * d_pad * itemsize > (6 << 20):
        tb //= 2
    tb = min(tb, _round_up(b, 8))
    b_pad = _round_up(b, tb)

    # Pad activations (zeros) and cast to the matmul-input dtype (halves DMA for bf16).
    xp = jnp.zeros((b_pad, d_pad), weight_dtype).at[:b, :d_in].set(x.astype(weight_dtype))
    w0p, b0p, wap, bap, wbp, bbp, wfp, bfp = _pad_params(params, d_pad, weight_dtype)

    const2 = lambda i: (0, 0)
    const3 = lambda i: (0, 0, 0)
    out = pl.pallas_call(
        _mlp_residual_kernel,
        out_shape=jax.ShapeDtypeStruct((b_pad, CLASSES_PAD), jnp.float32),
        grid=(b_pad // tb,),
        in_specs=[
            pl.BlockSpec((tb, d_pad), lambda i: (i, 0)),                      # x (streamed)
            pl.BlockSpec((d_pad, HIDDEN_PAD), const2),                        # w0 (resident)
            pl.BlockSpec((1, HIDDEN_PAD), const2),                            # b0
            pl.BlockSpec((NUM_BLOCKS, HIDDEN_PAD, HIDDEN_PAD), const3),       # block linear 1 W
            pl.BlockSpec((NUM_BLOCKS, 1, HIDDEN_PAD), const3),                # block linear 1 b
            pl.BlockSpec((NUM_BLOCKS, HIDDEN_PAD, HIDDEN_PAD), const3),       # block linear 2 W
            pl.BlockSpec((NUM_BLOCKS, 1, HIDDEN_PAD), const3),                # block linear 2 b
            pl.BlockSpec((HIDDEN_PAD, CLASSES_PAD), const2),                  # wf
            pl.BlockSpec((1, CLASSES_PAD), const2),                           # bf
        ],
        out_specs=pl.BlockSpec((tb, CLASSES_PAD), lambda i: (i, 0)),
        compiler_params=pltpu.CompilerParams(
            dimension_semantics=("parallel",)),   # batch tiles across v7x's two TCs
    )(xp, w0p, b0p, wap, bap, wbp, bbp, wfp, bfp)

    return out[:b, :NUM_CLASSES]


def init_params(key, input_dim):
    """Deterministic init mimicking nn.Linear default (U[-1/sqrt(fan_in), +])."""
    ks = jax.random.split(key, 8)

    def uni(k, shape, fan_in):
        bound = 1.0 / float(fan_in) ** 0.5
        return jax.random.uniform(k, shape, jnp.float32, -bound, bound)

    w0 = uni(ks[0], (input_dim, HIDDEN_DIM), input_dim)            # pre-transposed
    b0 = uni(ks[1], (HIDDEN_DIM,), input_dim)
    wa = uni(ks[2], (NUM_BLOCKS, HIDDEN_DIM, HIDDEN_DIM), HIDDEN_DIM)
    ba = uni(ks[3], (NUM_BLOCKS, HIDDEN_DIM), HIDDEN_DIM)
    wb = uni(ks[4], (NUM_BLOCKS, HIDDEN_DIM, HIDDEN_DIM), HIDDEN_DIM)
    bb = uni(ks[5], (NUM_BLOCKS, HIDDEN_DIM), HIDDEN_DIM)
    wf = uni(ks[6], (HIDDEN_DIM, NUM_CLASSES), HIDDEN_DIM)
    bf = uni(ks[7], (NUM_CLASSES,), HIDDEN_DIM)
    return (w0, b0, wa, ba, wb, bb, wf, bf)


def reference_forward(x_img, params, weight_dtype=jnp.float32):
    """Pure-JAX reference with identical semantics (residual MLP)."""
    w0, b0, wa, ba, wb, bb, wf, bf = params
    x = x_img.reshape(x_img.shape[0], -1)

    def dot(a, w):
        return jnp.dot(a.astype(weight_dtype), w.astype(weight_dtype),
                       preferred_element_type=jnp.float32)

    h = jnp.maximum(dot(x, w0) + b0, 0.0)
    for i in range(NUM_BLOCKS):
        t = jnp.maximum(dot(h, wa[i]) + ba[i], 0.0)
        t = dot(t, wb[i]) + bb[i]
        h = jnp.maximum(h + t, 0.0)
    return dot(h, wf) + bf


if __name__ == "__main__":
    # Small shapes consistent with the module's forward: (b, 3, H, W).
    B, H, W = 32, 16, 16
    input_dim = 3 * H * W

    key = jax.random.PRNGKey(0)
    kx, kp = jax.random.split(key)
    x = jax.random.normal(kx, (B, 3, H, W), jnp.float32)
    params = init_params(kp, input_dim)

    # f32 weights (matches the torch module's numerics).
    out = jax.block_until_ready(mlp_classifier_deep_residual(x, params))
    ref = reference_forward(x, params)
    assert out.shape == (B, NUM_CLASSES)
    assert jnp.allclose(out, ref, atol=2e-3, rtol=2e-3), "f32 mismatch vs reference"

    # bf16 weight/activation fast path (v6e/v7x); compared against a reference
    # that applies the same bf16 casting with f32 accumulation.
    out_bf16 = jax.block_until_ready(
        mlp_classifier_deep_residual(x, params, weight_dtype=jnp.bfloat16))
    ref_bf16 = reference_forward(x, params, weight_dtype=jnp.bfloat16)
    assert out_bf16.shape == (B, NUM_CLASSES)
    assert jnp.allclose(out_bf16, ref_bf16, atol=5e-3, rtol=5e-3), "bf16 mismatch vs reference"

    print("KERNEL_OK")
</pallas_src>

<mosaic_0001>
module attributes {stable_mosaic.version = 11 : i64} {
  func.func @_mlp_residual_kernel(%arg0: i32, %arg1: memref<32x768xf32, #tpu.memory_space<vmem>>, %arg2: memref<768x256xf32, #tpu.memory_space<vmem>>, %arg3: memref<1x256xf32, #tpu.memory_space<vmem>>, %arg4: memref<5x256x256xf32, #tpu.memory_space<vmem>>, %arg5: memref<5x1x256xf32, #tpu.memory_space<vmem>>, %arg6: memref<5x256x256xf32, #tpu.memory_space<vmem>>, %arg7: memref<5x1x256xf32, #tpu.memory_space<vmem>>, %arg8: memref<256x128xf32, #tpu.memory_space<vmem>>, %arg9: memref<1x128xf32, #tpu.memory_space<vmem>>, %arg10: memref<32x128xf32, #tpu.memory_space<vmem>>) attributes {dimension_semantics = [#tpu.dimension_semantics<parallel>], iteration_bounds = array<i64: 1>, scalar_prefetch = 0 : i64, scratch_operands = 0 : i64, tpu.core_type = #tpu.core_type<tc>, window_params = [{transform_indices = @transform_0, window_bounds = array<i64: 32, 768>}, {pipeline_mode = #tpu.pipeline_mode<synchronous>, transform_indices = @transform_1, window_bounds = array<i64: 768, 256>}, {pipeline_mode = #tpu.pipeline_mode<synchronous>, transform_indices = @transform_2, window_bounds = array<i64: 1, 256>}, {pipeline_mode = #tpu.pipeline_mode<synchronous>, transform_indices = @transform_3, window_bounds = array<i64: 5, 256, 256>}, {pipeline_mode = #tpu.pipeline_mode<synchronous>, transform_indices = @transform_4, window_bounds = array<i64: 5, 1, 256>}, {pipeline_mode = #tpu.pipeline_mode<synchronous>, transform_indices = @transform_5, window_bounds = array<i64: 5, 256, 256>}, {pipeline_mode = #tpu.pipeline_mode<synchronous>, transform_indices = @transform_6, window_bounds = array<i64: 5, 1, 256>}, {pipeline_mode = #tpu.pipeline_mode<synchronous>, transform_indices = @transform_7, window_bounds = array<i64: 256, 128>}, {pipeline_mode = #tpu.pipeline_mode<synchronous>, transform_indices = @transform_8, window_bounds = array<i64: 1, 128>}, {transform_indices = @transform_9, window_bounds = array<i64: 32, 128>}]} {
    %c0 = arith.constant 0 : index
    %c0_0 = arith.constant 0 : index
    %0 = vector.load %arg1[%c0, %c0_0] : memref<32x768xf32, #tpu.memory_space<vmem>>, vector<32x768xf32>
    %c0_1 = arith.constant 0 : index
    %c0_2 = arith.constant 0 : index
    %1 = vector.load %arg2[%c0_1, %c0_2] : memref<768x256xf32, #tpu.memory_space<vmem>>, vector<768x256xf32>
    %cst = arith.constant dense<0.000000e+00> : vector<32x256xf32>
    %2 = tpu.matmul %0, %1, %cst {dimension_numbers = #tpu.dot_dimension_numbers<[1], [0], [0], [1], [0, 0, 1, 1], [], []>} : vector<32x768xf32>, vector<768x256xf32>, vector<32x256xf32> -> vector<32x256xf32>
    %c0_3 = arith.constant 0 : index
    %c0_4 = arith.constant 0 : index
    %3 = vector.load %arg3[%c0_3, %c0_4] : memref<1x256xf32, #tpu.memory_space<vmem>>, vector<1x256xf32>
    %4 = vector.broadcast %3 : vector<1x256xf32> to vector<32x256xf32>
    %5 = arith.addf %2, %4 : vector<32x256xf32>
    %cst_5 = arith.constant 0.000000e+00 : f32
    %6 = vector.broadcast %cst_5 : f32 to vector<32x256xf32>
    %7 = arith.maximumf %5, %6 : vector<32x256xf32>
    %c0_6 = arith.constant 0 : index
    %c0_7 = arith.constant 0 : index
    %c0_8 = arith.constant 0 : index
    %8 = vector.load %arg4[%c0_6, %c0_7, %c0_8] : memref<5x256x256xf32, #tpu.memory_space<vmem>>, vector<1x256x256xf32>
    %9 = vector.shape_cast %8 : vector<1x256x256xf32> to vector<256x256xf32>
    %cst_9 = arith.constant dense<0.000000e+00> : vector<32x256xf32>
    %10 = tpu.matmul %7, %9, %cst_9 {dimension_numbers = #tpu.dot_dimension_numbers<[1], [0], [0], [1], [0, 0, 1, 1], [], []>} : vector<32x256xf32>, vector<256x256xf32>, vector<32x256xf32> -> vector<32x256xf32>
    %c0_10 = arith.constant 0 : index
    %c0_11 = arith.constant 0 : index
    %c0_12 = arith.constant 0 : index
    %11 = vector.load %arg5[%c0_10, %c0_11, %c0_12] : memref<5x1x256xf32, #tpu.memory_space<vmem>>, vector<1x1x256xf32>
    %12 = vector.shape_cast %11 : vector<1x1x256xf32> to vector<1x256xf32>
    %13 = vector.broadcast %12 : vector<1x256xf32> to vector<32x256xf32>
    %14 = arith.addf %10, %13 : vector<32x256xf32>
    %cst_13 = arith.constant 0.000000e+00 : f32
    %15 = vector.broadcast %cst_13 : f32 to vector<32x256xf32>
    %16 = arith.maximumf %14, %15 : vector<32x256xf32>
    %c0_14 = arith.constant 0 : index
    %c0_15 = arith.constant 0 : index
    %c0_16 = arith.constant 0 : index
    %17 = vector.load %arg6[%c0_14, %c0_15, %c0_16] : memref<5x256x256xf32, #tpu.memory_space<vmem>>, vector<1x256x256xf32>
    %18 = vector.shape_cast %17 : vector<1x256x256xf32> to vector<256x256xf32>
    %cst_17 = arith.constant dense<0.000000e+00> : vector<32x256xf32>
    %19 = tpu.matmul %16, %18, %cst_17 {dimension_numbers = #tpu.dot_dimension_numbers<[1], [0], [0], [1], [0, 0, 1, 1], [], []>} : vector<32x256xf32>, vector<256x256xf32>, vector<32x256xf32> -> vector<32x256xf32>
    %c0_18 = arith.constant 0 : index
    %c0_19 = arith.constant 0 : index
    %c0_20 = arith.constant 0 : index
    %20 = vector.load %arg7[%c0_18, %c0_19, %c0_20] : memref<5x1x256xf32, #tpu.memory_space<vmem>>, vector<1x1x256xf32>
    %21 = vector.shape_cast %20 : vector<1x1x256xf32> to vector<1x256xf32>
    %22 = vector.broadcast %21 : vector<1x256xf32> to vector<32x256xf32>
    %23 = arith.addf %19, %22 : vector<32x256xf32>
    %24 = arith.addf %7, %23 : vector<32x256xf32>
    %cst_21 = arith.constant 0.000000e+00 : f32
    %25 = vector.broadcast %cst_21 : f32 to vector<32x256xf32>
    %26 = arith.maximumf %24, %25 : vector<32x256xf32>
    %c1 = arith.constant 1 : index
    %c0_22 = arith.constant 0 : index
    %c0_23 = arith.constant 0 : index
    %27 = vector.load %arg4[%c1, %c0_22, %c0_23] : memref<5x256x256xf32, #tpu.memory_space<vmem>>, vector<1x256x256xf32>
    %28 = vector.shape_cast %27 : vector<1x256x256xf32> to vector<256x256xf32>
    %cst_24 = arith.constant dense<0.000000e+00> : vector<32x256xf32>
    %29 = tpu.matmul %26, %28, %cst_24 {dimension_numbers = #tpu.dot_dimension_numbers<[1], [0], [0], [1], [0, 0, 1, 1], [], []>} : vector<32x256xf32>, vector<256x256xf32>, vector<32x256xf32> -> vector<32x256xf32>
    %c1_25 = arith.constant 1 : index
    %c0_26 = arith.constant 0 : index
    %c0_27 = arith.constant 0 : index
    %30 = vector.load %arg5[%c1_25, %c0_26, %c0_27] : memref<5x1x256xf32, #tpu.memory_space<vmem>>, vector<1x1x256xf32>
    %31 = vector.shape_cast %30 : vector<1x1x256xf32> to vector<1x256xf32>
    %32 = vector.broadcast %31 : vector<1x256xf32> to vector<32x256xf32>
    %33 = arith.addf %29, %32 : vector<32x256xf32>
    %cst_28 = arith.constant 0.000000e+00 : f32
    %34 = vector.broadcast %cst_28 : f32 to vector<32x256xf32>
    %35 = arith.maximumf %33, %34 : vector<32x256xf32>
    %c1_29 = arith.constant 1 : index
    %c0_30 = arith.constant 0 : index
    %c0_31 = arith.constant 0 : index
    %36 = vector.load %arg6[%c1_29, %c0_30, %c0_31] : memref<5x256x256xf32, #tpu.memory_space<vmem>>, vector<1x256x256xf32>
    %37 = vector.shape_cast %36 : vector<1x256x256xf32> to vector<256x256xf32>
    %cst_32 = arith.constant dense<0.000000e+00> : vector<32x256xf32>
    %38 = tpu.matmul %35, %37, %cst_32 {dimension_numbers = #tpu.dot_dimension_numbers<[1], [0], [0], [1], [0, 0, 1, 1], [], []>} : vector<32x256xf32>, vector<256x256xf32>, vector<32x256xf32> -> vector<32x256xf32>
    %c1_33 = arith.constant 1 : index
    %c0_34 = arith.constant 0 : index
    %c0_35 = arith.constant 0 : index
    %39 = vector.load %arg7[%c1_33, %c0_34, %c0_35] : memref<5x1x256xf32, #tpu.memory_space<vmem>>, vector<1x1x256xf32>
    %40 = vector.shape_cast %39 : vector<1x1x256xf32> to vector<1x256xf32>
    %41 = vector.broadcast %40 : vector<1x256xf32> to vector<32x256xf32>
    %42 = arith.addf %38, %41 : vector<32x256xf32>
    %43 = arith.addf %26, %42 : vector<32x256xf32>
    %cst_36 = arith.constant 0.000000e+00 : f32
    %44 = vector.broadcast %cst_36 : f32 to vector<32x256xf32>
    %45 = arith.maximumf %43, %44 : vector<32x256xf32>
    %c2 = arith.constant 2 : index
    %c0_37 = arith.constant 0 : index
    %c0_38 = arith.constant 0 : index
    %46 = vector.load %arg4[%c2, %c0_37, %c0_38] : memref<5x256x256xf32, #tpu.memory_space<vmem>>, vector<1x256x256xf32>
    %47 = vector.shape_cast %46 : vector<1x256x256xf32> to vector<256x256xf32>
    %cst_39 = arith.constant dense<0.000000e+00> : vector<32x256xf32>
    %48 = tpu.matmul %45, %47, %cst_39 {dimension_numbers = #tpu.dot_dimension_numbers<[1], [0], [0], [1], [0, 0, 1, 1], [], []>} : vector<32x256xf32>, vector<256x256xf32>, vector<32x256xf32> -> vector<32x256xf32>
    %c2_40 = arith.constant 2 : index
    %c0_41 = arith.constant 0 : index
    %c0_42 = arith.constant 0 : index
    %49 = vector.load %arg5[%c2_40, %c0_41, %c0_42] : memref<5x1x256xf32, #tpu.memory_space<vmem>>, vector<1x1x256xf32>
    %50 = vector.shape_cast %49 : vector<1x1x256xf32> to vector<1x256xf32>
    %51 = vector.broadcast %50 : vector<1x256xf32> to vector<32x256xf32>
    %52 = arith.addf %48, %51 : vector<32x256xf32>
    %cst_43 = arith.constant 0.000000e+00 : f32
    %53 = vector.broadcast %cst_43 : f32 to vector<32x256xf32>
    %54 = arith.maximumf %52, %53 : vector<32x256xf32>
    %c2_44 = arith.constant 2 : index
    %c0_45 = arith.constant 0 : index
    %c0_46 = arith.constant 0 : index
    %55 = vector.load %arg6[%c2_44, %c0_45, %c0_46] : memref<5x256x256xf32, #tpu.memory_space<vmem>>, vector<1x256x256xf32>
    %56 = vector.shape_cast %55 : vector<1x256x256xf32> to vector<256x256xf32>
    %cst_47 = arith.constant dense<0.000000e+00> : vector<32x256xf32>
    %57 = tpu.matmul %54, %56, %cst_47 {dimension_numbers = #tpu.dot_dimension_numbers<[1], [0], [0], [1], [0, 0, 1, 1], [], []>} : vector<32x256xf32>, vector<256x256xf32>, vector<32x256xf32> -> vector<32x256xf32>
    %c2_48 = arith.constant 2 : index
    %c0_49 = arith.constant 0 : index
    %c0_50 = arith.constant 0 : index
    %58 = vector.load %arg7[%c2_48, %c0_49, %c0_50] : memref<5x1x256xf32, #tpu.memory_space<vmem>>, vector<1x1x256xf32>
    %59 = vector.shape_cast %58 : vector<1x1x256xf32> to vector<1x256xf32>
    %60 = vector.broadcast %59 : vector<1x256xf32> to vector<32x256xf32>
    %61 = arith.addf %57, %60 : vector<32x256xf32>
    %62 = arith.addf %45, %61 : vector<32x256xf32>
    %cst_51 = arith.constant 0.000000e+00 : f32
    %63 = vector.broadcast %cst_51 : f32 to vector<32x256xf32>
    %64 = arith.maximumf %62, %63 : vector<32x256xf32>
    %c3 = arith.constant 3 : index
    %c0_52 = arith.constant 0 : index
    %c0_53 = arith.constant 0 : index
    %65 = vector.load %arg4[%c3, %c0_52, %c0_53] : memref<5x256x256xf32, #tpu.memory_space<vmem>>, vector<1x256x256xf32>
    %66 = vector.shape_cast %65 : vector<1x256x256xf32> to vector<256x256xf32>
    %cst_54 = arith.constant dense<0.000000e+00> : vector<32x256xf32>
    %67 = tpu.matmul %64, %66, %cst_54 {dimension_numbers = #tpu.dot_dimension_numbers<[1], [0], [0], [1], [0, 0, 1, 1], [], []>} : vector<32x256xf32>, vector<256x256xf32>, vector<32x256xf32> -> vector<32x256xf32>
    %c3_55 = arith.constant 3 : index
    %c0_56 = arith.constant 0 : index
    %c0_57 = arith.constant 0 : index
    %68 = vector.load %arg5[%c3_55, %c0_56, %c0_57] : memref<5x1x256xf32, #tpu.memory_space<vmem>>, vector<1x1x256xf32>
    %69 = vector.shape_cast %68 : vector<1x1x256xf32> to vector<1x256xf32>
    %70 = vector.broadcast %69 : vector<1x256xf32> to vector<32x256xf32>
    %71 = arith.addf %67, %70 : vector<32x256xf32>
    %cst_58 = arith.constant 0.000000e+00 : f32
    %72 = vector.broadcast %cst_58 : f32 to vector<32x256xf32>
    %73 = arith.maximumf %71, %72 : vector<32x256xf32>
    %c3_59 = arith.constant 3 : index
    %c0_60 = arith.constant 0 : index
    %c0_61 = arith.constant 0 : index
    %74 = vector.load %arg6[%c3_59, %c0_60, %c0_61] : memref<5x256x256xf32, #tpu.memory_space<vmem>>, vector<1x256x256xf32>
    %75 = vector.shape_cast %74 : vector<1x256x256xf32> to vector<256x256xf32>
    %cst_62 = arith.constant dense<0.000000e+00> : vector<32x256xf32>
    %76 = tpu.matmul %73, %75, %cst_62 {dimension_numbers = #tpu.dot_dimension_numbers<[1], [0], [0], [1], [0, 0, 1, 1], [], []>} : vector<32x256xf32>, vector<256x256xf32>, vector<32x256xf32> -> vector<32x256xf32>
    %c3_63 = arith.constant 3 : index
    %c0_64 = arith.constant 0 : index
    %c0_65 = arith.constant 0 : index
    %77 = vector.load %arg7[%c3_63, %c0_64, %c0_65] : memref<5x1x256xf32, #tpu.memory_space<vmem>>, vector<1x1x256xf32>
    %78 = vector.shape_cast %77 : vector<1x1x256xf32> to vector<1x256xf32>
    %79 = vector.broadcast %78 : vector<1x256xf32> to vector<32x256xf32>
    %80 = arith.addf %76, %79 : vector<32x256xf32>
    %81 = arith.addf %64, %80 : vector<32x256xf32>
    %cst_66 = arith.constant 0.000000e+00 : f32
    %82 = vector.broadcast %cst_66 : f32 to vector<32x256xf32>
    %83 = arith.maximumf %81, %82 : vector<32x256xf32>
    %c4 = arith.constant 4 : index
    %c0_67 = arith.constant 0 : index
    %c0_68 = arith.constant 0 : index
    %84 = vector.load %arg4[%c4, %c0_67, %c0_68] : memref<5x256x256xf32, #tpu.memory_space<vmem>>, vector<1x256x256xf32>
    %85 = vector.shape_cast %84 : vector<1x256x256xf32> to vector<256x256xf32>
    %cst_69 = arith.constant dense<0.000000e+00> : vector<32x256xf32>
    %86 = tpu.matmul %83, %85, %cst_69 {dimension_numbers = #tpu.dot_dimension_numbers<[1], [0], [0], [1], [0, 0, 1, 1], [], []>} : vector<32x256xf32>, vector<256x256xf32>, vector<32x256xf32> -> vector<32x256xf32>
    %c4_70 = arith.constant 4 : index
    %c0_71 = arith.constant 0 : index
    %c0_72 = arith.constant 0 : index
    %87 = vector.load %arg5[%c4_70, %c0_71, %c0_72] : memref<5x1x256xf32, #tpu.memory_space<vmem>>, vector<1x1x256xf32>
    %88 = vector.shape_cast %87 : vector<1x1x256xf32> to vector<1x256xf32>
    %89 = vector.broadcast %88 : vector<1x256xf32> to vector<32x256xf32>
    %90 = arith.addf %86, %89 : vector<32x256xf32>
    %cst_73 = arith.constant 0.000000e+00 : f32
    %91 = vector.broadcast %cst_73 : f32 to vector<32x256xf32>
    %92 = arith.maximumf %90, %91 : vector<32x256xf32>
    %c4_74 = arith.constant 4 : index
    %c0_75 = arith.constant 0 : index
    %c0_76 = arith.constant 0 : index
    %93 = vector.load %arg6[%c4_74, %c0_75, %c0_76] : memref<5x256x256xf32, #tpu.memory_space<vmem>>, vector<1x256x256xf32>
    %94 = vector.shape_cast %93 : vector<1x256x256xf32> to vector<256x256xf32>
    %cst_77 = arith.constant dense<0.000000e+00> : vector<32x256xf32>
    %95 = tpu.matmul %92, %94, %cst_77 {dimension_numbers = #tpu.dot_dimension_numbers<[1], [0], [0], [1], [0, 0, 1, 1], [], []>} : vector<32x256xf32>, vector<256x256xf32>, vector<32x256xf32> -> vector<32x256xf32>
    %c4_78 = arith.constant 4 : index
    %c0_79 = arith.constant 0 : index
    %c0_80 = arith.constant 0 : index
    %96 = vector.load %arg7[%c4_78, %c0_79, %c0_80] : memref<5x1x256xf32, #tpu.memory_space<vmem>>, vector<1x1x256xf32>
    %97 = vector.shape_cast %96 : vector<1x1x256xf32> to vector<1x256xf32>
    %98 = vector.broadcast %97 : vector<1x256xf32> to vector<32x256xf32>
    %99 = arith.addf %95, %98 : vector<32x256xf32>
    %100 = arith.addf %83, %99 : vector<32x256xf32>
    %cst_81 = arith.constant 0.000000e+00 : f32
    %101 = vector.broadcast %cst_81 : f32 to vector<32x256xf32>
    %102 = arith.maximumf %100, %101 : vector<32x256xf32>
    %c0_82 = arith.constant 0 : index
    %c0_83 = arith.constant 0 : index
    %103 = vector.load %arg8[%c0_82, %c0_83] : memref<256x128xf32, #tpu.memory_space<vmem>>, vector<256x128xf32>
    %cst_84 = arith.constant dense<0.000000e+00> : vector<32x128xf32>
    %104 = tpu.matmul %102, %103, %cst_84 {dimension_numbers = #tpu.dot_dimension_numbers<[1], [0], [0], [1], [0, 0, 1, 1], [], []>} : vector<32x256xf32>, vector<256x128xf32>, vector<32x128xf32> -> vector<32x128xf32>
    %c0_85 = arith.constant 0 : index
    %c0_86 = arith.constant 0 : index
    %105 = vector.load %arg9[%c0_85, %c0_86] : memref<1x128xf32, #tpu.memory_space<vmem>>, vector<1x128xf32>
    %106 = vector.broadcast %105 : vector<1x128xf32> to vector<32x128xf32>
    %107 = arith.addf %104, %106 : vector<32x128xf32>
    %c0_87 = arith.constant 0 : index
    %c0_88 = arith.constant 0 : index
    %108 = vector.load %arg10[%c0_87, %c0_88] : memref<32x128xf32, #tpu.memory_space<vmem>>, vector<32x128xf32>
    tpu.vector_store %arg10[%c0_87, %c0_88], %107 {strides = array<i32>} : memref<32x128xf32, #tpu.memory_space<vmem>>, vector<32x128xf32>,
    return
  }
  func.func @transform_0(%arg0: i32) -> (i32, i32) {
    %c0_i32 = arith.constant 0 : i32
    %c0_i32_0 = arith.constant 0 : i32
    return %arg0, %c0_i32 : i32, i32
  }
  func.func @transform_1(%arg0: i32) -> (i32, i32) {
    %c0_i32 = arith.constant 0 : i32
    %c0_i32_0 = arith.constant 0 : i32
    %c0_i32_1 = arith.constant 0 : i32
    return %c0_i32, %c0_i32_0 : i32, i32
  }
  func.func @transform_2(%arg0: i32) -> (i32, i32) {
    %c0_i32 = arith.constant 0 : i32
    %c0_i32_0 = arith.constant 0 : i32
    %c0_i32_1 = arith.constant 0 : i32
    return %c0_i32, %c0_i32_0 : i32, i32
  }
  func.func @transform_3(%arg0: i32) -> (i32, i32, i32) {
    %c0_i32 = arith.constant 0 : i32
    %c0_i32_0 = arith.constant 0 : i32
    %c0_i32_1 = arith.constant 0 : i32
    %c0_i32_2 = arith.constant 0 : i32
    return %c0_i32, %c0_i32_0, %c0_i32_1 : i32, i32, i32
  }
  func.func @transform_4(%arg0: i32) -> (i32, i32, i32) {
    %c0_i32 = arith.constant 0 : i32
    %c0_i32_0 = arith.constant 0 : i32
    %c0_i32_1 = arith.constant 0 : i32
    %c0_i32_2 = arith.constant 0 : i32
    return %c0_i32, %c0_i32_0, %c0_i32_1 : i32, i32, i32
  }
  func.func @transform_5(%arg0: i32) -> (i32, i32, i32) {
    %c0_i32 = arith.constant 0 : i32
    %c0_i32_0 = arith.constant 0 : i32
    %c0_i32_1 = arith.constant 0 : i32
    %c0_i32_2 = arith.constant 0 : i32
    return %c0_i32, %c0_i32_0, %c0_i32_1 : i32, i32, i32
  }
  func.func @transform_6(%arg0: i32) -> (i32, i32, i32) {
    %c0_i32 = arith.constant 0 : i32
    %c0_i32_0 = arith.constant 0 : i32
    %c0_i32_1 = arith.constant 0 : i32
    %c0_i32_2 = arith.constant 0 : i32
    return %c0_i32, %c0_i32_0, %c0_i32_1 : i32, i32, i32
  }
  func.func @transform_7(%arg0: i32) -> (i32, i32) {
    %c0_i32 = arith.constant 0 : i32
    %c0_i32_0 = arith.constant 0 : i32
    %c0_i32_1 = arith.constant 0 : i32
    return %c0_i32, %c0_i32_0 : i32, i32
  }
  func.func @transform_8(%arg0: i32) -> (i32, i32) {
    %c0_i32 = arith.constant 0 : i32
    %c0_i32_0 = arith.constant 0 : i32
    %c0_i32_1 = arith.constant 0 : i32
    return %c0_i32, %c0_i32_0 : i32, i32
  }
  func.func @transform_9(%arg0: i32) -> (i32, i32) {
    %c0_i32 = arith.constant 0 : i32
    %c0_i32_0 = arith.constant 0 : i32
    return %arg0, %c0_i32 : i32, i32
  }
}

</mosaic_0001>

<bundles_post_ra>
// kernel: tpu_custom_call.1
= control target key start
LH: loop header
LB: loop body
LE: loop exit
PB: predicated region body
PF: predicated region fallthrough
CT: control target
= control target key end

     0   :  { %14 = vsyncpa [#allocation3], 0  ;;  %s3274_s0 = inlined_call_operand.hbm [shape: f32[32,768], index: 0, kind: input, shape index: {}]   ;;  %s3275_s1 = inlined_call_operand.hbm [shape: f32[768,256], index: 1, kind: input, shape index: {}]   ;;  %s3276_s2 = inlined_call_operand.hbm [shape: f32[1,256], index: 2, kind: input, shape index: {}]   ;;  %s3277_s3 = inlined_call_operand.hbm [shape: f32[5,256,256], index: 3, kind: input, shape index: {}]   ;;  %s3278_s4 = inlined_call_operand.hbm [shape: f32[5,1,256], index: 4, kind: input, shape index: {}]   ;;  %s3279_s5 = inlined_call_operand.hbm [shape: f32[5,256,256], index: 5, kind: input, shape index: {}]   ;;  %s3280_s6 = inlined_call_operand.hbm [shape: f32[5,1,256], index: 6, kind: input, shape index: {}]   ;;  %s3281_s7 = inlined_call_operand.hbm [shape: f32[256,128], index: 7, kind: input, shape index: {}]   ;;  %s3282_s8 = inlined_call_operand.hbm [shape: f32[1,128], index: 8, kind: input, shape index: {}]   ;;  %s3283_s9 = inlined_call_operand.hbm [shape: f32[32,128], index: 9, kind: output, shape index: {}]  }
   0x1   :  { %15 = vsyncpa [#allocation6], 0 }
   0x2   :  { %16 = vsyncpa [#allocation9], 0 }
   0x3   :  { %17 = vsyncpa [#allocation12], 0 }
   0x4   :  { %18 = vsyncpa [#allocation15], 0 }
   0x5   :  { %19 = vsyncpa [#allocation4], 0  ;;  %s2864_s30 = smov [#allocation5]  }
   0x6   :  { %s37_s10 = sshll.u32 %s2864_s30, 4  ;;  %s38_s10 = int_to_ptr.vmem [resolvable:$true] %s37_s10 }
   0x7   :  { %s2660_s11 = scalar_lea.vmem %s38_s10, 24576  ;;  %p2665_p1 = scmp.lt.s32.totalorder %s38_s10, %s38_s10 }
   0x8   :  { %p2661_p0 = scmp.ne.s32.totalorder %s38_s10, %s2660_s11  ;;  %p2666_p2 = scmp.lt.s32.totalorder %s2660_s11, %s2660_s11 }
   0xa   :  { %p2667_p3 = por %p2666_p2, %p2665_p1 }
   0xc   :  { %p2668_p4 = pnand %p2667_p3, %p2661_p0 }
   0xe   :  { %2671 = shalt.err (!%p2668_p4)
}
   0xf   :  { %s2865_s12 = smov 256   ;;  %s2866_s13 = smov 16  }
  0x10   :  { %43 = dma.hbm_to_vmem [thread:$0]  %s3275_s1, 24576, %s38_s10, [#allocation6], %s2865_s12, %s2865_s12, %s2866_s13  }
  0x11   :  { %s2867_s16 = smov [#allocation8]   ;;  %s2868_s18 = smov [#allocation11]  }
  0x12   :  { %s59_s17 = sshll.u32 %s2867_s16, 4  ;;  %s83_s19 = sshll.u32 %s2868_s18, 4  ;;  %s60_s17 = int_to_ptr.vmem [resolvable:$true] %s59_s17  ;;  %s84_s19 = int_to_ptr.vmem [resolvable:$true] %s83_s19 }
  0x13   :  { %s2680_s20 = scalar_lea.vmem %s60_s17, 40960  ;;  %p2685_p6 = scmp.lt.s32.totalorder %s60_s17, %s60_s17 }
  0x14   :  { %p2681_p5 = scmp.ne.s32.totalorder %s60_s17, %s2680_s20  ;;  %p2686_p7 = scmp.lt.s32.totalorder %s2680_s20, %s2680_s20 }
  0x16   :  { %p2687_p8 = por %p2686_p7, %p2685_p6 }
  0x18   :  { %p2688_p9 = pnand %p2687_p8, %p2681_p5 }
  0x1a   :  { %2691 = shalt.err (!%p2688_p9)
}
  0x1b   :  { %65 = dma.hbm_to_vmem [thread:$0]  %s3277_s3, 40960, %s60_s17, [#allocation9], %s2865_s12, %s2865_s12, %s2866_s13  }
  0x1c   :  { %s2700_s23 = scalar_lea.vmem %s84_s19, 40960  ;;  %p2705_p11 = scmp.lt.s32.totalorder %s84_s19, %s84_s19 }
  0x1d   :  { %p2701_p10 = scmp.ne.s32.totalorder %s84_s19, %s2700_s23  ;;  %p2706_p12 = scmp.lt.s32.totalorder %s2700_s23, %s2700_s23 }
  0x1f   :  { %p2707_p13 = por %p2706_p12, %p2705_p11 }
  0x21   :  { %p2708_p0 = pnand %p2707_p13, %p2701_p10 }
  0x23   :  { %2711 = shalt.err (!%p2708_p0)
}
  0x24   :  { %89 = dma.hbm_to_vmem [thread:$0]  %s3279_s5, 40960, %s84_s19, [#allocation12], %s2865_s12, %s2865_s12, %s2866_s13  }
  0x25   :  { %s2869_s25 = smov [#allocation14]  }
  0x26   :  { %s107_s26 = sshll.u32 %s2869_s25, 4  ;;  %s108_s26 = int_to_ptr.vmem [resolvable:$true] %s107_s26 }
  0x27   :  { %s2720_s27 = scalar_lea.vmem %s108_s26, 4096  ;;  %p2725_p2 = scmp.lt.s32.totalorder %s108_s26, %s108_s26 }
  0x28   :  { %p2721_p1 = scmp.ne.s32.totalorder %s108_s26, %s2720_s27  ;;  %p2726_p3 = scmp.lt.s32.totalorder %s2720_s27, %s2720_s27 }
  0x2a   :  { %p2727_p4 = por %p2726_p3, %p2725_p2 }
  0x2c   :  { %p2728_p5 = pnand %p2727_p4, %p2721_p1 }
  0x2e   :  { %2731 = shalt.err (!%p2728_p5)
}
  0x2f   :  { %s2870_s3 = smov 128   ;;  %s2871_s28 = smov 8  }
  0x30   :  { %113 = dma.hbm_to_vmem [thread:$0]  %s3281_s7, 4096, %s108_s26, [#allocation15], %s2870_s3, %s2870_s3, %s2871_s28  }
  0x31   :  { %s2872_s5 = smov [#allocation2]  }
  0x32   :  { %s25_s10 = sshll.u32 %s2872_s5, 4  ;;  %s26_s10 = int_to_ptr.vmem [resolvable:$true] %s25_s10 }
  0x33   :  { %s2740_s11 = scalar_lea.vmem %s26_s10, 3072  ;;  %p2745_p7 = scmp.lt.s32.totalorder %s26_s10, %s26_s10 }
  0x34   :  { %p2741_p6 = scmp.ne.s32.totalorder %s26_s10, %s2740_s11  ;;  %p2746_p8 = scmp.lt.s32.totalorder %s2740_s11, %s2740_s11 }
  0x36   :  { %p2747_p9 = por %p2746_p8, %p2745_p7 }
  0x38   :  { %p2748_p10 = pnand %p2747_p9, %p2741_p6 }
  0x3a   :  { %2751 = shalt.err (!%p2748_p10)
}
  0x3b   :  { %s2873_s12 = smov 768   ;;  %s2874_s13 = smov 48  }
  0x3c   :  { %31 = dma.hbm_to_vmem [thread:$0]  %s3274_s0, 3072, %s26_s10, [#allocation3], %s2873_s12, %s2873_s12, %s2874_s13  }
  0x3d   :  { %s2875_s16 = smov [#allocation7]   ;;  %s2876_s7 = smov [#allocation10]  }
  0x3e   :  { %s50_s17 = sshll.u32 %s2875_s16, 4  ;;  %s71_s18 = sshll.u32 %s2876_s7, 4  ;;  %s51_s17 = int_to_ptr.vmem [resolvable:$true] %s50_s17  ;;  %s72_s18 = int_to_ptr.vmem [resolvable:$true] %s71_s18 }
  0x3f   :  { %s2760_s19 = scalar_lea.vmem %s51_s17, 32  ;;  %p2765_p12 = scmp.lt.s32.totalorder %s51_s17, %s51_s17 }
  0x40   :  { %p2761_p11 = scmp.ne.s32.totalorder %s51_s17, %s2760_s19  ;;  %p2766_p13 = scmp.lt.s32.totalorder %s2760_s19, %s2760_s19 }
  0x42   :  { %p2767_p0 = por %p2766_p13, %p2765_p12 }
  0x44   :  { %p2768_p1 = pnand %p2767_p0, %p2761_p11 }
  0x46   :  { %2771 = shalt.err (!%p2768_p1)
}
  0x47   :  { %53 = dma.hbm_to_vmem [thread:$0]  %s3276_s2, 32, %s51_s17, [#allocation6]  }
  0x48   :  { %s2780_s22 = scalar_lea.vmem %s72_s18, 160  ;;  %p2785_p3 = scmp.lt.s32.totalorder %s72_s18, %s72_s18 }
  0x49   :  { %p2781_p2 = scmp.ne.s32.totalorder %s72_s18, %s2780_s22  ;;  %p2786_p4 = scmp.lt.s32.totalorder %s2780_s22, %s2780_s22 }
  0x4b   :  { %p2787_p5 = por %p2786_p4, %p2785_p3 }
  0x4d   :  { %p2788_p6 = pnand %p2787_p5, %p2781_p2 }
  0x4f   :  { %2791 = shalt.err (!%p2788_p6)
}
  0x50   :  { %s2877_s0 = smov 32   ;;  %s2878_s23 = smov 2  }
  0x51   :  { %77 = dma.hbm_to_vmem [thread:$0]  %s3278_s4, 160, %s72_s18, [#allocation9], %s2877_s0, %s2877_s0, %s2878_s23  }
  0x52   :  { %s2879_s25 = smov [#allocation13]   ;;  %s2880_s27 = smov [#allocation16]  }
  0x53   :  { %s95_s26 = sshll.u32 %s2879_s25, 4  ;;  %s120_s29 = sshll.u32 %s2880_s27, 4  ;;  %s96_s26 = int_to_ptr.vmem [resolvable:$true] %s95_s26  ;;  %s121_s29 = int_to_ptr.vmem [resolvable:$true] %s120_s29 }
  0x54   :  { %s2800_s2 = scalar_lea.vmem %s96_s26, 160  ;;  %p2805_p8 = scmp.lt.s32.totalorder %s96_s26, %s96_s26 }
  0x55   :  { %p2801_p7 = scmp.ne.s32.totalorder %s96_s26, %s2800_s2  ;;  %p2806_p9 = scmp.lt.s32.totalorder %s2800_s2, %s2800_s2 }
  0x57   :  { %p2807_p10 = por %p2806_p9, %p2805_p8 }
  0x59   :  { %p2808_p11 = pnand %p2807_p10, %p2801_p7 }
  0x5b   :  { %2811 = shalt.err (!%p2808_p11)
}
  0x5c   :  { %101 = dma.hbm_to_vmem [thread:$0]  %s3280_s6, 160, %s96_s26, [#allocation12], %s2877_s0, %s2877_s0, %s2878_s23  }
  0x5d   :  { %s2820_s10 = scalar_lea.vmem %s121_s29, 16  ;;  %s2824_s4 = scalar_lea.vmem %s121_s29, 32 }
  0x5e   :  { %p2821_p12 = scmp.ne.s32.totalorder %s121_s29, %s2820_s10  ;;  %p2825_p13 = scmp.lt.s32.totalorder %s121_s29, %s121_s29 }
  0x5f   :  { %p2826_p0 = scmp.lt.s32.totalorder %s2824_s4, %s2820_s10 }
  0x61   :  { %p2827_p1 = por %p2826_p0, %p2825_p13 }
  0x63   :  { %p2828_p2 = pnand %p2827_p1, %p2821_p12 }
  0x65   :  { %2831 = shalt.err (!%p2828_p2)
}
  0x66   :  { %123 = dma.hbm_to_vmem [thread:$0]  %s3282_s8, 16, %s121_s29, [#allocation15]  }
  0x67   :  { %2852 = dma.done.wait [#allocation3], 3072  }
  0x68   :  { %2853 = vsyncadd [#allocation3], 4294964224 }
  0x69   :  { %2854 = dma.done.wait [#allocation6], 24608  }
  0x6a   :  { %2855 = vsyncadd [#allocation6], 4294942688 }
  0x6b   :  { %2856 = dma.done.wait [#allocation9], 41120  }
  0x6c   :  { %2857 = vsyncadd [#allocation9], 4294926176 }
  0x6d   :  { %2858 = dma.done.wait [#allocation12], 41120  }
  0x6e   :  { %2859 = vsyncadd [#allocation12], 4294926176 }
  0x6f   :  { %2860 = dma.done.wait [#allocation15], 4112  }
  0x70   :  { %2861 = vsyncadd [#allocation15], 4294963184  ;;  %v206_v0 = vld [vmem:[#allocation5 + $0xf8] sm:$0xff]  ;;  %v205_v1 = vld [vmem:[#allocation5 + $0xf0] sm:$0xff]  ;;  %s2881_s6 = smov [#allocation17]  }
  0x71   :  { %v204_v2 = vld [vmem:[#allocation5 + $0xe8] sm:$0xff]  ;;  %379 = vmatprep.subr.mxu0 %v206_v0  ;;  %v270_v3 = vld [vmem:[#allocation5 + $0x2f8] sm:$0xff]  ;;  %v203_v4 = vld [vmem:[#allocation5 + $0xe0] sm:$0xff]  ;;  %s2573_s8 = sshll.u32 %s2881_s6, 4  ;;  %s2574_s8 = int_to_ptr.vmem [resolvable:$true] %s2573_s8 }
  0x72   :  { %v269_v5 = vld [vmem:[#allocation5 + $0x2f0] sm:$0xff]  ;;  %380 = vmatpush1.msra.mxu0 %v205_v1  ;;  %468 = vmatprep.subr.mxu1 %v270_v3  ;;  %v202_v6 = vld [vmem:[#allocation5 + $0xd8] sm:$0xff]  ;;  %v268_v7 = vld [vmem:[#allocation5 + $0x2e8] sm:$0xff]  ;;  %s2832_s13 = scalar_lea.vmem %s2574_s8, 512  ;;  %p2837_p4 = scmp.lt.s32.totalorder %s2574_s8, %s2574_s8 }
  0x73   :  { %381 = vmatprep.subr.mxu0 %v204_v2  ;;  %469 = vmatpush1.msra.mxu1 %v269_v5  ;;  %v201_v8 = vld [vmem:[#allocation5 + $0xd0] sm:$0xff]  ;;  %v267_v9 = vld [vmem:[#allocation5 + $0x2e0] sm:$0xff]  ;;  %v266_v10 = vld [vmem:[#allocation5 + $0x2d8] sm:$0xff]  ;;  %p2833_p3 = scmp.ne.s32.totalorder %s2574_s8, %s2832_s13  ;;  %p2838_p5 = scmp.lt.s32.totalorder %s2832_s13, %s2832_s13 }
  0x74   :  { %382 = vmatpush1.msra.mxu0 %v203_v4  ;;  %470 = vmatprep.subr.mxu1 %v268_v7  ;;  %v200_v11 = vld [vmem:[#allocation5 + $0xc8] sm:$0xff]  ;;  %v265_v12 = vld [vmem:[#allocation5 + $0x2d0] sm:$0xff]  ;;  %v199_v13 = vld [vmem:[#allocation5 + $0xc0] sm:$0xff] }
  0x75   :  { %383 = vmatprep.subr.mxu0 %v202_v6  ;;  %471 = vmatpush1.msra.mxu1 %v267_v9  ;;  %v264_v14 = vld [vmem:[#allocation5 + $0x2c8] sm:$0xff]  ;;  %v198_v15 = vld [vmem:[#allocation5 + $0xb8] sm:$0xff]  ;;  %v263_v16 = vld [vmem:[#allocation5 + $0x2c0] sm:$0xff]  ;;  %p2839_p6 = por %p2838_p5, %p2837_p4 }
  0x76   :  { %384 = vmatpush1.msra.mxu0 %v201_v8  ;;  %472 = vmatprep.subr.mxu1 %v266_v10  ;;  %v197_v17 = vld [vmem:[#allocation5 + $0xb0] sm:$0xff]  ;;  %v262_v18 = vld [vmem:[#allocation5 + $0x2b8] sm:$0xff]  ;;  %v196_v19 = vld [vmem:[#allocation5 + $0xa8] sm:$0xff] }
  0x77   :  { %385 = vmatprep.subr.mxu0 %v200_v11  ;;  %473 = vmatpush1.msra.mxu1 %v265_v12  ;;  %v261_v20 = vld [vmem:[#allocation5 + $0x2b0] sm:$0xff]  ;;  %v195_v21 = vld [vmem:[#allocation5 + $0xa0] sm:$0xff]  ;;  %v260_v22 = vld [vmem:[#allocation5 + $0x2a8] sm:$0xff]  ;;  %p2840_p7 = pnand %p2839_p6, %p2833_p3 }
  0x78   :  { %386 = vmatpush1.msra.mxu0 %v199_v13  ;;  %474 = vmatprep.subr.mxu1 %v264_v14  ;;  %v194_v23 = vld [vmem:[#allocation5 + $0x98] sm:$0xff]  ;;  %v259_v24 = vld [vmem:[#allocation5 + $0x2a0] sm:$0xff]  ;;  %v193_v25 = vld [vmem:[#allocation5 + $0x90] sm:$0xff] }
  0x79   :  { %387 = vmatprep.subr.mxu0 %v198_v15  ;;  %475 = vmatpush1.msra.mxu1 %v263_v16  ;;  %v258_v26 = vld [vmem:[#allocation5 + $0x298] sm:$0xff]  ;;  %v192_v27 = vld [vmem:[#allocation5 + $0x88] sm:$0xff]  ;;  %v257_v28 = vld [vmem:[#allocation5 + $0x290] sm:$0xff] }
  0x7a   :  { %388 = vmatpush1.msra.mxu0 %v197_v17  ;;  %476 = vmatprep.subr.mxu1 %v262_v18  ;;  %v191_v29 = vld [vmem:[#allocation5 + $0x80] sm:$0xff]  ;;  %v256_v30 = vld [vmem:[#allocation5 + $0x288] sm:$0xff]  ;;  %v190_v31 = vld [vmem:[#allocation5 + $0x78] sm:$0xff] }
  0x7b   :  { %389 = vmatprep.subr.mxu0 %v196_v19  ;;  %477 = vmatpush1.msra.mxu1 %v261_v20  ;;  %v255_v32 = vld [vmem:[#allocation5 + $0x280] sm:$0xff]  ;;  %v189_v33 = vld [vmem:[#allocation5 + $0x70] sm:$0xff]  ;;  %v254_v34 = vld [vmem:[#allocation5 + $0x278] sm:$0xff] }
  0x7c   :  { %390 = vmatpush1.msra.mxu0 %v195_v21  ;;  %478 = vmatprep.subr.mxu1 %v260_v22  ;;  %v188_v35 = vld [vmem:[#allocation5 + $0x68] sm:$0xff]  ;;  %v253_v36 = vld [vmem:[#allocation5 + $0x270] sm:$0xff]  ;;  %v187_v37 = vld [vmem:[#allocation5 + $0x60] sm:$0xff] }
  0x7d   :  { %391 = vmatprep.subr.mxu0 %v194_v23  ;;  %479 = vmatpush1.msra.mxu1 %v259_v24  ;;  %v252_v38 = vld [vmem:[#allocation5 + $0x268] sm:$0xff]  ;;  %v186_v39 = vld [vmem:[#allocation5 + $0x58] sm:$0xff]  ;;  %v251_v40 = vld [vmem:[#allocation5 + $0x260] sm:$0xff] }
  0x7e   :  { %392 = vmatpush1.msra.mxu0 %v193_v25  ;;  %480 = vmatprep.subr.mxu1 %v258_v26  ;;  %v185_v41 = vld [vmem:[#allocation5 + $0x50] sm:$0xff]  ;;  %v250_v42 = vld [vmem:[#allocation5 + $0x258] sm:$0xff]  ;;  %v184_v43 = vld [vmem:[#allocation5 + $0x48] sm:$0xff] }
  0x7f   :  { %393 = vmatprep.subr.mxu0 %v192_v27  ;;  %481 = vmatpush1.msra.mxu1 %v257_v28  ;;  %v249_v44 = vld [vmem:[#allocation5 + $0x250] sm:$0xff]  ;;  %v183_v45 = vld [vmem:[#allocation5 + $0x40] sm:$0xff]  ;;  %v248_v46 = vld [vmem:[#allocation5 + $0x248] sm:$0xff] }
  0x80   :  { %394 = vmatpush1.msra.mxu0 %v191_v29  ;;  %482 = vmatprep.subr.mxu1 %v256_v30  ;;  %v182_v47 = vld [vmem:[#allocation5 + $0x38] sm:$0xff]  ;;  %v247_v48 = vld [vmem:[#allocation5 + $0x240] sm:$0xff]  ;;  %v181_v49 = vld [vmem:[#allocation5 + $0x30] sm:$0xff] }
  0x81   :  { %395 = vmatprep.subr.mxu0 %v190_v31  ;;  %483 = vmatpush1.msra.mxu1 %v255_v32  ;;  %v246_v50 = vld [vmem:[#allocation5 + $0x238] sm:$0xff]  ;;  %v180_v51 = vld [vmem:[#allocation5 + $0x28] sm:$0xff]  ;;  %v245_v52 = vld [vmem:[#allocation5 + $0x230] sm:$0xff] }
  0x82   :  { %396 = vmatpush1.msra.mxu0 %v189_v33  ;;  %484 = vmatprep.subr.mxu1 %v254_v34  ;;  %v179_v53 = vld [vmem:[#allocation5 + $0x20] sm:$0xff]  ;;  %v244_v54 = vld [vmem:[#allocation5 + $0x228] sm:$0xff]  ;;  %v178_v55 = vld [vmem:[#allocation5 + $0x18] sm:$0xff] }
  0x83   :  { %397 = vmatprep.subr.mxu0 %v188_v35  ;;  %485 = vmatpush1.msra.mxu1 %v253_v36  ;;  %v243_v56 = vld [vmem:[#allocation5 + $0x220] sm:$0xff]  ;;  %v177_v57 = vld [vmem:[#allocation5 + $0x10] sm:$0xff]  ;;  %v242_v58 = vld [vmem:[#allocation5 + $0x218] sm:$0xff] }
  0x84   :  { %398 = vmatpush1.msra.mxu0 %v187_v37  ;;  %486 = vmatprep.subr.mxu1 %v252_v38  ;;  %v176_v59 = vld [vmem:[#allocation5 + $0x8] sm:$0xff]  ;;  %v241_v60 = vld [vmem:[#allocation5 + $0x210] sm:$0xff]  ;;  %v175_v61 = vld [vmem:[#allocation5] sm:$0xff] }
  0x85   :  { %399 = vmatprep.subr.mxu0 %v186_v39  ;;  %487 = vmatpush1.msra.mxu1 %v251_v40  ;;  %v240_v62 = vld [vmem:[#allocation5 + $0x208] sm:$0xff]  ;;  %v238_v63 = vld [vmem:[#allocation5 + $0x1f8] sm:$0xff]  ;;  %v239_v0 = vld [vmem:[#allocation5 + $0x200] sm:$0xff] }
  0x86   :  { %400 = vmatpush1.msra.mxu0 %v185_v41  ;;  %488 = vmatprep.subr.mxu1 %v250_v42  ;;  %v237_v1 = vld [vmem:[#allocation5 + $0x1f0] sm:$0xff]  ;;  %v302_v2 = vld [vmem:[#allocation5 + $0x3f8] sm:$0xff]  ;;  %v236_v3 = vld [vmem:[#allocation5 + $0x1e8] sm:$0xff] }
  0x87   :  { %401 = vmatprep.subr.mxu0 %v184_v43  ;;  %489 = vmatpush1.msra.mxu1 %v249_v44  ;;  %v301_v4 = vld [vmem:[#allocation5 + $0x3f0] sm:$0xff]  ;;  %v235_v5 = vld [vmem:[#allocation5 + $0x1e0] sm:$0xff]  ;;  %v300_v6 = vld [vmem:[#allocation5 + $0x3e8] sm:$0xff] }
  0x88   :  { %402 = vmatpush1.msra.mxu0 %v183_v45  ;;  %490 = vmatprep.subr.mxu1 %v248_v46  ;;  %v234_v7 = vld [vmem:[#allocation5 + $0x1d8] sm:$0xff]  ;;  %v299_v8 = vld [vmem:[#allocation5 + $0x3e0] sm:$0xff]  ;;  %v233_v9 = vld [vmem:[#allocation5 + $0x1d0] sm:$0xff] }
  0x89   :  { %403 = vmatprep.subr.mxu0 %v182_v47  ;;  %491 = vmatpush1.msra.mxu1 %v247_v48  ;;  %v298_v10 = vld [vmem:[#allocation5 + $0x3d8] sm:$0xff]  ;;  %v232_v11 = vld [vmem:[#allocation5 + $0x1c8] sm:$0xff]  ;;  %v297_v12 = vld [vmem:[#allocation5 + $0x3d0] sm:$0xff] }
  0x8a   :  { %404 = vmatpush1.msra.mxu0 %v181_v49  ;;  %492 = vmatprep.subr.mxu1 %v246_v50  ;;  %v231_v13 = vld [vmem:[#allocation5 + $0x1c0] sm:$0xff]  ;;  %v296_v14 = vld [vmem:[#allocation5 + $0x3c8] sm:$0xff]  ;;  %v230_v15 = vld [vmem:[#allocation5 + $0x1b8] sm:$0xff] }
  0x8b   :  { %405 = vmatprep.subr.mxu0 %v180_v51  ;;  %493 = vmatpush1.msra.mxu1 %v245_v52  ;;  %v295_v16 = vld [vmem:[#allocation5 + $0x3c0] sm:$0xff]  ;;  %v229_v17 = vld [vmem:[#allocation5 + $0x1b0] sm:$0xff]  ;;  %v294_v18 = vld [vmem:[#allocation5 + $0x3b8] sm:$0xff] }
  0x8c   :  { %406 = vmatpush1.msra.mxu0 %v179_v53  ;;  %494 = vmatprep.subr.mxu1 %v244_v54  ;;  %v228_v19 = vld [vmem:[#allocation5 + $0x1a8] sm:$0xff]  ;;  %v293_v20 = vld [vmem:[#allocation5 + $0x3b0] sm:$0xff]  ;;  %v227_v21 = vld [vmem:[#allocation5 + $0x1a0] sm:$0xff] }
  0x8d   :  { %407 = vmatprep.subr.mxu0 %v178_v55  ;;  %495 = vmatpush1.msra.mxu1 %v243_v56  ;;  %v292_v22 = vld [vmem:[#allocation5 + $0x3a8] sm:$0xff]  ;;  %v226_v23 = vld [vmem:[#allocation5 + $0x198] sm:$0xff]  ;;  %v291_v24 = vld [vmem:[#allocation5 + $0x3a0] sm:$0xff] }
  0x8e   :  { %408 = vmatpush1.msra.mxu0 %v177_v57  ;;  %496 = vmatprep.subr.mxu1 %v242_v58  ;;  %v225_v25 = vld [vmem:[#allocation5 + $0x190] sm:$0xff]  ;;  %v290_v26 = vld [vmem:[#allocation5 + $0x398] sm:$0xff]  ;;  %v224_v27 = vld [vmem:[#allocation5 + $0x188] sm:$0xff] }
  0x8f   :  { %409 = vmatprep.subr.mxu0 %v176_v59  ;;  %497 = vmatpush1.msra.mxu1 %v241_v60  ;;  %v289_v28 = vld [vmem:[#allocation5 + $0x390] sm:$0xff]  ;;  %v223_v29 = vld [vmem:[#allocation5 + $0x180] sm:$0xff]  ;;  %v288_v30 = vld [vmem:[#allocation5 + $0x388] sm:$0xff] }
  0x90   :  { %410 = vmatpush1.msra.mxu0 %v175_v61  ;;  %498 = vmatprep.subr.mxu1 %v240_v62  ;;  %v222_v31 = vld [vmem:[#allocation5 + $0x178] sm:$0xff]  ;;  %v287_v32 = vld [vmem:[#allocation5 + $0x380] sm:$0xff]  ;;  %v221_v33 = vld [vmem:[#allocation5 + $0x170] sm:$0xff] }
  0x91   :  { %411 = vmatprep.subr.mxu0 %v238_v63  ;;  %499 = vmatpush1.msra.mxu1 %v239_v0  ;;  %v286_v34 = vld [vmem:[#allocation5 + $0x378] sm:$0xff]  ;;  %v220_v35 = vld [vmem:[#allocation5 + $0x168] sm:$0xff]  ;;  %v285_v36 = vld [vmem:[#allocation5 + $0x370] sm:$0xff] }
  0x92   :  { %412 = vmatpush2.msra.mxu0 %v237_v1  ;;  %500 = vmatprep.subr.mxu1 %v302_v2  ;;  %v219_v37 = vld [vmem:[#allocation5 + $0x160] sm:$0xff]  ;;  %v284_v38 = vld [vmem:[#allocation5 + $0x368] sm:$0xff]  ;;  %v218_v39 = vld [vmem:[#allocation5 + $0x158] sm:$0xff] }
  0x93   :  { %413 = vmatprep.subr.mxu0 %v236_v3  ;;  %501 = vmatpush2.msra.mxu1 %v301_v4  ;;  %v283_v40 = vld [vmem:[#allocation5 + $0x360] sm:$0xff]  ;;  %v217_v41 = vld [vmem:[#allocation5 + $0x150] sm:$0xff]  ;;  %v282_v42 = vld [vmem:[#allocation5 + $0x358] sm:$0xff] }
  0x94   :  { %414 = vmatpush2.msra.mxu0 %v235_v5  ;;  %502 = vmatprep.subr.mxu1 %v300_v6  ;;  %v216_v43 = vld [vmem:[#allocation5 + $0x148] sm:$0xff]  ;;  %v281_v44 = vld [vmem:[#allocation5 + $0x350] sm:$0xff]  ;;  %v215_v45 = vld [vmem:[#allocation5 + $0x140] sm:$0xff] }
  0x95   :  { %415 = vmatprep.subr.mxu0 %v234_v7  ;;  %503 = vmatpush2.msra.mxu1 %v299_v8  ;;  %v280_v46 = vld [vmem:[#allocation5 + $0x348] sm:$0xff]  ;;  %v214_v47 = vld [vmem:[#allocation5 + $0x138] sm:$0xff]  ;;  %v279_v48 = vld [vmem:[#allocation5 + $0x340] sm:$0xff] }
  0x96   :  { %416 = vmatpush2.msra.mxu0 %v233_v9  ;;  %504 = vmatprep.subr.mxu1 %v298_v10  ;;  %v213_v49 = vld [vmem:[#allocation5 + $0x130] sm:$0xff]  ;;  %v278_v50 = vld [vmem:[#allocation5 + $0x338] sm:$0xff]  ;;  %v212_v51 = vld [vmem:[#allocation5 + $0x128] sm:$0xff] }
  0x97   :  { %417 = vmatprep.subr.mxu0 %v232_v11  ;;  %505 = vmatpush2.msra.mxu1 %v297_v12  ;;  %v277_v52 = vld [vmem:[#allocation5 + $0x330] sm:$0xff]  ;;  %v211_v53 = vld [vmem:[#allocation5 + $0x120] sm:$0xff]  ;;  %v276_v54 = vld [vmem:[#allocation5 + $0x328] sm:$0xff] }
  0x98   :  { %418 = vmatpush2.msra.mxu0 %v231_v13  ;;  %506 = vmatprep.subr.mxu1 %v296_v14  ;;  %v210_v55 = vld [vmem:[#allocation5 + $0x118] sm:$0xff]  ;;  %v275_v56 = vld [vmem:[#allocation5 + $0x320] sm:$0xff]  ;;  %v209_v57 = vld [vmem:[#allocation5 + $0x110] sm:$0xff] }
  0x99   :  { %419 = vmatprep.subr.mxu0 %v230_v15  ;;  %507 = vmatpush2.msra.mxu1 %v295_v16  ;;  %v274_v58 = vld [vmem:[#allocation5 + $0x318] sm:$0xff]  ;;  %v208_v59 = vld [vmem:[#allocation5 + $0x108] sm:$0xff]  ;;  %v207_v61 = vld [vmem:[#allocation5 + $0x100] sm:$0xff] }
  0x9a   :  { %420 = vmatpush2.msra.mxu0 %v229_v17  ;;  %508 = vmatprep.subr.mxu1 %v294_v18  ;;  %v152_v60 = vld [vmem:[#allocation2 + $0x8] sm:$0xff]  ;;  %v273_v62 = vld [vmem:[#allocation5 + $0x310] sm:$0xff]  ;;  %v151_v63 = vld [vmem:[#allocation2] sm:$0xff] }
  0x9b   :  { %421 = vmatprep.subr.mxu0 %v228_v19  ;;  %509 = vmatpush2.msra.mxu1 %v293_v20  ;;  %v272_v0 = vld [vmem:[#allocation5 + $0x308] sm:$0xff]  ;;  %v334_v1 = vld [vmem:[#allocation5 + $0x4f8] sm:$0xff]  ;;  %v271_v2 = vld [vmem:[#allocation5 + $0x300] sm:$0xff] }
  0x9c   :  { %422 = vmatpush2.msra.mxu0 %v227_v21  ;;  %510 = vmatprep.subr.mxu1 %v292_v22  ;;  %v154_v3 = vld [vmem:[#allocation2 + $0x18] sm:$0xff]  ;;  %v333_v4 = vld [vmem:[#allocation5 + $0x4f0] sm:$0xff]  ;;  %v332_v6 = vld [vmem:[#allocation5 + $0x4e8] sm:$0xff] }
  0x9d   :  { %423 = vmatprep.subr.mxu0 %v226_v23  ;;  %511 = vmatpush2.msra.mxu1 %v291_v24  ;;  %v153_v5 = vld [vmem:[#allocation2 + $0x10] sm:$0xff]  ;;  %v331_v7 = vld [vmem:[#allocation5 + $0x4e0] sm:$0xff]  ;;  %v158_v8 = vld [vmem:[#allocation2 + $0x38] sm:$0xff] }
  0x9e   :  { %424 = vmatpush2.msra.mxu0 %v225_v25  ;;  %512 = vmatprep.subr.mxu1 %v290_v26  ;;  %v330_v9 = vld [vmem:[#allocation5 + $0x4d8] sm:$0xff]  ;;  %v157_v10 = vld [vmem:[#allocation2 + $0x30] sm:$0xff]  ;;  %v160_v12 = vld [vmem:[#allocation2 + $0x48] sm:$0xff] }
  0x9f   :  { %425 = vmatprep.subr.mxu0 %v224_v27  ;;  %513 = vmatpush2.msra.mxu1 %v289_v28  ;;  %v329_v11 = vld [vmem:[#allocation5 + $0x4d0] sm:$0xff]  ;;  %v328_v13 = vld [vmem:[#allocation5 + $0x4c8] sm:$0xff]  ;;  %v159_v14 = vld [vmem:[#allocation2 + $0x40] sm:$0xff] }
  0xa0   :  { %426 = vmatpush2.msra.mxu0 %v223_v29  ;;  %514 = vmatprep.subr.mxu1 %v288_v30  ;;  %v327_v15 = vld [vmem:[#allocation5 + $0x4c0] sm:$0xff]  ;;  %v164_v16 = vld [vmem:[#allocation2 + $0x68] sm:$0xff]  ;;  %v326_v17 = vld [vmem:[#allocation5 + $0x4b8] sm:$0xff] }
  0xa1   :  { %427 = vmatprep.subr.mxu0 %v222_v31  ;;  %515 = vmatpush2.msra.mxu1 %v287_v32  ;;  %v163_v18 = vld [vmem:[#allocation2 + $0x60] sm:$0xff]  ;;  %v325_v19 = vld [vmem:[#allocation5 + $0x4b0] sm:$0xff]  ;;  %v166_v20 = vld [vmem:[#allocation2 + $0x78] sm:$0xff] }
  0xa2   :  { %428 = vmatpush2.msra.mxu0 %v221_v33  ;;  %516 = vmatprep.subr.mxu1 %v286_v34  ;;  %v324_v21 = vld [vmem:[#allocation5 + $0x4a8] sm:$0xff]  ;;  %v165_v22 = vld [vmem:[#allocation2 + $0x70] sm:$0xff]  ;;  %v323_v23 = vld [vmem:[#allocation5 + $0x4a0] sm:$0xff] }
  0xa3   :  { %429 = vmatprep.subr.mxu0 %v220_v35  ;;  %517 = vmatpush2.msra.mxu1 %v285_v36  ;;  %v170_v24 = vld [vmem:[#allocation2 + $0x98] sm:$0xff]  ;;  %v169_v26 = vld [vmem:[#allocation2 + $0x90] sm:$0xff]  ;;  %v172_v28 = vld [vmem:[#allocation2 + $0xa8] sm:$0xff] }
  0xa4   :  { %430 = vmatpush2.msra.mxu0 %v219_v37  ;;  %518 = vmatprep.subr.mxu1 %v284_v38  ;;  %v322_v25 = vld [vmem:[#allocation5 + $0x498] sm:$0xff]  ;;  %v321_v27 = vld [vmem:[#allocation5 + $0x490] sm:$0xff]  ;;  %v320_v29 = vld [vmem:[#allocation5 + $0x488] sm:$0xff] }
  0xa5   :  { %431 = vmatprep.subr.mxu0 %v218_v39  ;;  %519 = vmatpush2.msra.mxu1 %v283_v40  ;;  %v171_v30 = vld [vmem:[#allocation2 + $0xa0] sm:$0xff]  ;;  %v156_v32 = vld [vmem:[#allocation2 + $0x28] sm:$0xff]  ;;  %v318_v33 = vld [vmem:[#allocation5 + $0x478] sm:$0xff] }
  0xa6   :  { %432 = vmatpush2.msra.mxu0 %v217_v41  ;;  %520 = vmatprep.subr.mxu1 %v282_v42  ;;  %v319_v31 = vld [vmem:[#allocation5 + $0x480] sm:$0xff]  ;;  %v317_v34 = vld [vmem:[#allocation5 + $0x470] sm:$0xff]  ;;  %v316_v35 = vld [vmem:[#allocation5 + $0x468] sm:$0xff] }
  0xa7   :  { %433 = vmatprep.subr.mxu0 %v216_v43  ;;  %521 = vmatpush2.msra.mxu1 %v281_v44  ;;  %v315_v36 = vld [vmem:[#allocation5 + $0x460] sm:$0xff]  ;;  %v314_v37 = vld [vmem:[#allocation5 + $0x458] sm:$0xff]  ;;  %v313_v38 = vld [vmem:[#allocation5 + $0x450] sm:$0xff] }
  0xa8   :  { %434 = vmatpush2.msra.mxu0 %v215_v45  ;;  %522 = vmatprep.subr.mxu1 %v280_v46  ;;  %v312_v39 = vld [vmem:[#allocation5 + $0x448] sm:$0xff]  ;;  %v311_v40 = vld [vmem:[#allocation5 + $0x440] sm:$0xff]  ;;  %v310_v41 = vld [vmem:[#allocation5 + $0x438] sm:$0xff] }
  0xa9   :  { %435 = vmatprep.subr.mxu0 %v214_v47  ;;  %523 = vmatpush2.msra.mxu1 %v279_v48  ;;  %v309_v42 = vld [vmem:[#allocation5 + $0x430] sm:$0xff]  ;;  %v308_v43 = vld [vmem:[#allocation5 + $0x428] sm:$0xff]  ;;  %v307_v44 = vld [vmem:[#allocation5 + $0x420] sm:$0xff] }
  0xaa   :  { %436 = vmatpush2.msra.mxu0 %v213_v49  ;;  %524 = vmatprep.subr.mxu1 %v278_v50  ;;  %v306_v45 = vld [vmem:[#allocation5 + $0x418] sm:$0xff]  ;;  %v305_v46 = vld [vmem:[#allocation5 + $0x410] sm:$0xff]  ;;  %v304_v47 = vld [vmem:[#allocation5 + $0x408] sm:$0xff] }
  0xab   :  { %437 = vmatprep.subr.mxu0 %v212_v51  ;;  %525 = vmatpush2.msra.mxu1 %v277_v52  ;;  %v303_v48 = vld [vmem:[#allocation5 + $0x400] sm:$0xff]  ;;  %v366_v49 = vld [vmem:[#allocation5 + $0x5f8] sm:$0xff]  ;;  %v365_v50 = vld [vmem:[#allocation5 + $0x5f0] sm:$0xff] }
  0xac   :  { %438 = vmatpush2.msra.mxu0 %v211_v53  ;;  %526 = vmatprep.subr.mxu1 %v276_v54  ;;  %v364_v51 = vld [vmem:[#allocation5 + $0x5e8] sm:$0xff]  ;;  %v363_v52 = vld [vmem:[#allocation5 + $0x5e0] sm:$0xff]  ;;  %v362_v53 = vld [vmem:[#allocation5 + $0x5d8] sm:$0xff] }
  0xad   :  { %439 = vmatprep.subr.mxu0 %v210_v55  ;;  %527 = vmatpush2.msra.mxu1 %v275_v56  ;;  %v361_v54 = vld [vmem:[#allocation5 + $0x5d0] sm:$0xff]  ;;  %v360_v55 = vld [vmem:[#allocation5 + $0x5c8] sm:$0xff]  ;;  %v359_v56 = vld [vmem:[#allocation5 + $0x5c0] sm:$0xff] }
  0xae   :  { %440 = vmatpush2.msra.mxu0 %v209_v57  ;;  %528 = vmatprep.subr.mxu1 %v274_v58  ;;  %v358_v57 = vld [vmem:[#allocation5 + $0x5b8] sm:$0xff]  ;;  %v357_v58 = vld [vmem:[#allocation5 + $0x5b0] sm:$0xff] }
  0xaf   :  { %441 = vmatprep.subr.mxu0 %v208_v59  ;;  %443 = vmatprep.mubr.f32.mxu0 %v152_v60  ;;  %v356_v59 = vld [vmem:[#allocation5 + $0x5a8] sm:$0xff]  ;;  %v355_v60 = vld [vmem:[#allocation5 + $0x5a0] sm:$0xff] }
  0xb0   :  { %442 = vmatpush2.msra.mxu0 %v207_v61  ;;  %529 = vmatpush2.msra.mxu1 %v273_v62  ;;  %v354_v61 = vld [vmem:[#allocation5 + $0x598] sm:$0xff]  ;;  %v353_v62 = vld [vmem:[#allocation5 + $0x590] sm:$0xff] }
  0xb1   :  { %444 = vmatmul.mubr.f32.vlgmr.msra.gmra.mxu0 %v151_v63  ;;  %530 = vmatprep.subr.mxu1 %v272_v0  ;;  %v352_v63 = vld [vmem:[#allocation5 + $0x588] sm:$0xff]  ;;  %v351_v0 = vld [vmem:[#allocation5 + $0x580] sm:$0xff] }
  0xb2   :  { %557 = vmatprep.subr.mxu0 %v334_v1  ;;  %531 = vmatpush2.msra.mxu1 %v271_v2  ;;  %v350_v1 = vld [vmem:[#allocation5 + $0x578] sm:$0xff]  ;;  %v349_v2 = vld [vmem:[#allocation5 + $0x570] sm:$0xff] }
  0xb3   :  { %532 = vmatprep.mubr.f32.mxu1 %v154_v3  ;;  %558 = vmatpush1.msra.mxu0 %v333_v4  ;;  %v348_v3 = vld [vmem:[#allocation5 + $0x568] sm:$0xff]  ;;  %v347_v4 = vld [vmem:[#allocation5 + $0x560] sm:$0xff] }
  0xb4   :  { %533 = vmatmul.mubr.f32.vlgmr.msra.gmra.mxu1 %v153_v5  ;;  %559 = vmatprep.subr.mxu0 %v332_v6  ;;  %v346_v5 = vld [vmem:[#allocation5 + $0x558] sm:$0xff]  ;;  %v345_v6 = vld [vmem:[#allocation5 + $0x550] sm:$0xff] }
  0xb5   :  { %560 = vmatpush1.msra.mxu0 %v331_v7  ;;  %449 = vmatprep.mubr.f32.mxu0 %v158_v8  ;;  %v344_v7 = vld [vmem:[#allocation5 + $0x548] sm:$0xff]  ;;  %v343_v8 = vld [vmem:[#allocation5 + $0x540] sm:$0xff] }
  0xb6   :  { %561 = vmatprep.subr.mxu0 %v330_v9  ;;  %450 = vmatmul.mubr.f32.gmra.mxu0 %v157_v10  ;;  %v342_v9 = vld [vmem:[#allocation5 + $0x538] sm:$0xff]  ;;  %v341_v10 = vld [vmem:[#allocation5 + $0x530] sm:$0xff] }
  0xb7   :  { %562 = vmatpush1.msra.mxu0 %v329_v11  ;;  %538 = vmatprep.mubr.f32.mxu1 %v160_v12  ;;  %v340_v11 = vld [vmem:[#allocation5 + $0x528] sm:$0xff]  ;;  %v339_v12 = vld [vmem:[#allocation5 + $0x520] sm:$0xff] }
  0xb8   :  { %563 = vmatprep.subr.mxu0 %v328_v13  ;;  %539 = vmatmul.mubr.f32.gmra.mxu1 %v159_v14  ;;  %v338_v13 = vld [vmem:[#allocation5 + $0x518] sm:$0xff]  ;;  %v337_v14 = vld [vmem:[#allocation5 + $0x510] sm:$0xff] }
  0xb9   :  { %564 = vmatpush1.msra.mxu0 %v327_v15  ;;  %455 = vmatprep.mubr.f32.mxu0 %v164_v16  ;;  %v336_v15 = vld [vmem:[#allocation5 + $0x508] sm:$0xff]  ;;  %v335_v16 = vld [vmem:[#allocation5 + $0x500] sm:$0xff] }
  0xba   :  { %565 = vmatprep.subr.mxu0 %v326_v17  ;;  %456 = vmatmul.mubr.f32.gmra.mxu0 %v163_v18  ;;  %v155_v17 = vld [vmem:[#allocation2 + $0x20] sm:$0xff]  ;;  %v162_v18 = vld [vmem:[#allocation2 + $0x58] sm:$0xff] }
  0xbb   :  { %566 = vmatpush1.msra.mxu0 %v325_v19  ;;  %544 = vmatprep.mubr.f32.mxu1 %v166_v20  ;;  %v161_v19 = vld [vmem:[#allocation2 + $0x50] sm:$0xff]  ;;  %v168_v20 = vld [vmem:[#allocation2 + $0x88] sm:$0xff] }
  0xbc   :  { %567 = vmatprep.subr.mxu0 %v324_v21  ;;  %545 = vmatmul.mubr.f32.gmra.mxu1 %v165_v22  ;;  %v167_v21 = vld [vmem:[#allocation2 + $0x80] sm:$0xff] }
  0xbd   :  { %568 = vmatpush1.msra.mxu0 %v323_v23  ;;  %461 = vmatprep.mubr.f32.mxu0 %v170_v24  ;;  %v685_v22 = vld [vmem:[#allocation8 + $0xf8] sm:$0xff]  ;;  %v684_v23 = vld [vmem:[#allocation8 + $0xf0] sm:$0xff]  ;;  %v683_v24 = vld [vmem:[#allocation8 + $0xe8] sm:$0xff] }
  0xbe   :  { %569 = vmatprep.subr.mxu0 %v322_v25  ;;  %462 = vmatmul.mubr.f32.gmra.mxu0 %v169_v26  ;;  %v174_v25 = vld [vmem:[#allocation2 + $0xb8] sm:$0xff]  ;;  %v682_v26 = vld [vmem:[#allocation8 + $0xe0] sm:$0xff] }
  0xbf   :  { %570 = vmatpush1.msra.mxu0 %v321_v27  ;;  %550 = vmatprep.mubr.f32.mxu1 %v172_v28  ;;  %v681_v27 = vld [vmem:[#allocation8 + $0xd8] sm:$0xff]  ;;  %v680_v28 = vld [vmem:[#allocation8 + $0xd0] sm:$0xff] }
  0xc0   :  { %571 = vmatprep.subr.mxu0 %v320_v29  ;;  %551 = vmatmul.mubr.f32.gmra.mxu1 %v171_v30  ;;  %v173_v29 = vld [vmem:[#allocation2 + $0xb0] sm:$0xff] }
  0xc1   :  { %572 = vmatpush1.msra.mxu0 %v319_v31  ;;  %621 = vmatprep.mubr.f32.mxu0 %v156_v32  ;;  %v679_v30 = vld [vmem:[#allocation8 + $0xc8] sm:$0xff]  ;;  %v678_v31 = vld [vmem:[#allocation8 + $0xc0] sm:$0xff]  ;;  %v677_v32 = vld [vmem:[#allocation8 + $0xb8] sm:$0xff] }
  0xc2   :  { %573 = vmatprep.subr.mxu0 %v318_v33  ;;  %730 = vmatprep.subr.mxu1 %v685_v22  ;;  %v676_v33 = vld [vmem:[#allocation8 + $0xb0] sm:$0xff]  ;;  %v687_v22 = vld [vmem:[#allocation8 + $0x108] sm:$0xff] }
  0xc3   :  { %574 = vmatpush1.msra.mxu0 %v317_v34  ;;  %731 = vmatpush1.msra.mxu1 %v684_v23  ;;  %v675_v34 = vld [vmem:[#allocation8 + $0xa8] sm:$0xff]  ;;  %v686_v23 = vld [vmem:[#allocation8 + $0x100] sm:$0xff] }
  0xc4   :  { %575 = vmatprep.subr.mxu0 %v316_v35  ;;  %732 = vmatprep.subr.mxu1 %v683_v24  ;;  %v674_v35 = vld [vmem:[#allocation8 + $0xa0] sm:$0xff] }
  0xc5   :  { %576 = vmatpush1.msra.mxu0 %v315_v36  ;;  %733 = vmatpush1.msra.mxu1 %v682_v26  ;;  %v673_v36 = vld [vmem:[#allocation8 + $0x98] sm:$0xff]  ;;  %v858_v24 = vld [vmem:[#allocation11 + $0xf8] sm:$0xff] }
  0xc6   :  { %577 = vmatprep.subr.mxu0 %v314_v37  ;;  %734 = vmatprep.subr.mxu1 %v681_v27  ;;  %v672_v37 = vld [vmem:[#allocation8 + $0x90] sm:$0xff] }
  0xc7   :  { %578 = vmatpush1.msra.mxu0 %v313_v38  ;;  %735 = vmatpush1.msra.mxu1 %v680_v28  ;;  %v671_v38 = vld [vmem:[#allocation8 + $0x88] sm:$0xff]  ;;  %v856_v26 = vld [vmem:[#allocation11 + $0xe8] sm:$0xff] }
  0xc8   :  { %579 = vmatprep.subr.mxu0 %v312_v39  ;;  %736 = vmatprep.subr.mxu1 %v679_v30  ;;  %v670_v39 = vld [vmem:[#allocation8 + $0x80] sm:$0xff]  ;;  %v855_v27 = vld [vmem:[#allocation11 + $0xe0] sm:$0xff]  ;;  %v852_v30 = vld [vmem:[#allocation11 + $0xc8] sm:$0xff] }
  0xc9   :  { %580 = vmatpush1.msra.mxu0 %v311_v40  ;;  %737 = vmatpush1.msra.mxu1 %v678_v31  ;;  %v669_v40 = vld [vmem:[#allocation8 + $0x78] sm:$0xff]  ;;  %v854_v28 = vld [vmem:[#allocation11 + $0xd8] sm:$0xff]  ;;  %v851_v31 = vld [vmem:[#allocation11 + $0xc0] sm:$0xff] }
  0xca   :  { %581 = vmatprep.subr.mxu0 %v310_v41  ;;  %738 = vmatprep.subr.mxu1 %v677_v32  ;;  %v668_v41 = vld [vmem:[#allocation8 + $0x70] sm:$0xff]  ;;  %v850_v32 = vld [vmem:[#allocation11 + $0xb8] sm:$0xff] }
  0xcb   :  { %582 = vmatpush1.msra.mxu0 %v309_v42  ;;  %739 = vmatpush1.msra.mxu1 %v676_v33  ;;  %v667_v42 = vld [vmem:[#allocation8 + $0x68] sm:$0xff]  ;;  %v849_v33 = vld [vmem:[#allocation11 + $0xb0] sm:$0xff] }
  0xcc   :  { %583 = vmatprep.subr.mxu0 %v308_v43  ;;  %740 = vmatprep.subr.mxu1 %v675_v34  ;;  %v666_v43 = vld [vmem:[#allocation8 + $0x60] sm:$0xff]  ;;  %v848_v34 = vld [vmem:[#allocation11 + $0xa8] sm:$0xff] }
  0xcd   :  { %584 = vmatpush1.msra.mxu0 %v307_v44  ;;  %741 = vmatpush1.msra.mxu1 %v674_v35  ;;  %v665_v44 = vld [vmem:[#allocation8 + $0x58] sm:$0xff]  ;;  %v847_v35 = vld [vmem:[#allocation11 + $0xa0] sm:$0xff] }
  0xce   :  { %585 = vmatprep.subr.mxu0 %v306_v45  ;;  %742 = vmatprep.subr.mxu1 %v673_v36  ;;  %v664_v45 = vld [vmem:[#allocation8 + $0x50] sm:$0xff]  ;;  %v846_v36 = vld [vmem:[#allocation11 + $0x98] sm:$0xff] }
  0xcf   :  { %586 = vmatpush1.msra.mxu0 %v305_v46  ;;  %743 = vmatpush1.msra.mxu1 %v672_v37  ;;  %v663_v46 = vld [vmem:[#allocation8 + $0x48] sm:$0xff]  ;;  %v845_v37 = vld [vmem:[#allocation11 + $0x90] sm:$0xff] }
  0xd0   :  { %587 = vmatprep.subr.mxu0 %v304_v47  ;;  %744 = vmatprep.subr.mxu1 %v671_v38  ;;  %v662_v47 = vld [vmem:[#allocation8 + $0x40] sm:$0xff]  ;;  %v844_v38 = vld [vmem:[#allocation11 + $0x88] sm:$0xff] }
  0xd1   :  { %588 = vmatpush1.msra.mxu0 %v303_v48  ;;  %745 = vmatpush1.msra.mxu1 %v670_v39  ;;  %v661_v48 = vld [vmem:[#allocation8 + $0x38] sm:$0xff]  ;;  %v843_v39 = vld [vmem:[#allocation11 + $0x80] sm:$0xff] }
  0xd2   :  { %589 = vmatprep.subr.mxu0 %v366_v49  ;;  %746 = vmatprep.subr.mxu1 %v669_v40  ;;  %v660_v49 = vld [vmem:[#allocation8 + $0x30] sm:$0xff]  ;;  %v842_v40 = vld [vmem:[#allocation11 + $0x78] sm:$0xff] }
  0xd3   :  { %590 = vmatpush2.msra.mxu0 %v365_v50  ;;  %747 = vmatpush1.msra.mxu1 %v668_v41  ;;  %v659_v50 = vld [vmem:[#allocation8 + $0x28] sm:$0xff]  ;;  %v841_v41 = vld [vmem:[#allocation11 + $0x70] sm:$0xff] }
  0xd4   :  { %591 = vmatprep.subr.mxu0 %v364_v51  ;;  %748 = vmatprep.subr.mxu1 %v667_v42  ;;  %v658_v51 = vld [vmem:[#allocation8 + $0x20] sm:$0xff]  ;;  %v840_v42 = vld [vmem:[#allocation11 + $0x68] sm:$0xff] }
  0xd5   :  { %592 = vmatpush2.msra.mxu0 %v363_v52  ;;  %749 = vmatpush1.msra.mxu1 %v666_v43  ;;  %v657_v52 = vld [vmem:[#allocation8 + $0x18] sm:$0xff]  ;;  %v839_v43 = vld [vmem:[#allocation11 + $0x60] sm:$0xff] }
  0xd6   :  { %593 = vmatprep.subr.mxu0 %v362_v53  ;;  %750 = vmatprep.subr.mxu1 %v665_v44  ;;  %v656_v53 = vld [vmem:[#allocation8 + $0x10] sm:$0xff]  ;;  %v838_v44 = vld [vmem:[#allocation11 + $0x58] sm:$0xff] }
  0xd7   :  { %594 = vmatpush2.msra.mxu0 %v361_v54  ;;  %751 = vmatpush1.msra.mxu1 %v664_v45  ;;  %v655_v54 = vld [vmem:[#allocation8 + $0x8] sm:$0xff]  ;;  %v837_v45 = vld [vmem:[#allocation11 + $0x50] sm:$0xff] }
  0xd8   :  { %595 = vmatprep.subr.mxu0 %v360_v55  ;;  %752 = vmatprep.subr.mxu1 %v663_v46  ;;  %v654_v55 = vld [vmem:[#allocation8] sm:$0xff]  ;;  %v836_v46 = vld [vmem:[#allocation11 + $0x48] sm:$0xff] }
  0xd9   :  { %596 = vmatpush2.msra.mxu0 %v359_v56  ;;  %753 = vmatpush1.msra.mxu1 %v662_v47  ;;  %v717_v56 = vld [vmem:[#allocation8 + $0x1f8] sm:$0xff]  ;;  %v835_v47 = vld [vmem:[#allocation11 + $0x40] sm:$0xff] }
  0xda   :  { %597 = vmatprep.subr.mxu0 %v358_v57  ;;  %754 = vmatprep.subr.mxu1 %v661_v48  ;;  %v716_v57 = vld [vmem:[#allocation8 + $0x1f0] sm:$0xff]  ;;  %v834_v48 = vld [vmem:[#allocation11 + $0x38] sm:$0xff] }
  0xdb   :  { %598 = vmatpush2.msra.mxu0 %v357_v58  ;;  %755 = vmatpush1.msra.mxu1 %v660_v49  ;;  %v715_v58 = vld [vmem:[#allocation8 + $0x1e8] sm:$0xff]  ;;  %v833_v49 = vld [vmem:[#allocation11 + $0x30] sm:$0xff] }
  0xdc   :  { %599 = vmatprep.subr.mxu0 %v356_v59  ;;  %756 = vmatprep.subr.mxu1 %v659_v50  ;;  %v714_v59 = vld [vmem:[#allocation8 + $0x1e0] sm:$0xff]  ;;  %v832_v50 = vld [vmem:[#allocation11 + $0x28] sm:$0xff] }
  0xdd   :  { %600 = vmatpush2.msra.mxu0 %v355_v60  ;;  %757 = vmatpush1.msra.mxu1 %v658_v51  ;;  %v713_v60 = vld [vmem:[#allocation8 + $0x1d8] sm:$0xff]  ;;  %v831_v51 = vld [vmem:[#allocation11 + $0x20] sm:$0xff] }
  0xde   :  { %601 = vmatprep.subr.mxu0 %v354_v61  ;;  %758 = vmatprep.subr.mxu1 %v657_v52  ;;  %v712_v61 = vld [vmem:[#allocation8 + $0x1d0] sm:$0xff]  ;;  %v830_v52 = vld [vmem:[#allocation11 + $0x18] sm:$0xff] }
  0xdf   :  { %602 = vmatpush2.msra.mxu0 %v353_v62  ;;  %759 = vmatpush1.msra.mxu1 %v656_v53  ;;  %v711_v62 = vld [vmem:[#allocation8 + $0x1c8] sm:$0xff]  ;;  %v829_v53 = vld [vmem:[#allocation11 + $0x10] sm:$0xff] }
  0xe0   :  { %603 = vmatprep.subr.mxu0 %v352_v63  ;;  %760 = vmatprep.subr.mxu1 %v655_v54  ;;  %v710_v63 = vld [vmem:[#allocation8 + $0x1c0] sm:$0xff]  ;;  %v828_v54 = vld [vmem:[#allocation11 + $0x8] sm:$0xff] }
  0xe1   :  { %604 = vmatpush2.msra.mxu0 %v351_v0  ;;  %761 = vmatpush1.msra.mxu1 %v654_v55  ;;  %v709_v0 = vld [vmem:[#allocation8 + $0x1b8] sm:$0xff]  ;;  %v827_v55 = vld [vmem:[#allocation11] sm:$0xff] }
  0xe2   :  { %605 = vmatprep.subr.mxu0 %v350_v1  ;;  %762 = vmatprep.subr.mxu1 %v717_v56  ;;  %v708_v1 = vld [vmem:[#allocation8 + $0x1b0] sm:$0xff]  ;;  %v890_v56 = vld [vmem:[#allocation11 + $0x1f8] sm:$0xff] }
  0xe3   :  { %606 = vmatpush2.msra.mxu0 %v349_v2  ;;  %763 = vmatpush2.msra.mxu1 %v716_v57  ;;  %v707_v2 = vld [vmem:[#allocation8 + $0x1a8] sm:$0xff]  ;;  %v889_v57 = vld [vmem:[#allocation11 + $0x1f0] sm:$0xff] }
  0xe4   :  { %607 = vmatprep.subr.mxu0 %v348_v3  ;;  %764 = vmatprep.subr.mxu1 %v715_v58  ;;  %v706_v3 = vld [vmem:[#allocation8 + $0x1a0] sm:$0xff]  ;;  %v888_v58 = vld [vmem:[#allocation11 + $0x1e8] sm:$0xff] }
  0xe5   :  { %608 = vmatpush2.msra.mxu0 %v347_v4  ;;  %765 = vmatpush2.msra.mxu1 %v714_v59  ;;  %v705_v4 = vld [vmem:[#allocation8 + $0x198] sm:$0xff]  ;;  %v887_v59 = vld [vmem:[#allocation11 + $0x1e0] sm:$0xff] }
  0xe6   :  { %609 = vmatprep.subr.mxu0 %v346_v5  ;;  %766 = vmatprep.subr.mxu1 %v713_v60  ;;  %v704_v5 = vld [vmem:[#allocation8 + $0x190] sm:$0xff]  ;;  %v886_v60 = vld [vmem:[#allocation11 + $0x1d8] sm:$0xff] }
  0xe7   :  { %610 = vmatpush2.msra.mxu0 %v345_v6  ;;  %767 = vmatpush2.msra.mxu1 %v712_v61  ;;  %v703_v6 = vld [vmem:[#allocation8 + $0x188] sm:$0xff]  ;;  %v885_v61 = vld [vmem:[#allocation11 + $0x1d0] sm:$0xff] }
  0xe8   :  { %611 = vmatprep.subr.mxu0 %v344_v7  ;;  %768 = vmatprep.subr.mxu1 %v711_v62  ;;  %v702_v7 = vld [vmem:[#allocation8 + $0x180] sm:$0xff]  ;;  %v884_v62 = vld [vmem:[#allocation11 + $0x1c8] sm:$0xff] }
  0xe9   :  { %612 = vmatpush2.msra.mxu0 %v343_v8  ;;  %769 = vmatpush2.msra.mxu1 %v710_v63  ;;  %v701_v8 = vld [vmem:[#allocation8 + $0x178] sm:$0xff]  ;;  %v883_v63 = vld [vmem:[#allocation11 + $0x1c0] sm:$0xff] }
  0xea   :  { %613 = vmatprep.subr.mxu0 %v342_v9  ;;  %770 = vmatprep.subr.mxu1 %v709_v0  ;;  %v700_v9 = vld [vmem:[#allocation8 + $0x170] sm:$0xff]  ;;  %v882_v0 = vld [vmem:[#allocation11 + $0x1b8] sm:$0xff] }
  0xeb   :  { %614 = vmatpush2.msra.mxu0 %v341_v10  ;;  %771 = vmatpush2.msra.mxu1 %v708_v1  ;;  %v699_v10 = vld [vmem:[#allocation8 + $0x168] sm:$0xff]  ;;  %v881_v1 = vld [vmem:[#allocation11 + $0x1b0] sm:$0xff] }
  0xec   :  { %615 = vmatprep.subr.mxu0 %v340_v11  ;;  %772 = vmatprep.subr.mxu1 %v707_v2  ;;  %v698_v11 = vld [vmem:[#allocation8 + $0x160] sm:$0xff]  ;;  %v880_v2 = vld [vmem:[#allocation11 + $0x1a8] sm:$0xff] }
  0xed   :  { %616 = vmatpush2.msra.mxu0 %v339_v12  ;;  %773 = vmatpush2.msra.mxu1 %v706_v3  ;;  %v697_v12 = vld [vmem:[#allocation8 + $0x158] sm:$0xff]  ;;  %v879_v3 = vld [vmem:[#allocation11 + $0x1a0] sm:$0xff] }
  0xee   :  { %617 = vmatprep.subr.mxu0 %v338_v13  ;;  %774 = vmatprep.subr.mxu1 %v705_v4  ;;  %v696_v13 = vld [vmem:[#allocation8 + $0x150] sm:$0xff]  ;;  %v878_v4 = vld [vmem:[#allocation11 + $0x198] sm:$0xff] }
  0xef   :  { %618 = vmatpush2.msra.mxu0 %v337_v14  ;;  %775 = vmatpush2.msra.mxu1 %v704_v5  ;;  %v695_v14 = vld [vmem:[#allocation8 + $0x148] sm:$0xff]  ;;  %v877_v5 = vld [vmem:[#allocation11 + $0x190] sm:$0xff] }
  0xf0   :  { %619 = vmatprep.subr.mxu0 %v336_v15  ;;  %776 = vmatprep.subr.mxu1 %v703_v6  ;;  %v694_v15 = vld [vmem:[#allocation8 + $0x140] sm:$0xff]  ;;  %v876_v6 = vld [vmem:[#allocation11 + $0x188] sm:$0xff] }
  0xf1   :  { %620 = vmatpush2.msra.mxu0 %v335_v16  ;;  %777 = vmatpush2.msra.mxu1 %v702_v7  ;;  %v693_v16 = vld [vmem:[#allocation8 + $0x138] sm:$0xff]  ;;  %v875_v7 = vld [vmem:[#allocation11 + $0x180] sm:$0xff] }
  0xf2   :  { %622 = vmatmul.mubr.f32.vlgmr.msra.gmra.mxu0 %v155_v17  ;;  %778 = vmatprep.subr.mxu1 %v701_v8  ;;  %v692_v17 = vld [vmem:[#allocation8 + $0x130] sm:$0xff]  ;;  %v874_v8 = vld [vmem:[#allocation11 + $0x178] sm:$0xff] }
  0xf3   :  { %627 = vmatprep.mubr.f32.mxu0 %v162_v18  ;;  %779 = vmatpush2.msra.mxu1 %v700_v9  ;;  %v691_v18 = vld [vmem:[#allocation8 + $0x128] sm:$0xff]  ;;  %v873_v9 = vld [vmem:[#allocation11 + $0x170] sm:$0xff] }
  0xf4   :  { %780 = vmatprep.subr.mxu1 %v699_v10  ;;  %903 = vmatprep.subr.mxu0 %v858_v24  ;;  %v872_v10 = vld [vmem:[#allocation11 + $0x168] sm:$0xff] }
  0xf5   :  { %781 = vmatpush2.msra.mxu1 %v698_v11  ;;  %v871_v11 = vld [vmem:[#allocation11 + $0x160] sm:$0xff] }
  0xf6   :  { %628 = vmatmul.mubr.f32.gmra.mxu0 %v161_v19  ;;  %782 = vmatprep.subr.mxu1 %v697_v12  ;;  %v690_v19 = vld [vmem:[#allocation8 + $0x120] sm:$0xff] }
  0xf7   :  { %633 = vmatprep.mubr.f32.mxu0 %v168_v20  ;;  %783 = vmatpush2.msra.mxu1 %v696_v13  ;;  %v689_v20 = vld [vmem:[#allocation8 + $0x118] sm:$0xff]  ;;  %v870_v12 = vld [vmem:[#allocation11 + $0x158] sm:$0xff] }
  0xf8   :  { %784 = vmatprep.subr.mxu1 %v695_v14  ;;  %v869_v13 = vld [vmem:[#allocation11 + $0x150] sm:$0xff]  ;;  %v868_v14 = vld [vmem:[#allocation11 + $0x148] sm:$0xff] }
  0xf9   :  { %785 = vmatpush2.msra.mxu1 %v694_v15  ;;  %v867_v15 = vld [vmem:[#allocation11 + $0x140] sm:$0xff] }
  0xfa   :  { %634 = vmatmul.mubr.f32.gmra.mxu0 %v167_v21  ;;  %786 = vmatprep.subr.mxu1 %v693_v16  ;;  %v688_v21 = vld [vmem:[#allocation8 + $0x110] sm:$0xff] }
  0xfb   :  { %639 = vmatprep.mubr.f32.mxu0 %v174_v25  ;;  %787 = vmatpush2.msra.mxu1 %v692_v17  ;;  %v857_v25 = vld [vmem:[#allocation11 + $0xf0] sm:$0xff] }
  0xfc   :  { %788 = vmatprep.subr.mxu1 %v691_v18  ;;  %904 = vmatpush1.msra.mxu0 %v857_v25 }
  0xfd   :  { %789 = vmatpush2.msra.mxu1 %v690_v19  ;;  %905 = vmatprep.subr.mxu0 %v856_v26  ;;  %v369_v19 = vlaneseq  ;;  %v367_v26 = vld [vmem:[#allocation7] sm:$0x3] }
  0xfe   :  { %640 = vmatmul.mubr.f32.gmra.mxu0 %v173_v29  ;;  %790 = vmatprep.subr.mxu1 %v689_v20  ;;  %v853_v29 = vld [vmem:[#allocation11 + $0xd0] sm:$0xff] }
  0xff   :  { %791 = vmatpush2.msra.mxu1 %v688_v21  ;;  %906 = vmatpush1.msra.mxu0 %v855_v27  ;;  %v370_v21 = vshrl.u32 %v369_v19, 7  ;;  %v862_v19 = vld [vmem:[#allocation11 + $0x118] sm:$0xff] }
 0x100   :  { %792 = vmatprep.subr.mxu1 %v687_v22  ;;  %907 = vmatprep.subr.mxu0 %v854_v28 }
 0x101   :  { %793 = vmatpush2.msra.mxu1 %v686_v23  ;;  %908 = vmatpush1.msra.mxu0 %v853_v29  ;;  %v2962_v24 = vsub.s32 0, %v370_v21  ;;  %v2964_v27 = vsub.s32 1, %v370_v21  ;;  %v860_v21 = vld [vmem:[#allocation11 + $0x108] sm:$0xff] }
 0x102   :  { %909 = vmatprep.subr.mxu0 %v852_v30 }
 0x103   :  { %910 = vmatpush1.msra.mxu0 %v851_v31  ;;  %v372_v30 = vrot.slane %v367_v26, %v2962_v24  ;;  %v376_v31 = vrot.slane %v367_v26, %v2964_v27  ;;  %v1038_v26 = vld [vmem:[#allocation8 + $0x2e8] sm:$0xff] }
 0x104   :  { %911 = vmatprep.subr.mxu0 %v850_v32 }
 0x105   :  { %912 = vmatpush1.msra.mxu0 %v849_v33 }
 0x106   :  { %913 = vmatprep.subr.mxu0 %v848_v34 }
 0x107   :  { %914 = vmatpush1.msra.mxu0 %v847_v35 }
 0x108   :  { %915 = vmatprep.subr.mxu0 %v846_v36 }
 0x109   :  { %916 = vmatpush1.msra.mxu0 %v845_v37 }
 0x10a   :  { %917 = vmatprep.subr.mxu0 %v844_v38 }
 0x10b   :  { %918 = vmatpush1.msra.mxu0 %v843_v39 }
 0x10c   :  { %919 = vmatprep.subr.mxu0 %v842_v40 }
 0x10d   :  { %920 = vmatpush1.msra.mxu0 %v841_v41 }
 0x10e   :  { %921 = vmatprep.subr.mxu0 %v840_v42 }
 0x10f   :  { %922 = vmatpush1.msra.mxu0 %v839_v43 }
 0x110   :  { %923 = vmatprep.subr.mxu0 %v838_v44 }
 0x111   :  { %924 = vmatpush1.msra.mxu0 %v837_v45 }
 0x112   :  { %925 = vmatprep.subr.mxu0 %v836_v46 }
 0x113   :  { %926 = vmatpush1.msra.mxu0 %v835_v47 }
 0x114   :  { %927 = vmatprep.subr.mxu0 %v834_v48 }
 0x115   :  { %928 = vmatpush1.msra.mxu0 %v833_v49 }
 0x116   :  { %929 = vmatprep.subr.mxu0 %v832_v50 }
 0x117   :  { %930 = vmatpush1.msra.mxu0 %v831_v51 }
 0x118   :  { %931 = vmatprep.subr.mxu0 %v830_v52 }
 0x119   :  { %932 = vmatpush1.msra.mxu0 %v829_v53 }
 0x11a   :  { %933 = vmatprep.subr.mxu0 %v828_v54 }
 0x11b   :  { %934 = vmatpush1.msra.mxu0 %v827_v55 }
 0x11c   :  { %935 = vmatprep.subr.mxu0 %v890_v56 }
 0x11d   :  { %936 = vmatpush2.msra.mxu0 %v889_v57 }
 0x11e   :  { %937 = vmatprep.subr.mxu0 %v888_v58 }
 0x11f   :  { %938 = vmatpush2.msra.mxu0 %v887_v59 }
 0x120   :  { %939 = vmatprep.subr.mxu0 %v886_v60 }
 0x121   :  { %940 = vmatpush2.msra.mxu0 %v885_v61 }
 0x122   :  { %941 = vmatprep.subr.mxu0 %v884_v62 }
 0x123   :  { %942 = vmatpush2.msra.mxu0 %v883_v63 }
 0x124   :  { %943 = vmatprep.subr.mxu0 %v882_v0 }
 0x125   :  { %944 = vmatpush2.msra.mxu0 %v881_v1 }
 0x126   :  { %945 = vmatprep.subr.mxu0 %v880_v2 }
 0x127   :  { %946 = vmatpush2.msra.mxu0 %v879_v3 }
 0x128   :  { %947 = vmatprep.subr.mxu0 %v878_v4 }
 0x129   :  { %948 = vmatpush2.msra.mxu0 %v877_v5 }
 0x12a   :  { %949 = vmatprep.subr.mxu0 %v876_v6 }
 0x12b   :  { %950 = vmatpush2.msra.mxu0 %v875_v7 }
 0x12c   :  { %951 = vmatprep.subr.mxu0 %v874_v8 }
 0x12d   :  { %952 = vmatpush2.msra.mxu0 %v873_v9 }
 0x12e   :  { %953 = vmatprep.subr.mxu0 %v872_v10 }
 0x12f   :  { %954 = vmatpush2.msra.mxu0 %v871_v11 }
 0x130   :  { %955 = vmatprep.subr.mxu0 %v870_v12 }
 0x131   :  { %956 = vmatpush2.msra.mxu0 %v869_v13 }
 0x132   :  { %957 = vmatprep.subr.mxu0 %v868_v14 }
 0x133   :  { %958 = vmatpush2.msra.mxu0 %v867_v15  ;;  %v866_v15 = vld [vmem:[#allocation11 + $0x138] sm:$0xff] }
 0x134   :  { %959 = vmatprep.subr.mxu0 %v866_v15  ;;  %v1066_v15 = vld [vmem:[#allocation8 + $0x3c8] sm:$0xff] }
 0x171   :  { %v445_v16 = vpop.f32.mrf.mxu0 }
 0x172   :  { %v446_v34 = vadd.f32 %v445_v16, %v372_v30  ;;  %v865_v16 = vld [vmem:[#allocation11 + $0x130] sm:$0xff] }
 0x173   :  { %v447_v17 = vpop.f32.mrf.mxu0  ;;  %960 = vmatpush2.msra.mxu0 %v865_v16  ;;  %v1065_v16 = vld [vmem:[#allocation8 + $0x3c0] sm:$0xff] }
 0x174   :  { %v534_v22 = vpop.f32.mrf.mxu1  ;;  %v448_v35 = vadd.f32 %v447_v17, %v376_v31  ;;  %v864_v17 = vld [vmem:[#allocation11 + $0x128] sm:$0xff] }
 0x175   :  { %v535_v38 = vadd.f32 %v534_v22, %v446_v34  ;;  %961 = vmatprep.subr.mxu0 %v864_v17  ;;  %v859_v22 = vld [vmem:[#allocation11 + $0x100] sm:$0xff]  ;;  %v1064_v17 = vld [vmem:[#allocation8 + $0x3b8] sm:$0xff] }
 0x176   :  { %v451_v18 = vpop.f32.mrf.mxu0  ;;  %v536_v25 = vpop.f32.mrf.mxu1  ;;  %v1031_v34 = vld [vmem:[#allocation8 + $0x2b0] sm:$0xff] }
 0x177   :  { %v452_v39 = vadd.f32 %v451_v18, %v372_v30  ;;  %v537_v41 = vadd.f32 %v536_v25, %v448_v35  ;;  %v863_v18 = vld [vmem:[#allocation11 + $0x120] sm:$0xff] }
 0x178   :  { %v453_v20 = vpop.f32.mrf.mxu0  ;;  %v540_v28 = vpop.f32.mrf.mxu1  ;;  %962 = vmatpush2.msra.mxu0 %v863_v18  ;;  %v1039_v25 = vld [vmem:[#allocation8 + $0x2f0] sm:$0xff]  ;;  %v1030_v35 = vld [vmem:[#allocation8 + $0x2a8] sm:$0xff] }
 0x179   :  { %v454_v42 = vadd.f32 %v453_v20, %v376_v31  ;;  %v541_v47 = vadd.f32 %v540_v28, %v452_v39  ;;  %963 = vmatprep.subr.mxu0 %v862_v19  ;;  %v861_v20 = vld [vmem:[#allocation11 + $0x110] sm:$0xff]  ;;  %v1026_v39 = vld [vmem:[#allocation8 + $0x288] sm:$0xff]  ;;  %v1063_v18 = vld [vmem:[#allocation8 + $0x3b0] sm:$0xff] }
 0x17a   :  { %v457_v23 = vpop.f32.mrf.mxu0  ;;  %v542_v32 = vpop.f32.mrf.mxu1  ;;  %964 = vmatpush2.msra.mxu0 %v861_v20  ;;  %v1037_v28 = vld [vmem:[#allocation8 + $0x2e0] sm:$0xff]  ;;  %v1062_v19 = vld [vmem:[#allocation8 + $0x3a8] sm:$0xff] }
 0x17b   :  { %v458_v48 = vadd.f32 %v457_v23, %v372_v30  ;;  %v543_v50 = vadd.f32 %v542_v32, %v454_v42  ;;  %965 = vmatprep.subr.mxu0 %v860_v21  ;;  %v1040_v23 = vld [vmem:[#allocation8 + $0x2f8] sm:$0xff]  ;;  %v1033_v32 = vld [vmem:[#allocation8 + $0x2c0] sm:$0xff]  ;;  %v1023_v42 = vld [vmem:[#allocation8 + $0x270] sm:$0xff] }
 0x17c   :  { %v459_v29 = vpop.f32.mrf.mxu0  ;;  %v546_v36 = vpop.f32.mrf.mxu1  ;;  %966 = vmatpush2.msra.mxu0 %v859_v22  ;;  %1086 = vmatprep.subr.mxu1 %v1040_v23  ;;  %v1061_v20 = vld [vmem:[#allocation8 + $0x3a0] sm:$0xff]  ;;  %v1060_v21 = vld [vmem:[#allocation8 + $0x398] sm:$0xff]  ;;  %v1059_v22 = vld [vmem:[#allocation8 + $0x390] sm:$0xff] }
 0x17d   :  { %v460_v51 = vadd.f32 %v459_v29, %v376_v31  ;;  %v547_v58 = vadd.f32 %v546_v36, %v458_v48  ;;  %v1036_v29 = vld [vmem:[#allocation8 + $0x2d8] sm:$0xff]  ;;  %v1029_v36 = vld [vmem:[#allocation8 + $0x2a0] sm:$0xff]  ;;  %v1019_v48 = vld [vmem:[#allocation8 + $0x250] sm:$0xff] }
 0x17e   :  { %v463_v33 = vpop.f32.mrf.mxu0  ;;  %v548_v43 = vpop.f32.mrf.mxu1  ;;  %v1058_v23 = vld [vmem:[#allocation8 + $0x388] sm:$0xff] }
 0x17f   :  { %v464_v59 = vadd.f32 %v463_v33, %v372_v30  ;;  %v549_v61 = vadd.f32 %v548_v43, %v460_v51  ;;  %v1035_v30 = vld [vmem:[#allocation8 + $0x2d0] sm:$0xff]  ;;  %v1032_v33 = vld [vmem:[#allocation8 + $0x2b8] sm:$0xff]  ;;  %v1022_v43 = vld [vmem:[#allocation8 + $0x268] sm:$0xff] }
 0x180   :  { %v465_v37 = vpop.f32.mrf.mxu0  ;;  %v552_v53 = vpop.f32.mrf.mxu1  ;;  %v1016_v51 = vld [vmem:[#allocation8 + $0x238] sm:$0xff] }
 0x181   :  { %v466_v62 = vadd.f32 %v465_v37, %v376_v31  ;;  %v553_v5 = vadd.f32 %v552_v53, %v464_v59  ;;  %v1034_v31 = vld [vmem:[#allocation8 + $0x2c8] sm:$0xff]  ;;  %v1028_v37 = vld [vmem:[#allocation8 + $0x298] sm:$0xff]  ;;  %v1015_v53 = vld [vmem:[#allocation8 + $0x230] sm:$0xff] }
 0x182   :  { %v554_v0 = vpop.f32.mrf.mxu1  ;;  %v1012_v59 = vld [vmem:[#allocation8 + $0x218] sm:$0xff] }
 0x183   :  { %v555_v7 = vadd.f32 %v554_v0, %v466_v62  ;;  %v1009_v62 = vld [vmem:[#allocation8 + $0x200] sm:$0xff]  ;;  %v1072_v0 = vld [vmem:[#allocation8 + $0x3f8] sm:$0xff] }
 0x1b2   :  { %v623_v40 = vpop.f32.mrf.mxu0 }
 0x1b3   :  { %v2968_v44 = vadd.f32 %v623_v40, %v535_v38  ;;  %v1027_v38 = vld [vmem:[#allocation8 + $0x290] sm:$0xff]  ;;  %v1025_v40 = vld [vmem:[#allocation8 + $0x280] sm:$0xff] }
 0x1b4   :  { %v625_v45 = vpop.f32.mrf.mxu0 }
 0x1b5   :  { %v2970_v46 = vadd.f32 %v625_v45, %v537_v41  ;;  %v646_v54 = vmax.f32 %v2968_v44, 0.0  ;;  %v1024_v41 = vld [vmem:[#allocation8 + $0x278] sm:$0xff]  ;;  %v1021_v45 = vld [vmem:[#allocation8 + $0x260] sm:$0xff] }
 0x1b6   :  { %v629_v49 = vpop.f32.mrf.mxu0 }
 0x1b7   :  { %v647_v52 = vmax.f32 %v2970_v46, 0.0  ;;  %v2974_v55 = vadd.f32 %v629_v49, %v541_v47  ;;  %v1020_v47 = vld [vmem:[#allocation8 + $0x258] sm:$0xff]  ;;  %v1018_v49 = vld [vmem:[#allocation8 + $0x248] sm:$0xff] }
 0x1b8   :  { %v631_v56 = vpop.f32.mrf.mxu0 }
 0x1b9   :  { %v2976_v57 = vadd.f32 %v631_v56, %v543_v50  ;;  %794 = vmatprep.mubr.f32.mxu1 %v647_v52  ;;  %v648_v1 = vmax.f32 %v2974_v55, 0.0  ;;  %v1017_v50 = vld [vmem:[#allocation8 + $0x240] sm:$0xff]  ;;  %v1014_v56 = vld [vmem:[#allocation8 + $0x228] sm:$0xff] }
 0x1ba   :  { %v635_v60 = vpop.f32.mrf.mxu0  ;;  %795 = vmatmul.mubr.f32.vlgmr.msra.gmra.mxu1 %v646_v54 }
 0x1bb   :  { %v649_v63 = vmax.f32 %v2976_v57, 0.0  ;;  %v2984_v2 = vadd.f32 %v635_v60, %v547_v58  ;;  %1087 = vmatpush1.msra.mxu1 %v1039_v25  ;;  %v1013_v58 = vld [vmem:[#allocation8 + $0x220] sm:$0xff]  ;;  %v1011_v60 = vld [vmem:[#allocation8 + $0x210] sm:$0xff] }
 0x1bc   :  { %v637_v3 = vpop.f32.mrf.mxu0  ;;  %1088 = vmatprep.subr.mxu1 %v1038_v26  ;;  %v1057_v25 = vld [vmem:[#allocation8 + $0x380] sm:$0xff]  ;;  %v1056_v26 = vld [vmem:[#allocation8 + $0x378] sm:$0xff] }
 0x1bd   :  { %v2986_v4 = vadd.f32 %v637_v3, %v549_v61  ;;  %800 = vmatprep.mubr.f32.mxu1 %v649_v63  ;;  %v650_v9 = vmax.f32 %v2984_v2, 0.0  ;;  %1089 = vmatpush1.msra.mxu1 %v1037_v28  ;;  %v1010_v61 = vld [vmem:[#allocation8 + $0x208] sm:$0xff]  ;;  %v1071_v3 = vld [vmem:[#allocation8 + $0x3f0] sm:$0xff] }
 0x1be   :  { %v641_v6 = vpop.f32.mrf.mxu0  ;;  %801 = vmatmul.mubr.f32.gmra.mxu1 %v648_v1  ;;  %1090 = vmatprep.subr.mxu1 %v1036_v29  ;;  %v1055_v28 = vld [vmem:[#allocation8 + $0x370] sm:$0xff]  ;;  %v1054_v29 = vld [vmem:[#allocation8 + $0x368] sm:$0xff] }
 0x1bf   :  { %v651_v8 = vmax.f32 %v2986_v4, 0.0  ;;  %v2994_v10 = vadd.f32 %v641_v6, %v553_v5  ;;  %1091 = vmatpush1.msra.mxu1 %v1035_v30  ;;  %v1070_v5 = vld [vmem:[#allocation8 + $0x3e8] sm:$0xff]  ;;  %v1069_v6 = vld [vmem:[#allocation8 + $0x3e0] sm:$0xff] }
 0x1c0   :  { %v643_v11 = vpop.f32.mrf.mxu0  ;;  %1092 = vmatprep.subr.mxu1 %v1034_v31  ;;  %v1053_v30 = vld [vmem:[#allocation8 + $0x360] sm:$0xff]  ;;  %v1052_v31 = vld [vmem:[#allocation8 + $0x358] sm:$0xff] }
 0x1c1   :  { %v2996_v12 = vadd.f32 %v643_v11, %v555_v7  ;;  %806 = vmatprep.mubr.f32.mxu1 %v651_v8  ;;  %v652_v14 = vmax.f32 %v2994_v10, 0.0  ;;  %1093 = vmatpush1.msra.mxu1 %v1033_v32  ;;  %v1068_v7 = vld [vmem:[#allocation8 + $0x3d8] sm:$0xff]  ;;  %v1067_v11 = vld [vmem:[#allocation8 + $0x3d0] sm:$0xff]  ;;  %v1223_v10 = vld [vmem:[#allocation11 + $0x338] sm:$0xff] }
 0x1c2   :  { %807 = vmatmul.mubr.f32.gmra.mxu1 %v650_v9  ;;  %1094 = vmatprep.subr.mxu1 %v1032_v33  ;;  %v1051_v32 = vld [vmem:[#allocation8 + $0x350] sm:$0xff]  ;;  %v718_v33 = vld [vmem:[#allocation10] sm:$0x3] }
 0x1c3   :  { %v653_v13 = vmax.f32 %v2996_v12, 0.0  ;;  %1095 = vmatpush1.msra.mxu1 %v1031_v34  ;;  %v723_v34 = vrot.slane %v718_v33, %v2962_v24  ;;  %v1222_v12 = vld [vmem:[#allocation11 + $0x330] sm:$0xff] }
 0x1c4   :  { %1096 = vmatprep.subr.mxu1 %v1030_v35  ;;  %v727_v35 = vrot.slane %v718_v33, %v2964_v27  ;;  %v1206_v33 = vld [vmem:[#allocation11 + $0x2b0] sm:$0xff] }
 0x1c5   :  { %812 = vmatprep.mubr.f32.mxu1 %v653_v13  ;;  %1097 = vmatpush1.msra.mxu1 %v1029_v36 }
 0x1c6   :  { %813 = vmatmul.mubr.f32.gmra.mxu1 %v652_v14  ;;  %1098 = vmatprep.subr.mxu1 %v1028_v37 }
 0x1c7   :  { %1099 = vmatpush1.msra.mxu1 %v1027_v38 }
 0x1c8   :  { %1100 = vmatprep.subr.mxu1 %v1026_v39 }
 0x1c9   :  { %1101 = vmatpush1.msra.mxu1 %v1025_v40 }
 0x1ca   :  { %1102 = vmatprep.subr.mxu1 %v1024_v41 }
 0x1cb   :  { %1103 = vmatpush1.msra.mxu1 %v1023_v42 }
 0x1cc   :  { %1104 = vmatprep.subr.mxu1 %v1022_v43 }
 0x1cd   :  { %1105 = vmatpush1.msra.mxu1 %v1021_v45 }
 0x1ce   :  { %1106 = vmatprep.subr.mxu1 %v1020_v47 }
 0x1cf   :  { %1107 = vmatpush1.msra.mxu1 %v1019_v48 }
 0x1d0   :  { %1108 = vmatprep.subr.mxu1 %v1018_v49 }
 0x1d1   :  { %1109 = vmatpush1.msra.mxu1 %v1017_v50 }
 0x1d2   :  { %1110 = vmatprep.subr.mxu1 %v1016_v51 }
 0x1d3   :  { %1111 = vmatpush1.msra.mxu1 %v1015_v53 }
 0x1d4   :  { %1112 = vmatprep.subr.mxu1 %v1014_v56 }
 0x1d5   :  { %1113 = vmatpush1.msra.mxu1 %v1013_v58 }
 0x1d6   :  { %1114 = vmatprep.subr.mxu1 %v1012_v59 }
 0x1d7   :  { %1115 = vmatpush1.msra.mxu1 %v1011_v60 }
 0x1d8   :  { %1116 = vmatprep.subr.mxu1 %v1010_v61 }
 0x1d9   :  { %1117 = vmatpush1.msra.mxu1 %v1009_v62 }
 0x1da   :  { %1118 = vmatprep.subr.mxu1 %v1072_v0 }
 0x1db   :  { %1119 = vmatpush2.msra.mxu1 %v1071_v3 }
 0x1dc   :  { %1120 = vmatprep.subr.mxu1 %v1070_v5 }
 0x1dd   :  { %1121 = vmatpush2.msra.mxu1 %v1069_v6  ;;  %v1050_v6 = vld [vmem:[#allocation8 + $0x348] sm:$0xff] }
 0x1de   :  { %1122 = vmatprep.subr.mxu1 %v1068_v7  ;;  %v1049_v7 = vld [vmem:[#allocation8 + $0x340] sm:$0xff] }
 0x1df   :  { %1123 = vmatpush2.msra.mxu1 %v1067_v11  ;;  %v1048_v11 = vld [vmem:[#allocation8 + $0x338] sm:$0xff] }
 0x1e0   :  { %1124 = vmatprep.subr.mxu1 %v1066_v15  ;;  %v1047_v15 = vld [vmem:[#allocation8 + $0x330] sm:$0xff] }
 0x1e1   :  { %1125 = vmatpush2.msra.mxu1 %v1065_v16  ;;  %v1046_v16 = vld [vmem:[#allocation8 + $0x328] sm:$0xff] }
 0x1e2   :  { %1126 = vmatprep.subr.mxu1 %v1064_v17  ;;  %v1045_v17 = vld [vmem:[#allocation8 + $0x320] sm:$0xff] }
 0x1e3   :  { %1127 = vmatpush2.msra.mxu1 %v1063_v18  ;;  %v1044_v18 = vld [vmem:[#allocation8 + $0x318] sm:$0xff] }
 0x1e4   :  { %1128 = vmatprep.subr.mxu1 %v1062_v19  ;;  %v1043_v19 = vld [vmem:[#allocation8 + $0x310] sm:$0xff] }
 0x1e5   :  { %1129 = vmatpush2.msra.mxu1 %v1061_v20  ;;  %v1042_v20 = vld [vmem:[#allocation8 + $0x308] sm:$0xff] }
 0x1e6   :  { %1130 = vmatprep.subr.mxu1 %v1060_v21  ;;  %v1041_v21 = vld [vmem:[#allocation8 + $0x300] sm:$0xff] }
 0x1e7   :  { %1131 = vmatpush2.msra.mxu1 %v1059_v22  ;;  %v1215_v22 = vld [vmem:[#allocation11 + $0x2f8] sm:$0xff] }
 0x1e8   :  { %1132 = vmatprep.subr.mxu1 %v1058_v23  ;;  %v1214_v23 = vld [vmem:[#allocation11 + $0x2f0] sm:$0xff]  ;;  %1261 = vmatprep.subr.mxu0 %v1215_v22  ;;  %v1233_v22 = vld [vmem:[#allocation11 + $0x388] sm:$0xff] }
 0x1e9   :  { %1133 = vmatpush2.msra.mxu1 %v1057_v25  ;;  %v1213_v25 = vld [vmem:[#allocation11 + $0x2e8] sm:$0xff] }
 0x1ea   :  { %1134 = vmatprep.subr.mxu1 %v1056_v26  ;;  %v1212_v26 = vld [vmem:[#allocation11 + $0x2e0] sm:$0xff] }
 0x1eb   :  { %1135 = vmatpush2.msra.mxu1 %v1055_v28  ;;  %v1211_v28 = vld [vmem:[#allocation11 + $0x2d8] sm:$0xff] }
 0x1ec   :  { %1136 = vmatprep.subr.mxu1 %v1054_v29  ;;  %v1210_v29 = vld [vmem:[#allocation11 + $0x2d0] sm:$0xff] }
 0x1ed   :  { %1137 = vmatpush2.msra.mxu1 %v1053_v30  ;;  %v1209_v30 = vld [vmem:[#allocation11 + $0x2c8] sm:$0xff] }
 0x1ee   :  { %1138 = vmatprep.subr.mxu1 %v1052_v31  ;;  %v1208_v31 = vld [vmem:[#allocation11 + $0x2c0] sm:$0xff] }
 0x1ef   :  { %1139 = vmatpush2.msra.mxu1 %v1051_v32  ;;  %v1207_v32 = vld [vmem:[#allocation11 + $0x2b8] sm:$0xff] }
 0x1f0   :  { %1140 = vmatprep.subr.mxu1 %v1050_v6  ;;  %v1243_v6 = vld [vmem:[#allocation11 + $0x3d8] sm:$0xff] }
 0x1f1   :  { %1141 = vmatpush2.msra.mxu1 %v1049_v7  ;;  %v1242_v7 = vld [vmem:[#allocation11 + $0x3d0] sm:$0xff] }
 0x1f2   :  { %1142 = vmatprep.subr.mxu1 %v1048_v11  ;;  %v1241_v11 = vld [vmem:[#allocation11 + $0x3c8] sm:$0xff] }
 0x1f3   :  { %1143 = vmatpush2.msra.mxu1 %v1047_v15  ;;  %v1240_v15 = vld [vmem:[#allocation11 + $0x3c0] sm:$0xff] }
 0x1f4   :  { %1144 = vmatprep.subr.mxu1 %v1046_v16  ;;  %v1239_v16 = vld [vmem:[#allocation11 + $0x3b8] sm:$0xff] }
 0x1f5   :  { %1145 = vmatpush2.msra.mxu1 %v1045_v17  ;;  %v1238_v17 = vld [vmem:[#allocation11 + $0x3b0] sm:$0xff] }
 0x1f6   :  { %1146 = vmatprep.subr.mxu1 %v1044_v18  ;;  %v1237_v18 = vld [vmem:[#allocation11 + $0x3a8] sm:$0xff] }
 0x1f7   :  { %1147 = vmatpush2.msra.mxu1 %v1043_v19  ;;  %v1236_v19 = vld [vmem:[#allocation11 + $0x3a0] sm:$0xff] }
 0x1f8   :  { %1148 = vmatprep.subr.mxu1 %v1042_v20  ;;  %v1235_v20 = vld [vmem:[#allocation11 + $0x398] sm:$0xff] }
 0x1f9   :  { %1149 = vmatpush2.msra.mxu1 %v1041_v21  ;;  %v1234_v21 = vld [vmem:[#allocation11 + $0x390] sm:$0xff] }
 0x27a   :  { %v796_v36 = vpop.f32.mrf.mxu1 }
 0x27b   :  { %v797_v37 = vadd.f32 %v796_v36, %v723_v34  ;;  %v1203_v36 = vld [vmem:[#allocation11 + $0x298] sm:$0xff] }
 0x27c   :  { %v798_v38 = vpop.f32.mrf.mxu1 }
 0x27d   :  { %v799_v39 = vadd.f32 %v798_v38, %v727_v35  ;;  %v819_v42 = vmax.f32 %v797_v37, 0.0  ;;  %v1202_v37 = vld [vmem:[#allocation11 + $0x290] sm:$0xff]  ;;  %v1201_v38 = vld [vmem:[#allocation11 + $0x288] sm:$0xff] }
 0x27e   :  { %v802_v40 = vpop.f32.mrf.mxu1 }
 0x27f   :  { %v820_v41 = vmax.f32 %v799_v39, 0.0  ;;  %v803_v43 = vadd.f32 %v802_v40, %v723_v34  ;;  %v1200_v39 = vld [vmem:[#allocation11 + $0x280] sm:$0xff]  ;;  %v1199_v40 = vld [vmem:[#allocation11 + $0x278] sm:$0xff] }
 0x280   :  { %v804_v45 = vpop.f32.mrf.mxu1 }
 0x281   :  { %v805_v47 = vadd.f32 %v804_v45, %v727_v35  ;;  %967 = vmatprep.mubr.f32.mxu0 %v820_v41  ;;  %v821_v50 = vmax.f32 %v803_v43, 0.0  ;;  %v1198_v41 = vld [vmem:[#allocation11 + $0x270] sm:$0xff]  ;;  %v1196_v43 = vld [vmem:[#allocation11 + $0x260] sm:$0xff]  ;;  %v1195_v45 = vld [vmem:[#allocation11 + $0x258] sm:$0xff] }
 0x282   :  { %v808_v48 = vpop.f32.mrf.mxu1  ;;  %968 = vmatmul.mubr.f32.vlgmr.msra.gmra.mxu0 %v819_v42  ;;  %v1197_v42 = vld [vmem:[#allocation11 + $0x268] sm:$0xff] }
 0x283   :  { %v822_v49 = vmax.f32 %v805_v47, 0.0  ;;  %v809_v51 = vadd.f32 %v808_v48, %v723_v34  ;;  %1262 = vmatpush1.msra.mxu0 %v1214_v23  ;;  %v1194_v47 = vld [vmem:[#allocation11 + $0x250] sm:$0xff]  ;;  %v1193_v48 = vld [vmem:[#allocation11 + $0x248] sm:$0xff]  ;;  %v1232_v23 = vld [vmem:[#allocation11 + $0x380] sm:$0xff] }
 0x284   :  { %v810_v53 = vpop.f32.mrf.mxu1  ;;  %1263 = vmatprep.subr.mxu0 %v1213_v25  ;;  %v1231_v25 = vld [vmem:[#allocation11 + $0x378] sm:$0xff] }
 0x285   :  { %v811_v56 = vadd.f32 %v810_v53, %v727_v35  ;;  %973 = vmatprep.mubr.f32.mxu0 %v822_v49  ;;  %v823_v60 = vmax.f32 %v809_v51, 0.0  ;;  %1264 = vmatpush1.msra.mxu0 %v1212_v26  ;;  %v1192_v49 = vld [vmem:[#allocation11 + $0x240] sm:$0xff]  ;;  %v1190_v51 = vld [vmem:[#allocation11 + $0x230] sm:$0xff]  ;;  %v1189_v53 = vld [vmem:[#allocation11 + $0x228] sm:$0xff] }
 0x286   :  { %v814_v58 = vpop.f32.mrf.mxu1  ;;  %974 = vmatmul.mubr.f32.gmra.mxu0 %v821_v50  ;;  %1265 = vmatprep.subr.mxu0 %v1211_v28  ;;  %v1191_v50 = vld [vmem:[#allocation11 + $0x238] sm:$0xff]  ;;  %v1230_v26 = vld [vmem:[#allocation11 + $0x370] sm:$0xff]  ;;  %v1229_v28 = vld [vmem:[#allocation11 + $0x368] sm:$0xff] }
 0x287   :  { %v824_v59 = vmax.f32 %v811_v56, 0.0  ;;  %v815_v61 = vadd.f32 %v814_v58, %v723_v34  ;;  %1266 = vmatpush1.msra.mxu0 %v1210_v29  ;;  %v1205_v34 = vld [vmem:[#allocation11 + $0x2a8] sm:$0xff]  ;;  %v1188_v56 = vld [vmem:[#allocation11 + $0x220] sm:$0xff]  ;;  %v1187_v58 = vld [vmem:[#allocation11 + $0x218] sm:$0xff] }
 0x288   :  { %v816_v62 = vpop.f32.mrf.mxu1  ;;  %1267 = vmatprep.subr.mxu0 %v1209_v30  ;;  %v1228_v29 = vld [vmem:[#allocation11 + $0x360] sm:$0xff]  ;;  %v1227_v30 = vld [vmem:[#allocation11 + $0x358] sm:$0xff] }
 0x289   :  { %v817_v0 = vadd.f32 %v816_v62, %v727_v35  ;;  %979 = vmatprep.mubr.f32.mxu0 %v824_v59  ;;  %v825_v5 = vmax.f32 %v815_v61, 0.0  ;;  %1268 = vmatpush1.msra.mxu0 %v1208_v31  ;;  %v1204_v35 = vld [vmem:[#allocation11 + $0x2a0] sm:$0xff]  ;;  %v1186_v59 = vld [vmem:[#allocation11 + $0x210] sm:$0xff]  ;;  %v1247_v62 = vld [vmem:[#allocation11 + $0x3f8] sm:$0xff] }
 0x28a   :  { %980 = vmatmul.mubr.f32.gmra.mxu0 %v823_v60  ;;  %1269 = vmatprep.subr.mxu0 %v1207_v32  ;;  %v1185_v60 = vld [vmem:[#allocation11 + $0x208] sm:$0xff]  ;;  %v1184_v61 = vld [vmem:[#allocation11 + $0x200] sm:$0xff]  ;;  %v1226_v31 = vld [vmem:[#allocation11 + $0x350] sm:$0xff] }
 0x28b   :  { %v826_v3 = vmax.f32 %v817_v0, 0.0  ;;  %1270 = vmatpush1.msra.mxu0 %v1206_v33  ;;  %v1246_v0 = vld [vmem:[#allocation11 + $0x3f0] sm:$0xff]  ;;  %v1225_v32 = vld [vmem:[#allocation11 + $0x348] sm:$0xff]  ;;  %v1224_v33 = vld [vmem:[#allocation11 + $0x340] sm:$0xff] }
 0x28c   :  { %1271 = vmatprep.subr.mxu0 %v1205_v34  ;;  %v891_v34 = vld [vmem:[#allocation13] sm:$0x3] }
 0x28d   :  { %985 = vmatprep.mubr.f32.mxu0 %v826_v3  ;;  %1272 = vmatpush1.msra.mxu0 %v1204_v35  ;;  %v1245_v3 = vld [vmem:[#allocation11 + $0x3e8] sm:$0xff]  ;;  %v896_v35 = vrot.slane %v891_v34, %v2962_v24 }
 0x28e   :  { %986 = vmatmul.mubr.f32.gmra.mxu0 %v825_v5  ;;  %1273 = vmatprep.subr.mxu0 %v1203_v36  ;;  %v1244_v5 = vld [vmem:[#allocation11 + $0x3e0] sm:$0xff]  ;;  %v900_v36 = vrot.slane %v891_v34, %v2964_v27  ;;  %v1379_v34 = vld [vmem:[#allocation8 + $0x460] sm:$0xff] }
 0x28f   :  { %1274 = vmatpush1.msra.mxu0 %v1202_v37 }
 0x290   :  { %1275 = vmatprep.subr.mxu0 %v1201_v38 }
 0x291   :  { %1276 = vmatpush1.msra.mxu0 %v1200_v39 }
 0x292   :  { %1277 = vmatprep.subr.mxu0 %v1199_v40 }
 0x293   :  { %1278 = vmatpush1.msra.mxu0 %v1198_v41 }
 0x294   :  { %1279 = vmatprep.subr.mxu0 %v1197_v42 }
 0x295   :  { %1280 = vmatpush1.msra.mxu0 %v1196_v43 }
 0x296   :  { %1281 = vmatprep.subr.mxu0 %v1195_v45 }
 0x297   :  { %1282 = vmatpush1.msra.mxu0 %v1194_v47 }
 0x298   :  { %1283 = vmatprep.subr.mxu0 %v1193_v48 }
 0x299   :  { %1284 = vmatpush1.msra.mxu0 %v1192_v49 }
 0x29a   :  { %1285 = vmatprep.subr.mxu0 %v1191_v50 }
 0x29b   :  { %1286 = vmatpush1.msra.mxu0 %v1190_v51 }
 0x29c   :  { %1287 = vmatprep.subr.mxu0 %v1189_v53 }
 0x29d   :  { %1288 = vmatpush1.msra.mxu0 %v1188_v56 }
 0x29e   :  { %1289 = vmatprep.subr.mxu0 %v1187_v58 }
 0x29f   :  { %1290 = vmatpush1.msra.mxu0 %v1186_v59 }
 0x2a0   :  { %1291 = vmatprep.subr.mxu0 %v1185_v60 }
 0x2a1   :  { %1292 = vmatpush1.msra.mxu0 %v1184_v61 }
 0x2a2   :  { %1293 = vmatprep.subr.mxu0 %v1247_v62 }
 0x2a3   :  { %1294 = vmatpush2.msra.mxu0 %v1246_v0  ;;  %v1219_v0 = vld [vmem:[#allocation11 + $0x318] sm:$0xff] }
 0x2a4   :  { %1295 = vmatprep.subr.mxu0 %v1245_v3  ;;  %v1218_v3 = vld [vmem:[#allocation11 + $0x310] sm:$0xff] }
 0x2a5   :  { %1296 = vmatpush2.msra.mxu0 %v1244_v5  ;;  %v1217_v5 = vld [vmem:[#allocation11 + $0x308] sm:$0xff] }
 0x2a6   :  { %1297 = vmatprep.subr.mxu0 %v1243_v6  ;;  %v1216_v6 = vld [vmem:[#allocation11 + $0x300] sm:$0xff] }
 0x2a7   :  { %1298 = vmatpush2.msra.mxu0 %v1242_v7  ;;  %v1398_v7 = vld [vmem:[#allocation8 + $0x4f8] sm:$0xff] }
 0x2a8   :  { %1299 = vmatprep.subr.mxu0 %v1241_v11  ;;  %v1397_v11 = vld [vmem:[#allocation8 + $0x4f0] sm:$0xff]  ;;  %1444 = vmatprep.subr.mxu1 %v1398_v7  ;;  %v1416_v7 = vld [vmem:[#allocation8 + $0x588] sm:$0xff] }
 0x2a9   :  { %1300 = vmatpush2.msra.mxu0 %v1240_v15  ;;  %v1396_v15 = vld [vmem:[#allocation8 + $0x4e8] sm:$0xff] }
 0x2aa   :  { %1301 = vmatprep.subr.mxu0 %v1239_v16  ;;  %v1395_v16 = vld [vmem:[#allocation8 + $0x4e0] sm:$0xff] }
 0x2ab   :  { %1302 = vmatpush2.msra.mxu0 %v1238_v17  ;;  %v1394_v17 = vld [vmem:[#allocation8 + $0x4d8] sm:$0xff] }
 0x2ac   :  { %1303 = vmatprep.subr.mxu0 %v1237_v18  ;;  %v1393_v18 = vld [vmem:[#allocation8 + $0x4d0] sm:$0xff] }
 0x2ad   :  { %1304 = vmatpush2.msra.mxu0 %v1236_v19  ;;  %v1392_v19 = vld [vmem:[#allocation8 + $0x4c8] sm:$0xff] }
 0x2ae   :  { %1305 = vmatprep.subr.mxu0 %v1235_v20  ;;  %v1391_v20 = vld [vmem:[#allocation8 + $0x4c0] sm:$0xff] }
 0x2af   :  { %1306 = vmatpush2.msra.mxu0 %v1234_v21  ;;  %v1390_v21 = vld [vmem:[#allocation8 + $0x4b8] sm:$0xff] }
 0x2b0   :  { %1307 = vmatprep.subr.mxu0 %v1233_v22  ;;  %v1389_v22 = vld [vmem:[#allocation8 + $0x4b0] sm:$0xff] }
 0x2b1   :  { %1308 = vmatpush2.msra.mxu0 %v1232_v23  ;;  %v1388_v23 = vld [vmem:[#allocation8 + $0x4a8] sm:$0xff] }
 0x2b2   :  { %1309 = vmatprep.subr.mxu0 %v1231_v25  ;;  %v1387_v25 = vld [vmem:[#allocation8 + $0x4a0] sm:$0xff] }
 0x2b3   :  { %1310 = vmatpush2.msra.mxu0 %v1230_v26  ;;  %v1386_v26 = vld [vmem:[#allocation8 + $0x498] sm:$0xff] }
 0x2b4   :  { %1311 = vmatprep.subr.mxu0 %v1229_v28  ;;  %v1385_v28 = vld [vmem:[#allocation8 + $0x490] sm:$0xff] }
 0x2b5   :  { %1312 = vmatpush2.msra.mxu0 %v1228_v29  ;;  %v1384_v29 = vld [vmem:[#allocation8 + $0x488] sm:$0xff] }
 0x2b6   :  { %1313 = vmatprep.subr.mxu0 %v1227_v30  ;;  %v1383_v30 = vld [vmem:[#allocation8 + $0x480] sm:$0xff] }
 0x2b7   :  { %1314 = vmatpush2.msra.mxu0 %v1226_v31  ;;  %v1382_v31 = vld [vmem:[#allocation8 + $0x478] sm:$0xff] }
 0x2b8   :  { %1315 = vmatprep.subr.mxu0 %v1225_v32  ;;  %v1381_v32 = vld [vmem:[#allocation8 + $0x470] sm:$0xff] }
 0x2b9   :  { %1316 = vmatpush2.msra.mxu0 %v1224_v33  ;;  %v1380_v33 = vld [vmem:[#allocation8 + $0x468] sm:$0xff] }
 0x2ba   :  { %1317 = vmatprep.subr.mxu0 %v1223_v10  ;;  %v1424_v10 = vld [vmem:[#allocation8 + $0x5c8] sm:$0xff] }
 0x2bb   :  { %1318 = vmatpush2.msra.mxu0 %v1222_v12  ;;  %v1423_v12 = vld [vmem:[#allocation8 + $0x5c0] sm:$0xff] }
 0x342   :  { %v969_v37 = vpop.f32.mrf.mxu0 }
 0x343   :  { %v970_v38 = vadd.f32 %v969_v37, %v896_v35  ;;  %v1376_v37 = vld [vmem:[#allocation8 + $0x448] sm:$0xff] }
 0x344   :  { %v971_v39 = vpop.f32.mrf.mxu0 }
 0x345   :  { %v972_v40 = vadd.f32 %v971_v39, %v900_v36  ;;  %v3014_v41 = vadd.f32 %v970_v38, %v646_v54  ;;  %v1375_v38 = vld [vmem:[#allocation8 + $0x440] sm:$0xff]  ;;  %v1374_v39 = vld [vmem:[#allocation8 + $0x438] sm:$0xff] }
 0x346   :  { %v975_v42 = vpop.f32.mrf.mxu0 }
 0x347   :  { %v3018_v43 = vadd.f32 %v972_v40, %v647_v52  ;;  %v976_v45 = vadd.f32 %v975_v42, %v896_v35  ;;  %v1000_v50 = vmax.f32 %v3014_v41, 0.0  ;;  %v1373_v40 = vld [vmem:[#allocation8 + $0x430] sm:$0xff]  ;;  %v1372_v42 = vld [vmem:[#allocation8 + $0x428] sm:$0xff] }
 0x348   :  { %v977_v47 = vpop.f32.mrf.mxu0 }
 0x349   :  { %v1001_v48 = vmax.f32 %v3018_v43, 0.0  ;;  %v978_v49 = vadd.f32 %v977_v47, %v900_v36  ;;  %v3024_v51 = vadd.f32 %v976_v45, %v648_v1  ;;  %v1371_v45 = vld [vmem:[#allocation8 + $0x420] sm:$0xff]  ;;  %v1370_v47 = vld [vmem:[#allocation8 + $0x418] sm:$0xff] }
 0x34a   :  { %v981_v53 = vpop.f32.mrf.mxu0 }
 0x34b   :  { %v3028_v44 = vadd.f32 %v978_v49, %v649_v63  ;;  %v982_v54 = vadd.f32 %v981_v53, %v896_v35  ;;  %1150 = vmatprep.mubr.f32.mxu1 %v1001_v48  ;;  %v1002_v55 = vmax.f32 %v3024_v51, 0.0  ;;  %v1369_v49 = vld [vmem:[#allocation8 + $0x410] sm:$0xff]  ;;  %v1368_v53 = vld [vmem:[#allocation8 + $0x408] sm:$0xff] }
 0x34c   :  { %v983_v46 = vpop.f32.mrf.mxu0  ;;  %1151 = vmatmul.mubr.f32.vlgmr.msra.gmra.mxu1 %v1000_v50 }
 0x34d   :  { %v1003_v52 = vmax.f32 %v3028_v44, 0.0  ;;  %v984_v56 = vadd.f32 %v983_v46, %v900_v36  ;;  %v3038_v1 = vadd.f32 %v982_v54, %v650_v9  ;;  %1445 = vmatpush1.msra.mxu1 %v1397_v11  ;;  %v1367_v54 = vld [vmem:[#allocation8 + $0x400] sm:$0xff]  ;;  %v1430_v46 = vld [vmem:[#allocation8 + $0x5f8] sm:$0xff] }
 0x34e   :  { %v987_v57 = vpop.f32.mrf.mxu0  ;;  %1446 = vmatprep.subr.mxu1 %v1396_v15  ;;  %v1415_v11 = vld [vmem:[#allocation8 + $0x580] sm:$0xff]  ;;  %v1414_v15 = vld [vmem:[#allocation8 + $0x578] sm:$0xff] }
 0x34f   :  { %v3042_v63 = vadd.f32 %v984_v56, %v651_v8  ;;  %v988_v58 = vadd.f32 %v987_v57, %v896_v35  ;;  %1156 = vmatprep.mubr.f32.mxu1 %v1003_v52  ;;  %v1004_v2 = vmax.f32 %v3038_v1, 0.0  ;;  %1447 = vmatpush1.msra.mxu1 %v1395_v16  ;;  %v1378_v35 = vld [vmem:[#allocation8 + $0x458] sm:$0xff]  ;;  %v1429_v56 = vld [vmem:[#allocation8 + $0x5f0] sm:$0xff]  ;;  %v1428_v57 = vld [vmem:[#allocation8 + $0x5e8] sm:$0xff] }
 0x350   :  { %v989_v59 = vpop.f32.mrf.mxu0  ;;  %1157 = vmatmul.mubr.f32.gmra.mxu1 %v1002_v55  ;;  %1448 = vmatprep.subr.mxu1 %v1394_v17  ;;  %v1413_v16 = vld [vmem:[#allocation8 + $0x570] sm:$0xff]  ;;  %v1412_v17 = vld [vmem:[#allocation8 + $0x568] sm:$0xff] }
 0x351   :  { %v1005_v60 = vmax.f32 %v3042_v63, 0.0  ;;  %v990_v61 = vadd.f32 %v989_v59, %v900_v36  ;;  %v3052_v9 = vadd.f32 %v988_v58, %v652_v14  ;;  %v1220_v14 = vld [vmem:[#allocation11 + $0x320] sm:$0xff]  ;;  %1449 = vmatpush1.msra.mxu1 %v1393_v18  ;;  %v1427_v58 = vld [vmem:[#allocation8 + $0x5e0] sm:$0xff]  ;;  %v1426_v59 = vld [vmem:[#allocation8 + $0x5d8] sm:$0xff] }
 0x352   :  { %1450 = vmatprep.subr.mxu1 %v1392_v19  ;;  %v1377_v36 = vld [vmem:[#allocation8 + $0x450] sm:$0xff]  ;;  %v1411_v18 = vld [vmem:[#allocation8 + $0x560] sm:$0xff]  ;;  %v1410_v19 = vld [vmem:[#allocation8 + $0x558] sm:$0xff] }
 0x353   :  { %v3056_v4 = vadd.f32 %v990_v61, %v653_v13  ;;  %1162 = vmatprep.mubr.f32.mxu1 %v1005_v60  ;;  %v1006_v62 = vmax.f32 %v3052_v9, 0.0  ;;  %v1221_v13 = vld [vmem:[#allocation11 + $0x328] sm:$0xff]  ;;  %1451 = vmatpush1.msra.mxu1 %v1391_v20  ;;  %v1581_v9 = vld [vmem:[#allocation11 + $0x538] sm:$0xff] }
 0x354   :  { %1163 = vmatmul.mubr.f32.gmra.mxu1 %v1004_v2  ;;  %1319 = vmatprep.subr.mxu0 %v1221_v13  ;;  %v1425_v61 = vld [vmem:[#allocation8 + $0x5d0] sm:$0xff]  ;;  %v1422_v13 = vld [vmem:[#allocation8 + $0x5b8] sm:$0xff] }
 0x355   :  { %v1007_v8 = vmax.f32 %v3056_v4, 0.0  ;;  %1320 = vmatpush2.msra.mxu0 %v1220_v14  ;;  %1452 = vmatprep.subr.mxu1 %v1390_v21  ;;  %v1421_v14 = vld [vmem:[#allocation8 + $0x5b0] sm:$0xff]  ;;  %v1074_v21 = vld [vmem:[#allocation10 + $0x2] sm:$0x3]  ;;  %v1580_v4 = vld [vmem:[#allocation11 + $0x530] sm:$0xff] }
 0x356   :  { %1321 = vmatprep.subr.mxu0 %v1219_v0  ;;  %1453 = vmatpush1.msra.mxu1 %v1389_v22  ;;  %v1420_v0 = vld [vmem:[#allocation8 + $0x5a8] sm:$0xff]  ;;  %v1409_v20 = vld [vmem:[#allocation8 + $0x550] sm:$0xff]  ;;  %v1079_v22 = vrot.slane %v1074_v21, %v2962_v24 }
 0x357   :  { %1168 = vmatprep.mubr.f32.mxu1 %v1007_v8  ;;  %1322 = vmatpush2.msra.mxu0 %v1218_v3  ;;  %v1419_v3 = vld [vmem:[#allocation8 + $0x5a0] sm:$0xff] }
 0x358   :  { %1169 = vmatmul.mubr.f32.gmra.mxu1 %v1006_v62  ;;  %1323 = vmatprep.subr.mxu0 %v1217_v5  ;;  %v1418_v5 = vld [vmem:[#allocation8 + $0x598] sm:$0xff] }
 0x359   :  { %1324 = vmatpush2.msra.mxu0 %v1216_v6  ;;  %1454 = vmatprep.subr.mxu1 %v1388_v23  ;;  %v1417_v6 = vld [vmem:[#allocation8 + $0x590] sm:$0xff]  ;;  %v1083_v23 = vrot.slane %v1074_v21, %v2964_v27  ;;  %v1564_v21 = vld [vmem:[#allocation11 + $0x4b0] sm:$0xff] }
 0x35a   :  { %1455 = vmatpush1.msra.mxu1 %v1387_v25 }
 0x35b   :  { %1456 = vmatprep.subr.mxu1 %v1386_v26 }
 0x35c   :  { %1457 = vmatpush1.msra.mxu1 %v1385_v28 }
 0x35d   :  { %1458 = vmatprep.subr.mxu1 %v1384_v29 }
 0x35e   :  { %1459 = vmatpush1.msra.mxu1 %v1383_v30 }
 0x35f   :  { %1460 = vmatprep.subr.mxu1 %v1382_v31 }
 0x360   :  { %1461 = vmatpush1.msra.mxu1 %v1381_v32 }
 0x361   :  { %1462 = vmatprep.subr.mxu1 %v1380_v33 }
 0x362   :  { %1463 = vmatpush1.msra.mxu1 %v1379_v34 }
 0x363   :  { %1464 = vmatprep.subr.mxu1 %v1378_v35 }
 0x364   :  { %1465 = vmatpush1.msra.mxu1 %v1377_v36 }
 0x365   :  { %1466 = vmatprep.subr.mxu1 %v1376_v37 }
 0x366   :  { %1467 = vmatpush1.msra.mxu1 %v1375_v38 }
 0x367   :  { %1468 = vmatprep.subr.mxu1 %v1374_v39 }
 0x368   :  { %1469 = vmatpush1.msra.mxu1 %v1373_v40 }
 0x369   :  { %1470 = vmatprep.subr.mxu1 %v1372_v42 }
 0x36a   :  { %1471 = vmatpush1.msra.mxu1 %v1371_v45 }
 0x36b   :  { %1472 = vmatprep.subr.mxu1 %v1370_v47 }
 0x36c   :  { %1473 = vmatpush1.msra.mxu1 %v1369_v49 }
 0x36d   :  { %1474 = vmatprep.subr.mxu1 %v1368_v53 }
 0x36e   :  { %1475 = vmatpush1.msra.mxu1 %v1367_v54 }
 0x36f   :  { %1476 = vmatprep.subr.mxu1 %v1430_v46 }
 0x370   :  { %1477 = vmatpush2.msra.mxu1 %v1429_v56 }
 0x371   :  { %1478 = vmatprep.subr.mxu1 %v1428_v57 }
 0x372   :  { %1479 = vmatpush2.msra.mxu1 %v1427_v58  ;;  %v1408_v58 = vld [vmem:[#allocation8 + $0x548] sm:$0xff] }
 0x373   :  { %1480 = vmatprep.subr.mxu1 %v1426_v59  ;;  %v1407_v59 = vld [vmem:[#allocation8 + $0x540] sm:$0xff] }
 0x374   :  { %1481 = vmatpush2.msra.mxu1 %v1425_v61  ;;  %v1406_v61 = vld [vmem:[#allocation8 + $0x538] sm:$0xff] }
 0x375   :  { %1482 = vmatprep.subr.mxu1 %v1424_v10  ;;  %v1405_v10 = vld [vmem:[#allocation8 + $0x530] sm:$0xff] }
 0x376   :  { %1483 = vmatpush2.msra.mxu1 %v1423_v12  ;;  %v1404_v12 = vld [vmem:[#allocation8 + $0x528] sm:$0xff] }
 0x377   :  { %1484 = vmatprep.subr.mxu1 %v1422_v13  ;;  %v1403_v13 = vld [vmem:[#allocation8 + $0x520] sm:$0xff] }
 0x378   :  { %1485 = vmatpush2.msra.mxu1 %v1421_v14  ;;  %v1402_v14 = vld [vmem:[#allocation8 + $0x518] sm:$0xff] }
 0x379   :  { %1486 = vmatprep.subr.mxu1 %v1420_v0  ;;  %v1401_v0 = vld [vmem:[#allocation8 + $0x510] sm:$0xff] }
 0x37a   :  { %1487 = vmatpush2.msra.mxu1 %v1419_v3  ;;  %v1400_v3 = vld [vmem:[#allocation8 + $0x508] sm:$0xff] }
 0x37b   :  { %1488 = vmatprep.subr.mxu1 %v1418_v5  ;;  %v1399_v5 = vld [vmem:[#allocation8 + $0x500] sm:$0xff] }
 0x37c   :  { %1489 = vmatpush2.msra.mxu1 %v1417_v6  ;;  %v1573_v6 = vld [vmem:[#allocation11 + $0x4f8] sm:$0xff] }
 0x37d   :  { %1490 = vmatprep.subr.mxu1 %v1416_v7  ;;  %v1572_v7 = vld [vmem:[#allocation11 + $0x4f0] sm:$0xff]  ;;  %1619 = vmatprep.subr.mxu0 %v1573_v6  ;;  %v1591_v6 = vld [vmem:[#allocation11 + $0x588] sm:$0xff] }
 0x37e   :  { %1491 = vmatpush2.msra.mxu1 %v1415_v11  ;;  %v1571_v11 = vld [vmem:[#allocation11 + $0x4e8] sm:$0xff] }
 0x37f   :  { %1492 = vmatprep.subr.mxu1 %v1414_v15  ;;  %v1570_v15 = vld [vmem:[#allocation11 + $0x4e0] sm:$0xff] }
 0x380   :  { %1493 = vmatpush2.msra.mxu1 %v1413_v16  ;;  %v1569_v16 = vld [vmem:[#allocation11 + $0x4d8] sm:$0xff] }
 0x381   :  { %1494 = vmatprep.subr.mxu1 %v1412_v17  ;;  %v1568_v17 = vld [vmem:[#allocation11 + $0x4d0] sm:$0xff] }
 0x382   :  { %1495 = vmatpush2.msra.mxu1 %v1411_v18  ;;  %v1567_v18 = vld [vmem:[#allocation11 + $0x4c8] sm:$0xff] }
 0x383   :  { %1496 = vmatprep.subr.mxu1 %v1410_v19  ;;  %v1566_v19 = vld [vmem:[#allocation11 + $0x4c0] sm:$0xff] }
 0x384   :  { %1497 = vmatpush2.msra.mxu1 %v1409_v20  ;;  %v1565_v20 = vld [vmem:[#allocation11 + $0x4b8] sm:$0xff] }
 0x385   :  { %1498 = vmatprep.subr.mxu1 %v1408_v58  ;;  %v1601_v58 = vld [vmem:[#allocation11 + $0x5d8] sm:$0xff] }
 0x386   :  { %1499 = vmatpush2.msra.mxu1 %v1407_v59  ;;  %v1600_v59 = vld [vmem:[#allocation11 + $0x5d0] sm:$0xff] }
 0x387   :  { %1500 = vmatprep.subr.mxu1 %v1406_v61  ;;  %v1599_v61 = vld [vmem:[#allocation11 + $0x5c8] sm:$0xff] }
 0x388   :  { %1501 = vmatpush2.msra.mxu1 %v1405_v10  ;;  %v1598_v10 = vld [vmem:[#allocation11 + $0x5c0] sm:$0xff] }
 0x389   :  { %1502 = vmatprep.subr.mxu1 %v1404_v12  ;;  %v1597_v12 = vld [vmem:[#allocation11 + $0x5b8] sm:$0xff] }
 0x38a   :  { %1503 = vmatpush2.msra.mxu1 %v1403_v13  ;;  %v1596_v13 = vld [vmem:[#allocation11 + $0x5b0] sm:$0xff] }
 0x38b   :  { %1504 = vmatprep.subr.mxu1 %v1402_v14  ;;  %v1595_v14 = vld [vmem:[#allocation11 + $0x5a8] sm:$0xff] }
 0x38c   :  { %1505 = vmatpush2.msra.mxu1 %v1401_v0  ;;  %v1594_v0 = vld [vmem:[#allocation11 + $0x5a0] sm:$0xff] }
 0x38d   :  { %1506 = vmatprep.subr.mxu1 %v1400_v3  ;;  %v1593_v3 = vld [vmem:[#allocation11 + $0x598] sm:$0xff] }
 0x38e   :  { %1507 = vmatpush2.msra.mxu1 %v1399_v5  ;;  %v1592_v5 = vld [vmem:[#allocation11 + $0x590] sm:$0xff] }
 0x40c   :  { %v1152_v25 = vpop.f32.mrf.mxu1 }
 0x40d   :  { %v1153_v26 = vadd.f32 %v1152_v25, %v1079_v22  ;;  %v1561_v25 = vld [vmem:[#allocation11 + $0x498] sm:$0xff] }
 0x40e   :  { %v1154_v28 = vpop.f32.mrf.mxu1 }
 0x40f   :  { %v1155_v29 = vadd.f32 %v1154_v28, %v1083_v23  ;;  %v1175_v32 = vmax.f32 %v1153_v26, 0.0  ;;  %v1560_v26 = vld [vmem:[#allocation11 + $0x490] sm:$0xff]  ;;  %v1559_v28 = vld [vmem:[#allocation11 + $0x488] sm:$0xff] }
 0x410   :  { %v1158_v30 = vpop.f32.mrf.mxu1 }
 0x411   :  { %v1176_v31 = vmax.f32 %v1155_v29, 0.0  ;;  %v1159_v33 = vadd.f32 %v1158_v30, %v1079_v22  ;;  %v1558_v29 = vld [vmem:[#allocation11 + $0x480] sm:$0xff]  ;;  %v1557_v30 = vld [vmem:[#allocation11 + $0x478] sm:$0xff] }
 0x412   :  { %v1160_v34 = vpop.f32.mrf.mxu1 }
 0x413   :  { %v1161_v35 = vadd.f32 %v1160_v34, %v1083_v23  ;;  %1325 = vmatprep.mubr.f32.mxu0 %v1176_v31  ;;  %v1177_v38 = vmax.f32 %v1159_v33, 0.0  ;;  %v1556_v31 = vld [vmem:[#allocation11 + $0x470] sm:$0xff]  ;;  %v1554_v33 = vld [vmem:[#allocation11 + $0x460] sm:$0xff]  ;;  %v1553_v34 = vld [vmem:[#allocation11 + $0x458] sm:$0xff] }
 0x414   :  { %v1164_v36 = vpop.f32.mrf.mxu1  ;;  %1326 = vmatmul.mubr.f32.vlgmr.msra.gmra.mxu0 %v1175_v32  ;;  %v1555_v32 = vld [vmem:[#allocation11 + $0x468] sm:$0xff] }
 0x415   :  { %v1178_v37 = vmax.f32 %v1161_v35, 0.0  ;;  %v1165_v39 = vadd.f32 %v1164_v36, %v1079_v22  ;;  %1620 = vmatpush1.msra.mxu0 %v1572_v7  ;;  %v1552_v35 = vld [vmem:[#allocation11 + $0x450] sm:$0xff]  ;;  %v1551_v36 = vld [vmem:[#allocation11 + $0x448] sm:$0xff]  ;;  %v1590_v7 = vld [vmem:[#allocation11 + $0x580] sm:$0xff] }
 0x416   :  { %v1166_v40 = vpop.f32.mrf.mxu1  ;;  %1621 = vmatprep.subr.mxu0 %v1571_v11  ;;  %v1589_v11 = vld [vmem:[#allocation11 + $0x578] sm:$0xff] }
 0x417   :  { %v1167_v42 = vadd.f32 %v1166_v40, %v1083_v23  ;;  %1331 = vmatprep.mubr.f32.mxu0 %v1178_v37  ;;  %v1179_v49 = vmax.f32 %v1165_v39, 0.0  ;;  %1622 = vmatpush1.msra.mxu0 %v1570_v15  ;;  %v1550_v37 = vld [vmem:[#allocation11 + $0x440] sm:$0xff]  ;;  %v1548_v39 = vld [vmem:[#allocation11 + $0x430] sm:$0xff]  ;;  %v1547_v40 = vld [vmem:[#allocation11 + $0x428] sm:$0xff] }
 0x418   :  { %v1170_v45 = vpop.f32.mrf.mxu1  ;;  %1332 = vmatmul.mubr.f32.gmra.mxu0 %v1177_v38  ;;  %1623 = vmatprep.subr.mxu0 %v1569_v16  ;;  %v1549_v38 = vld [vmem:[#allocation11 + $0x438] sm:$0xff]  ;;  %v1588_v15 = vld [vmem:[#allocation11 + $0x570] sm:$0xff]  ;;  %v1587_v16 = vld [vmem:[#allocation11 + $0x568] sm:$0xff] }
 0x419   :  { %v1180_v47 = vmax.f32 %v1167_v42, 0.0  ;;  %v1171_v53 = vadd.f32 %v1170_v45, %v1079_v22  ;;  %1624 = vmatpush1.msra.mxu0 %v1568_v17  ;;  %v1563_v22 = vld [vmem:[#allocation11 + $0x4a8] sm:$0xff]  ;;  %v1546_v42 = vld [vmem:[#allocation11 + $0x420] sm:$0xff]  ;;  %v1545_v45 = vld [vmem:[#allocation11 + $0x418] sm:$0xff] }
 0x41a   :  { %v1172_v54 = vpop.f32.mrf.mxu1  ;;  %1625 = vmatprep.subr.mxu0 %v1567_v18  ;;  %v1586_v17 = vld [vmem:[#allocation11 + $0x560] sm:$0xff]  ;;  %v1585_v18 = vld [vmem:[#allocation11 + $0x558] sm:$0xff] }
 0x41b   :  { %v1173_v46 = vadd.f32 %v1172_v54, %v1083_v23  ;;  %1337 = vmatprep.mubr.f32.mxu0 %v1180_v47  ;;  %v1181_v57 = vmax.f32 %v1171_v53, 0.0  ;;  %1626 = vmatpush1.msra.mxu0 %v1566_v19  ;;  %v1562_v23 = vld [vmem:[#allocation11 + $0x4a0] sm:$0xff]  ;;  %v1544_v47 = vld [vmem:[#allocation11 + $0x410] sm:$0xff]  ;;  %v1605_v54 = vld [vmem:[#allocation11 + $0x5f8] sm:$0xff] }
 0x41c   :  { %1338 = vmatmul.mubr.f32.gmra.mxu0 %v1179_v49  ;;  %1627 = vmatprep.subr.mxu0 %v1565_v20  ;;  %v1543_v49 = vld [vmem:[#allocation11 + $0x408] sm:$0xff]  ;;  %v1542_v53 = vld [vmem:[#allocation11 + $0x400] sm:$0xff]  ;;  %v1584_v19 = vld [vmem:[#allocation11 + $0x550] sm:$0xff] }
 0x41d   :  { %v1182_v56 = vmax.f32 %v1173_v46, 0.0  ;;  %1628 = vmatpush1.msra.mxu0 %v1564_v21  ;;  %v1604_v46 = vld [vmem:[#allocation11 + $0x5f0] sm:$0xff]  ;;  %v1583_v20 = vld [vmem:[#allocation11 + $0x548] sm:$0xff]  ;;  %v1582_v21 = vld [vmem:[#allocation11 + $0x540] sm:$0xff] }
 0x41e   :  { %1629 = vmatprep.subr.mxu0 %v1563_v22  ;;  %v1249_v22 = vld [vmem:[#allocation13 + $0x2] sm:$0x3] }
 0x41f   :  { %1343 = vmatprep.mubr.f32.mxu0 %v1182_v56  ;;  %1630 = vmatpush1.msra.mxu0 %v1562_v23  ;;  %v1603_v56 = vld [vmem:[#allocation11 + $0x5e8] sm:$0xff]  ;;  %v1254_v23 = vrot.slane %v1249_v22, %v2962_v24 }
 0x420   :  { %1344 = vmatmul.mubr.f32.gmra.mxu0 %v1181_v57  ;;  %1631 = vmatprep.subr.mxu0 %v1561_v25  ;;  %v1602_v57 = vld [vmem:[#allocation11 + $0x5e0] sm:$0xff]  ;;  %v1258_v25 = vrot.slane %v1249_v22, %v2964_v27  ;;  %v1737_v22 = vld [vmem:[#allocation8 + $0x660] sm:$0xff] }
 0x421   :  { %1632 = vmatpush1.msra.mxu0 %v1560_v26 }
 0x422   :  { %1633 = vmatprep.subr.mxu0 %v1559_v28 }
 0x423   :  { %1634 = vmatpush1.msra.mxu0 %v1558_v29 }
 0x424   :  { %1635 = vmatprep.subr.mxu0 %v1557_v30 }
 0x425   :  { %1636 = vmatpush1.msra.mxu0 %v1556_v31 }
 0x426   :  { %1637 = vmatprep.subr.mxu0 %v1555_v32 }
 0x427   :  { %1638 = vmatpush1.msra.mxu0 %v1554_v33 }
 0x428   :  { %1639 = vmatprep.subr.mxu0 %v1553_v34 }
 0x429   :  { %1640 = vmatpush1.msra.mxu0 %v1552_v35 }
 0x42a   :  { %1641 = vmatprep.subr.mxu0 %v1551_v36 }
 0x42b   :  { %1642 = vmatpush1.msra.mxu0 %v1550_v37 }
 0x42c   :  { %1643 = vmatprep.subr.mxu0 %v1549_v38 }
 0x42d   :  { %1644 = vmatpush1.msra.mxu0 %v1548_v39 }
 0x42e   :  { %1645 = vmatprep.subr.mxu0 %v1547_v40 }
 0x42f   :  { %1646 = vmatpush1.msra.mxu0 %v1546_v42 }
 0x430   :  { %1647 = vmatprep.subr.mxu0 %v1545_v45 }
 0x431   :  { %1648 = vmatpush1.msra.mxu0 %v1544_v47 }
 0x432   :  { %1649 = vmatprep.subr.mxu0 %v1543_v49 }
 0x433   :  { %1650 = vmatpush1.msra.mxu0 %v1542_v53 }
 0x434   :  { %1651 = vmatprep.subr.mxu0 %v1605_v54 }
 0x435   :  { %1652 = vmatpush2.msra.mxu0 %v1604_v46  ;;  %v1577_v46 = vld [vmem:[#allocation11 + $0x518] sm:$0xff] }
 0x436   :  { %1653 = vmatprep.subr.mxu0 %v1603_v56  ;;  %v1576_v56 = vld [vmem:[#allocation11 + $0x510] sm:$0xff] }
 0x437   :  { %1654 = vmatpush2.msra.mxu0 %v1602_v57  ;;  %v1575_v57 = vld [vmem:[#allocation11 + $0x508] sm:$0xff] }
 0x438   :  { %1655 = vmatprep.subr.mxu0 %v1601_v58  ;;  %v1574_v58 = vld [vmem:[#allocation11 + $0x500] sm:$0xff] }
 0x439   :  { %1656 = vmatpush2.msra.mxu0 %v1600_v59  ;;  %v1756_v59 = vld [vmem:[#allocation8 + $0x6f8] sm:$0xff] }
 0x43a   :  { %1657 = vmatprep.subr.mxu0 %v1599_v61  ;;  %v1755_v61 = vld [vmem:[#allocation8 + $0x6f0] sm:$0xff]  ;;  %1802 = vmatprep.subr.mxu1 %v1756_v59  ;;  %v1774_v59 = vld [vmem:[#allocation8 + $0x788] sm:$0xff] }
 0x43b   :  { %1658 = vmatpush2.msra.mxu0 %v1598_v10  ;;  %v1754_v10 = vld [vmem:[#allocation8 + $0x6e8] sm:$0xff] }
 0x43c   :  { %1659 = vmatprep.subr.mxu0 %v1597_v12  ;;  %v1753_v12 = vld [vmem:[#allocation8 + $0x6e0] sm:$0xff] }
 0x43d   :  { %1660 = vmatpush2.msra.mxu0 %v1596_v13  ;;  %v1752_v13 = vld [vmem:[#allocation8 + $0x6d8] sm:$0xff] }
 0x43e   :  { %1661 = vmatprep.subr.mxu0 %v1595_v14  ;;  %v1751_v14 = vld [vmem:[#allocation8 + $0x6d0] sm:$0xff] }
 0x43f   :  { %1662 = vmatpush2.msra.mxu0 %v1594_v0  ;;  %v1750_v0 = vld [vmem:[#allocation8 + $0x6c8] sm:$0xff] }
 0x440   :  { %1663 = vmatprep.subr.mxu0 %v1593_v3  ;;  %v1749_v3 = vld [vmem:[#allocation8 + $0x6c0] sm:$0xff] }
 0x441   :  { %1664 = vmatpush2.msra.mxu0 %v1592_v5  ;;  %v1748_v5 = vld [vmem:[#allocation8 + $0x6b8] sm:$0xff] }
 0x442   :  { %1665 = vmatprep.subr.mxu0 %v1591_v6  ;;  %v1747_v6 = vld [vmem:[#allocation8 + $0x6b0] sm:$0xff] }
 0x443   :  { %1666 = vmatpush2.msra.mxu0 %v1590_v7  ;;  %v1746_v7 = vld [vmem:[#allocation8 + $0x6a8] sm:$0xff] }
 0x444   :  { %1667 = vmatprep.subr.mxu0 %v1589_v11  ;;  %v1745_v11 = vld [vmem:[#allocation8 + $0x6a0] sm:$0xff] }
 0x445   :  { %1668 = vmatpush2.msra.mxu0 %v1588_v15  ;;  %v1744_v15 = vld [vmem:[#allocation8 + $0x698] sm:$0xff] }
 0x446   :  { %1669 = vmatprep.subr.mxu0 %v1587_v16  ;;  %v1743_v16 = vld [vmem:[#allocation8 + $0x690] sm:$0xff] }
 0x447   :  { %1670 = vmatpush2.msra.mxu0 %v1586_v17  ;;  %v1742_v17 = vld [vmem:[#allocation8 + $0x688] sm:$0xff] }
 0x448   :  { %1671 = vmatprep.subr.mxu0 %v1585_v18  ;;  %v1741_v18 = vld [vmem:[#allocation8 + $0x680] sm:$0xff] }
 0x449   :  { %1672 = vmatpush2.msra.mxu0 %v1584_v19  ;;  %v1740_v19 = vld [vmem:[#allocation8 + $0x678] sm:$0xff] }
 0x44a   :  { %1673 = vmatprep.subr.mxu0 %v1583_v20  ;;  %v1739_v20 = vld [vmem:[#allocation8 + $0x670] sm:$0xff] }
 0x44b   :  { %1674 = vmatpush2.msra.mxu0 %v1582_v21  ;;  %v1738_v21 = vld [vmem:[#allocation8 + $0x668] sm:$0xff] }
 0x44c   :  { %1675 = vmatprep.subr.mxu0 %v1581_v9  ;;  %v1782_v9 = vld [vmem:[#allocation8 + $0x7c8] sm:$0xff] }
 0x44d   :  { %1676 = vmatpush2.msra.mxu0 %v1580_v4  ;;  %v1781_v4 = vld [vmem:[#allocation8 + $0x7c0] sm:$0xff] }
 0x4d4   :  { %v1327_v26 = vpop.f32.mrf.mxu0 }
 0x4d5   :  { %v1328_v28 = vadd.f32 %v1327_v26, %v1254_v23  ;;  %v1734_v26 = vld [vmem:[#allocation8 + $0x648] sm:$0xff] }
 0x4d6   :  { %v1329_v29 = vpop.f32.mrf.mxu0 }
 0x4d7   :  { %v1330_v30 = vadd.f32 %v1329_v29, %v1258_v25  ;;  %v3074_v31 = vadd.f32 %v1328_v28, %v1000_v50  ;;  %v1733_v28 = vld [vmem:[#allocation8 + $0x640] sm:$0xff]  ;;  %v1732_v29 = vld [vmem:[#allocation8 + $0x638] sm:$0xff] }
 0x4d8   :  { %v1333_v32 = vpop.f32.mrf.mxu0 }
 0x4d9   :  { %v3078_v33 = vadd.f32 %v1330_v30, %v1001_v48  ;;  %v1334_v34 = vadd.f32 %v1333_v32, %v1254_v23  ;;  %v1358_v38 = vmax.f32 %v3074_v31, 0.0  ;;  %v1731_v30 = vld [vmem:[#allocation8 + $0x630] sm:$0xff]  ;;  %v1730_v32 = vld [vmem:[#allocation8 + $0x628] sm:$0xff] }
 0x4da   :  { %v1335_v35 = vpop.f32.mrf.mxu0 }
 0x4db   :  { %v1359_v36 = vmax.f32 %v3078_v33, 0.0  ;;  %v1336_v37 = vadd.f32 %v1335_v35, %v1258_v25  ;;  %v3084_v39 = vadd.f32 %v1334_v34, %v1002_v55  ;;  %v1729_v34 = vld [vmem:[#allocation8 + $0x620] sm:$0xff]  ;;  %v1728_v35 = vld [vmem:[#allocation8 + $0x618] sm:$0xff] }
 0x4dc   :  { %v1339_v40 = vpop.f32.mrf.mxu0 }
 0x4dd   :  { %v3088_v41 = vadd.f32 %v1336_v37, %v1003_v52  ;;  %v1340_v50 = vadd.f32 %v1339_v40, %v1254_v23  ;;  %1508 = vmatprep.mubr.f32.mxu1 %v1359_v36  ;;  %v1360_v51 = vmax.f32 %v3084_v39, 0.0  ;;  %v1727_v37 = vld [vmem:[#allocation8 + $0x610] sm:$0xff]  ;;  %v1726_v40 = vld [vmem:[#allocation8 + $0x608] sm:$0xff] }
 0x4de   :  { %v1341_v43 = vpop.f32.mrf.mxu0  ;;  %1509 = vmatmul.mubr.f32.vlgmr.msra.gmra.mxu1 %v1358_v38 }
 0x4df   :  { %v1361_v48 = vmax.f32 %v3088_v41, 0.0  ;;  %v1342_v42 = vadd.f32 %v1341_v43, %v1258_v25  ;;  %v3098_v55 = vadd.f32 %v1340_v50, %v1004_v2  ;;  %1803 = vmatpush1.msra.mxu1 %v1755_v61  ;;  %v1725_v50 = vld [vmem:[#allocation8 + $0x600] sm:$0xff]  ;;  %v1788_v43 = vld [vmem:[#allocation8 + $0x7f8] sm:$0xff] }
 0x4e0   :  { %v1345_v44 = vpop.f32.mrf.mxu0  ;;  %1804 = vmatprep.subr.mxu1 %v1754_v10  ;;  %v1773_v61 = vld [vmem:[#allocation8 + $0x780] sm:$0xff]  ;;  %v1772_v10 = vld [vmem:[#allocation8 + $0x778] sm:$0xff] }
 0x4e1   :  { %v3102_v52 = vadd.f32 %v1342_v42, %v1005_v60  ;;  %v1346_v45 = vadd.f32 %v1345_v44, %v1254_v23  ;;  %1514 = vmatprep.mubr.f32.mxu1 %v1361_v48  ;;  %v1362_v1 = vmax.f32 %v3098_v55, 0.0  ;;  %1805 = vmatpush1.msra.mxu1 %v1753_v12  ;;  %v1736_v23 = vld [vmem:[#allocation8 + $0x658] sm:$0xff]  ;;  %v1787_v42 = vld [vmem:[#allocation8 + $0x7f0] sm:$0xff]  ;;  %v1786_v44 = vld [vmem:[#allocation8 + $0x7e8] sm:$0xff] }
 0x4e2   :  { %v1347_v47 = vpop.f32.mrf.mxu0  ;;  %1515 = vmatmul.mubr.f32.gmra.mxu1 %v1360_v51  ;;  %1806 = vmatprep.subr.mxu1 %v1752_v13  ;;  %v1771_v12 = vld [vmem:[#allocation8 + $0x770] sm:$0xff]  ;;  %v1770_v13 = vld [vmem:[#allocation8 + $0x768] sm:$0xff] }
 0x4e3   :  { %v1363_v49 = vmax.f32 %v3102_v52, 0.0  ;;  %v1348_v53 = vadd.f32 %v1347_v47, %v1258_v25  ;;  %v3112_v2 = vadd.f32 %v1346_v45, %v1006_v62  ;;  %v1578_v62 = vld [vmem:[#allocation11 + $0x520] sm:$0xff]  ;;  %1807 = vmatpush1.msra.mxu1 %v1751_v14  ;;  %v1785_v45 = vld [vmem:[#allocation8 + $0x7e0] sm:$0xff]  ;;  %v1784_v47 = vld [vmem:[#allocation8 + $0x7d8] sm:$0xff] }
 0x4e4   :  { %1808 = vmatprep.subr.mxu1 %v1750_v0  ;;  %v1735_v25 = vld [vmem:[#allocation8 + $0x650] sm:$0xff]  ;;  %v1769_v14 = vld [vmem:[#allocation8 + $0x760] sm:$0xff]  ;;  %v1768_v0 = vld [vmem:[#allocation8 + $0x758] sm:$0xff] }
 0x4e5   :  { %v3116_v63 = vadd.f32 %v1348_v53, %v1007_v8  ;;  %1520 = vmatprep.mubr.f32.mxu1 %v1363_v49  ;;  %v1364_v54 = vmax.f32 %v3112_v2, 0.0  ;;  %v1579_v8 = vld [vmem:[#allocation11 + $0x528] sm:$0xff]  ;;  %1809 = vmatpush1.msra.mxu1 %v1749_v3  ;;  %v1939_v2 = vld [vmem:[#allocation11 + $0x738] sm:$0xff] }
 0x4e6   :  { %1521 = vmatmul.mubr.f32.gmra.mxu1 %v1362_v1  ;;  %1677 = vmatprep.subr.mxu0 %v1579_v8  ;;  %v1783_v53 = vld [vmem:[#allocation8 + $0x7d0] sm:$0xff]  ;;  %v1780_v8 = vld [vmem:[#allocation8 + $0x7b8] sm:$0xff] }
 0x4e7   :  { %v1365_v60 = vmax.f32 %v3116_v63, 0.0  ;;  %1678 = vmatpush2.msra.mxu0 %v1578_v62  ;;  %1810 = vmatprep.subr.mxu1 %v1748_v5  ;;  %v1779_v62 = vld [vmem:[#allocation8 + $0x7b0] sm:$0xff]  ;;  %v1432_v5 = vld [vmem:[#allocation10 + $0x4] sm:$0x3]  ;;  %v1938_v63 = vld [vmem:[#allocation11 + $0x730] sm:$0xff] }
 0x4e8   :  { %1679 = vmatprep.subr.mxu0 %v1577_v46  ;;  %1811 = vmatpush1.msra.mxu1 %v1747_v6  ;;  %v1778_v46 = vld [vmem:[#allocation8 + $0x7a8] sm:$0xff]  ;;  %v1767_v3 = vld [vmem:[#allocation8 + $0x750] sm:$0xff]  ;;  %v1437_v6 = vrot.slane %v1432_v5, %v2962_v24 }
 0x4e9   :  { %1526 = vmatprep.mubr.f32.mxu1 %v1365_v60  ;;  %1680 = vmatpush2.msra.mxu0 %v1576_v56  ;;  %v1777_v56 = vld [vmem:[#allocation8 + $0x7a0] sm:$0xff] }
 0x4ea   :  { %1527 = vmatmul.mubr.f32.gmra.mxu1 %v1364_v54  ;;  %1681 = vmatprep.subr.mxu0 %v1575_v57  ;;  %v1776_v57 = vld [vmem:[#allocation8 + $0x798] sm:$0xff] }
 0x4eb   :  { %1682 = vmatpush2.msra.mxu0 %v1574_v58  ;;  %1812 = vmatprep.subr.mxu1 %v1746_v7  ;;  %v1775_v58 = vld [vmem:[#allocation8 + $0x790] sm:$0xff]  ;;  %v1441_v7 = vrot.slane %v1432_v5, %v2964_v27  ;;  %v1922_v5 = vld [vmem:[#allocation11 + $0x6b0] sm:$0xff] }
 0x4ec   :  { %1813 = vmatpush1.msra.mxu1 %v1745_v11 }
 0x4ed   :  { %1814 = vmatprep.subr.mxu1 %v1744_v15 }
 0x4ee   :  { %1815 = vmatpush1.msra.mxu1 %v1743_v16 }
 0x4ef   :  { %1816 = vmatprep.subr.mxu1 %v1742_v17 }
 0x4f0   :  { %1817 = vmatpush1.msra.mxu1 %v1741_v18 }
 0x4f1   :  { %1818 = vmatprep.subr.mxu1 %v1740_v19 }
 0x4f2   :  { %1819 = vmatpush1.msra.mxu1 %v1739_v20 }
 0x4f3   :  { %1820 = vmatprep.subr.mxu1 %v1738_v21 }
 0x4f4   :  { %1821 = vmatpush1.msra.mxu1 %v1737_v22 }
 0x4f5   :  { %1822 = vmatprep.subr.mxu1 %v1736_v23 }
 0x4f6   :  { %1823 = vmatpush1.msra.mxu1 %v1735_v25 }
 0x4f7   :  { %1824 = vmatprep.subr.mxu1 %v1734_v26 }
 0x4f8   :  { %1825 = vmatpush1.msra.mxu1 %v1733_v28 }
 0x4f9   :  { %1826 = vmatprep.subr.mxu1 %v1732_v29 }
 0x4fa   :  { %1827 = vmatpush1.msra.mxu1 %v1731_v30 }
 0x4fb   :  { %1828 = vmatprep.subr.mxu1 %v1730_v32 }
 0x4fc   :  { %1829 = vmatpush1.msra.mxu1 %v1729_v34 }
 0x4fd   :  { %1830 = vmatprep.subr.mxu1 %v1728_v35 }
 0x4fe   :  { %1831 = vmatpush1.msra.mxu1 %v1727_v37 }
 0x4ff   :  { %1832 = vmatprep.subr.mxu1 %v1726_v40 }
 0x500   :  { %1833 = vmatpush1.msra.mxu1 %v1725_v50 }
 0x501   :  { %1834 = vmatprep.subr.mxu1 %v1788_v43 }
 0x502   :  { %1835 = vmatpush2.msra.mxu1 %v1787_v42 }
 0x503   :  { %1836 = vmatprep.subr.mxu1 %v1786_v44 }
 0x504   :  { %1837 = vmatpush2.msra.mxu1 %v1785_v45  ;;  %v1766_v45 = vld [vmem:[#allocation8 + $0x748] sm:$0xff] }
 0x505   :  { %1838 = vmatprep.subr.mxu1 %v1784_v47  ;;  %v1765_v47 = vld [vmem:[#allocation8 + $0x740] sm:$0xff] }
 0x506   :  { %1839 = vmatpush2.msra.mxu1 %v1783_v53  ;;  %v1764_v53 = vld [vmem:[#allocation8 + $0x738] sm:$0xff] }
 0x507   :  { %1840 = vmatprep.subr.mxu1 %v1782_v9  ;;  %v1763_v9 = vld [vmem:[#allocation8 + $0x730] sm:$0xff] }
 0x508   :  { %1841 = vmatpush2.msra.mxu1 %v1781_v4  ;;  %v1762_v4 = vld [vmem:[#allocation8 + $0x728] sm:$0xff] }
 0x509   :  { %1842 = vmatprep.subr.mxu1 %v1780_v8  ;;  %v1761_v8 = vld [vmem:[#allocation8 + $0x720] sm:$0xff] }
 0x50a   :  { %1843 = vmatpush2.msra.mxu1 %v1779_v62  ;;  %v1760_v62 = vld [vmem:[#allocation8 + $0x718] sm:$0xff] }
 0x50b   :  { %1844 = vmatprep.subr.mxu1 %v1778_v46  ;;  %v1759_v46 = vld [vmem:[#allocation8 + $0x710] sm:$0xff] }
 0x50c   :  { %1845 = vmatpush2.msra.mxu1 %v1777_v56  ;;  %v1758_v56 = vld [vmem:[#allocation8 + $0x708] sm:$0xff] }
 0x50d   :  { %1846 = vmatprep.subr.mxu1 %v1776_v57  ;;  %v1757_v57 = vld [vmem:[#allocation8 + $0x700] sm:$0xff] }
 0x50e   :  { %1847 = vmatpush2.msra.mxu1 %v1775_v58  ;;  %v1931_v58 = vld [vmem:[#allocation11 + $0x6f8] sm:$0xff] }
 0x50f   :  { %1848 = vmatprep.subr.mxu1 %v1774_v59  ;;  %v1930_v59 = vld [vmem:[#allocation11 + $0x6f0] sm:$0xff]  ;;  %1977 = vmatprep.subr.mxu0 %v1931_v58  ;;  %v1949_v58 = vld [vmem:[#allocation11 + $0x788] sm:$0xff] }
 0x510   :  { %1849 = vmatpush2.msra.mxu1 %v1773_v61  ;;  %v1929_v61 = vld [vmem:[#allocation11 + $0x6e8] sm:$0xff] }
 0x511   :  { %1850 = vmatprep.subr.mxu1 %v1772_v10  ;;  %v1928_v10 = vld [vmem:[#allocation11 + $0x6e0] sm:$0xff] }
 0x512   :  { %1851 = vmatpush2.msra.mxu1 %v1771_v12  ;;  %v1927_v12 = vld [vmem:[#allocation11 + $0x6d8] sm:$0xff] }
 0x513   :  { %1852 = vmatprep.subr.mxu1 %v1770_v13  ;;  %v1926_v13 = vld [vmem:[#allocation11 + $0x6d0] sm:$0xff] }
 0x514   :  { %1853 = vmatpush2.msra.mxu1 %v1769_v14  ;;  %v1925_v14 = vld [vmem:[#allocation11 + $0x6c8] sm:$0xff] }
 0x515   :  { %1854 = vmatprep.subr.mxu1 %v1768_v0  ;;  %v1924_v0 = vld [vmem:[#allocation11 + $0x6c0] sm:$0xff] }
 0x516   :  { %1855 = vmatpush2.msra.mxu1 %v1767_v3  ;;  %v1923_v3 = vld [vmem:[#allocation11 + $0x6b8] sm:$0xff] }
 0x517   :  { %1856 = vmatprep.subr.mxu1 %v1766_v45  ;;  %v1959_v45 = vld [vmem:[#allocation11 + $0x7d8] sm:$0xff] }
 0x518   :  { %1857 = vmatpush2.msra.mxu1 %v1765_v47  ;;  %v1958_v47 = vld [vmem:[#allocation11 + $0x7d0] sm:$0xff] }
 0x519   :  { %1858 = vmatprep.subr.mxu1 %v1764_v53  ;;  %v1957_v53 = vld [vmem:[#allocation11 + $0x7c8] sm:$0xff] }
 0x51a   :  { %1859 = vmatpush2.msra.mxu1 %v1763_v9  ;;  %v1956_v9 = vld [vmem:[#allocation11 + $0x7c0] sm:$0xff] }
 0x51b   :  { %1860 = vmatprep.subr.mxu1 %v1762_v4  ;;  %v1955_v4 = vld [vmem:[#allocation11 + $0x7b8] sm:$0xff] }
 0x51c   :  { %1861 = vmatpush2.msra.mxu1 %v1761_v8  ;;  %v1954_v8 = vld [vmem:[#allocation11 + $0x7b0] sm:$0xff] }
 0x51d   :  { %1862 = vmatprep.subr.mxu1 %v1760_v62  ;;  %v1953_v62 = vld [vmem:[#allocation11 + $0x7a8] sm:$0xff] }
 0x51e   :  { %1863 = vmatpush2.msra.mxu1 %v1759_v46  ;;  %v1952_v46 = vld [vmem:[#allocation11 + $0x7a0] sm:$0xff] }
 0x51f   :  { %1864 = vmatprep.subr.mxu1 %v1758_v56  ;;  %v1951_v56 = vld [vmem:[#allocation11 + $0x798] sm:$0xff] }
 0x520   :  { %1865 = vmatpush2.msra.mxu1 %v1757_v57  ;;  %v1950_v57 = vld [vmem:[#allocation11 + $0x790] sm:$0xff] }
 0x59e   :  { %v1510_v11 = vpop.f32.mrf.mxu1 }
 0x59f   :  { %v1511_v15 = vadd.f32 %v1510_v11, %v1437_v6  ;;  %v1919_v11 = vld [vmem:[#allocation11 + $0x698] sm:$0xff] }
 0x5a0   :  { %v1512_v16 = vpop.f32.mrf.mxu1 }
 0x5a1   :  { %v1513_v17 = vadd.f32 %v1512_v16, %v1441_v7  ;;  %v1533_v20 = vmax.f32 %v1511_v15, 0.0  ;;  %v1918_v15 = vld [vmem:[#allocation11 + $0x690] sm:$0xff]  ;;  %v1917_v16 = vld [vmem:[#allocation11 + $0x688] sm:$0xff] }
 0x5a2   :  { %v1516_v18 = vpop.f32.mrf.mxu1 }
 0x5a3   :  { %v1534_v19 = vmax.f32 %v1513_v17, 0.0  ;;  %v1517_v21 = vadd.f32 %v1516_v18, %v1437_v6  ;;  %v1916_v17 = vld [vmem:[#allocation11 + $0x680] sm:$0xff]  ;;  %v1915_v18 = vld [vmem:[#allocation11 + $0x678] sm:$0xff] }
 0x5a4   :  { %v1518_v22 = vpop.f32.mrf.mxu1 }
 0x5a5   :  { %v1519_v23 = vadd.f32 %v1518_v22, %v1441_v7  ;;  %1683 = vmatprep.mubr.f32.mxu0 %v1534_v19  ;;  %v1535_v28 = vmax.f32 %v1517_v21, 0.0  ;;  %v1914_v19 = vld [vmem:[#allocation11 + $0x670] sm:$0xff]  ;;  %v1912_v21 = vld [vmem:[#allocation11 + $0x660] sm:$0xff]  ;;  %v1911_v22 = vld [vmem:[#allocation11 + $0x658] sm:$0xff] }
 0x5a6   :  { %v1522_v25 = vpop.f32.mrf.mxu1  ;;  %1684 = vmatmul.mubr.f32.vlgmr.msra.gmra.mxu0 %v1533_v20  ;;  %v1913_v20 = vld [vmem:[#allocation11 + $0x668] sm:$0xff] }
 0x5a7   :  { %v1536_v26 = vmax.f32 %v1519_v23, 0.0  ;;  %v1523_v29 = vadd.f32 %v1522_v25, %v1437_v6  ;;  %1978 = vmatpush1.msra.mxu0 %v1930_v59  ;;  %v1910_v23 = vld [vmem:[#allocation11 + $0x650] sm:$0xff]  ;;  %v1909_v25 = vld [vmem:[#allocation11 + $0x648] sm:$0xff]  ;;  %v1948_v59 = vld [vmem:[#allocation11 + $0x780] sm:$0xff] }
 0x5a8   :  { %v1524_v30 = vpop.f32.mrf.mxu1  ;;  %1979 = vmatprep.subr.mxu0 %v1929_v61  ;;  %v1947_v61 = vld [vmem:[#allocation11 + $0x778] sm:$0xff] }
 0x5a9   :  { %v1525_v32 = vadd.f32 %v1524_v30, %v1441_v7  ;;  %1689 = vmatprep.mubr.f32.mxu0 %v1536_v26  ;;  %v1537_v37 = vmax.f32 %v1523_v29, 0.0  ;;  %1980 = vmatpush1.msra.mxu0 %v1928_v10  ;;  %v1908_v26 = vld [vmem:[#allocation11 + $0x640] sm:$0xff]  ;;  %v1906_v29 = vld [vmem:[#allocation11 + $0x630] sm:$0xff]  ;;  %v1905_v30 = vld [vmem:[#allocation11 + $0x628] sm:$0xff] }
 0x5aa   :  { %v1528_v34 = vpop.f32.mrf.mxu1  ;;  %1690 = vmatmul.mubr.f32.gmra.mxu0 %v1535_v28  ;;  %1981 = vmatprep.subr.mxu0 %v1927_v12  ;;  %v1907_v28 = vld [vmem:[#allocation11 + $0x638] sm:$0xff]  ;;  %v1946_v10 = vld [vmem:[#allocation11 + $0x770] sm:$0xff]  ;;  %v1945_v12 = vld [vmem:[#allocation11 + $0x768] sm:$0xff] }
 0x5ab   :  { %v1538_v35 = vmax.f32 %v1525_v32, 0.0  ;;  %v1529_v40 = vadd.f32 %v1528_v34, %v1437_v6  ;;  %1982 = vmatpush1.msra.mxu0 %v1926_v13  ;;  %v1921_v6 = vld [vmem:[#allocation11 + $0x6a8] sm:$0xff]  ;;  %v1904_v32 = vld [vmem:[#allocation11 + $0x620] sm:$0xff]  ;;  %v1903_v34 = vld [vmem:[#allocation11 + $0x618] sm:$0xff] }
 0x5ac   :  { %v1530_v50 = vpop.f32.mrf.mxu1  ;;  %1983 = vmatprep.subr.mxu0 %v1925_v14  ;;  %v1944_v13 = vld [vmem:[#allocation11 + $0x760] sm:$0xff]  ;;  %v1943_v14 = vld [vmem:[#allocation11 + $0x758] sm:$0xff] }
 0x5ad   :  { %v1531_v43 = vadd.f32 %v1530_v50, %v1441_v7  ;;  %1695 = vmatprep.mubr.f32.mxu0 %v1538_v35  ;;  %v1539_v44 = vmax.f32 %v1529_v40, 0.0  ;;  %1984 = vmatpush1.msra.mxu0 %v1924_v0  ;;  %v1920_v7 = vld [vmem:[#allocation11 + $0x6a0] sm:$0xff]  ;;  %v1902_v35 = vld [vmem:[#allocation11 + $0x610] sm:$0xff]  ;;  %v1963_v50 = vld [vmem:[#allocation11 + $0x7f8] sm:$0xff] }
 0x5ae   :  { %1696 = vmatmul.mubr.f32.gmra.mxu0 %v1537_v37  ;;  %1985 = vmatprep.subr.mxu0 %v1923_v3  ;;  %v1901_v37 = vld [vmem:[#allocation11 + $0x608] sm:$0xff]  ;;  %v1900_v40 = vld [vmem:[#allocation11 + $0x600] sm:$0xff]  ;;  %v1942_v0 = vld [vmem:[#allocation11 + $0x750] sm:$0xff] }
 0x5af   :  { %v1540_v42 = vmax.f32 %v1531_v43, 0.0  ;;  %1986 = vmatpush1.msra.mxu0 %v1922_v5  ;;  %v1962_v43 = vld [vmem:[#allocation11 + $0x7f0] sm:$0xff]  ;;  %v1941_v3 = vld [vmem:[#allocation11 + $0x748] sm:$0xff]  ;;  %v1940_v5 = vld [vmem:[#allocation11 + $0x740] sm:$0xff] }
 0x5b0   :  { %1987 = vmatprep.subr.mxu0 %v1921_v6  ;;  %v1607_v6 = vld [vmem:[#allocation13 + $0x4] sm:$0x3] }
 0x5b1   :  { %1701 = vmatprep.mubr.f32.mxu0 %v1540_v42  ;;  %1988 = vmatpush1.msra.mxu0 %v1920_v7  ;;  %v1961_v42 = vld [vmem:[#allocation11 + $0x7e8] sm:$0xff]  ;;  %v1612_v7 = vrot.slane %v1607_v6, %v2962_v24 }
 0x5b2   :  { %1702 = vmatmul.mubr.f32.gmra.mxu0 %v1539_v44  ;;  %1989 = vmatprep.subr.mxu0 %v1919_v11  ;;  %v1960_v44 = vld [vmem:[#allocation11 + $0x7e0] sm:$0xff]  ;;  %v1616_v11 = vrot.slane %v1607_v6, %v2964_v27  ;;  %v2095_v6 = vld [vmem:[#allocation8 + $0x860] sm:$0xff] }
 0x5b3   :  { %1990 = vmatpush1.msra.mxu0 %v1918_v15 }
 0x5b4   :  { %1991 = vmatprep.subr.mxu0 %v1917_v16 }
 0x5b5   :  { %1992 = vmatpush1.msra.mxu0 %v1916_v17 }
 0x5b6   :  { %1993 = vmatprep.subr.mxu0 %v1915_v18 }
 0x5b7   :  { %1994 = vmatpush1.msra.mxu0 %v1914_v19 }
 0x5b8   :  { %1995 = vmatprep.subr.mxu0 %v1913_v20 }
 0x5b9   :  { %1996 = vmatpush1.msra.mxu0 %v1912_v21 }
 0x5ba   :  { %1997 = vmatprep.subr.mxu0 %v1911_v22 }
 0x5bb   :  { %1998 = vmatpush1.msra.mxu0 %v1910_v23 }
 0x5bc   :  { %1999 = vmatprep.subr.mxu0 %v1909_v25 }
 0x5bd   :  { %2000 = vmatpush1.msra.mxu0 %v1908_v26 }
 0x5be   :  { %2001 = vmatprep.subr.mxu0 %v1907_v28 }
 0x5bf   :  { %2002 = vmatpush1.msra.mxu0 %v1906_v29 }
 0x5c0   :  { %2003 = vmatprep.subr.mxu0 %v1905_v30 }
 0x5c1   :  { %2004 = vmatpush1.msra.mxu0 %v1904_v32 }
 0x5c2   :  { %2005 = vmatprep.subr.mxu0 %v1903_v34 }
 0x5c3   :  { %2006 = vmatpush1.msra.mxu0 %v1902_v35 }
 0x5c4   :  { %2007 = vmatprep.subr.mxu0 %v1901_v37 }
 0x5c5   :  { %2008 = vmatpush1.msra.mxu0 %v1900_v40 }
 0x5c6   :  { %2009 = vmatprep.subr.mxu0 %v1963_v50 }
 0x5c7   :  { %2010 = vmatpush2.msra.mxu0 %v1962_v43  ;;  %v1935_v43 = vld [vmem:[#allocation11 + $0x718] sm:$0xff] }
 0x5c8   :  { %2011 = vmatprep.subr.mxu0 %v1961_v42  ;;  %v1934_v42 = vld [vmem:[#allocation11 + $0x710] sm:$0xff] }
 0x5c9   :  { %2012 = vmatpush2.msra.mxu0 %v1960_v44  ;;  %v1933_v44 = vld [vmem:[#allocation11 + $0x708] sm:$0xff] }
 0x5ca   :  { %2013 = vmatprep.subr.mxu0 %v1959_v45  ;;  %v1932_v45 = vld [vmem:[#allocation11 + $0x700] sm:$0xff] }
 0x5cb   :  { %2014 = vmatpush2.msra.mxu0 %v1958_v47  ;;  %v2114_v47 = vld [vmem:[#allocation8 + $0x8f8] sm:$0xff] }
 0x5cc   :  { %2015 = vmatprep.subr.mxu0 %v1957_v53  ;;  %v2113_v53 = vld [vmem:[#allocation8 + $0x8f0] sm:$0xff]  ;;  %2160 = vmatprep.subr.mxu1 %v2114_v47  ;;  %v2132_v47 = vld [vmem:[#allocation8 + $0x988] sm:$0xff] }
 0x5cd   :  { %2016 = vmatpush2.msra.mxu0 %v1956_v9  ;;  %v2112_v9 = vld [vmem:[#allocation8 + $0x8e8] sm:$0xff] }
 0x5ce   :  { %2017 = vmatprep.subr.mxu0 %v1955_v4  ;;  %v2111_v4 = vld [vmem:[#allocation8 + $0x8e0] sm:$0xff] }
 0x5cf   :  { %2018 = vmatpush2.msra.mxu0 %v1954_v8  ;;  %v2110_v8 = vld [vmem:[#allocation8 + $0x8d8] sm:$0xff] }
 0x5d0   :  { %2019 = vmatprep.subr.mxu0 %v1953_v62  ;;  %v2109_v62 = vld [vmem:[#allocation8 + $0x8d0] sm:$0xff] }
 0x5d1   :  { %2020 = vmatpush2.msra.mxu0 %v1952_v46  ;;  %v2108_v46 = vld [vmem:[#allocation8 + $0x8c8] sm:$0xff] }
 0x5d2   :  { %2021 = vmatprep.subr.mxu0 %v1951_v56  ;;  %v2107_v56 = vld [vmem:[#allocation8 + $0x8c0] sm:$0xff] }
 0x5d3   :  { %2022 = vmatpush2.msra.mxu0 %v1950_v57  ;;  %v2106_v57 = vld [vmem:[#allocation8 + $0x8b8] sm:$0xff] }
 0x5d4   :  { %2023 = vmatprep.subr.mxu0 %v1949_v58  ;;  %v2105_v58 = vld [vmem:[#allocation8 + $0x8b0] sm:$0xff] }
 0x5d5   :  { %2024 = vmatpush2.msra.mxu0 %v1948_v59  ;;  %v2104_v59 = vld [vmem:[#allocation8 + $0x8a8] sm:$0xff] }
 0x5d6   :  { %2025 = vmatprep.subr.mxu0 %v1947_v61  ;;  %v2103_v61 = vld [vmem:[#allocation8 + $0x8a0] sm:$0xff] }
 0x5d7   :  { %2026 = vmatpush2.msra.mxu0 %v1946_v10  ;;  %v2102_v10 = vld [vmem:[#allocation8 + $0x898] sm:$0xff] }
 0x5d8   :  { %2027 = vmatprep.subr.mxu0 %v1945_v12  ;;  %v2101_v12 = vld [vmem:[#allocation8 + $0x890] sm:$0xff] }
 0x5d9   :  { %2028 = vmatpush2.msra.mxu0 %v1944_v13  ;;  %v2100_v13 = vld [vmem:[#allocation8 + $0x888] sm:$0xff] }
 0x5da   :  { %2029 = vmatprep.subr.mxu0 %v1943_v14  ;;  %v2099_v14 = vld [vmem:[#allocation8 + $0x880] sm:$0xff] }
 0x5db   :  { %2030 = vmatpush2.msra.mxu0 %v1942_v0  ;;  %v2098_v0 = vld [vmem:[#allocation8 + $0x878] sm:$0xff] }
 0x5dc   :  { %2031 = vmatprep.subr.mxu0 %v1941_v3  ;;  %v2097_v3 = vld [vmem:[#allocation8 + $0x870] sm:$0xff] }
 0x5dd   :  { %2032 = vmatpush2.msra.mxu0 %v1940_v5  ;;  %v2096_v5 = vld [vmem:[#allocation8 + $0x868] sm:$0xff] }
 0x5de   :  { %2033 = vmatprep.subr.mxu0 %v1939_v2  ;;  %v2140_v2 = vld [vmem:[#allocation8 + $0x9c8] sm:$0xff] }
 0x5df   :  { %2034 = vmatpush2.msra.mxu0 %v1938_v63  ;;  %v2139_v63 = vld [vmem:[#allocation8 + $0x9c0] sm:$0xff] }
 0x666   :  { %v1685_v15 = vpop.f32.mrf.mxu0 }
 0x667   :  { %v1686_v16 = vadd.f32 %v1685_v15, %v1612_v7  ;;  %v2092_v15 = vld [vmem:[#allocation8 + $0x848] sm:$0xff] }
 0x668   :  { %v1687_v17 = vpop.f32.mrf.mxu0 }
 0x669   :  { %v1688_v18 = vadd.f32 %v1687_v17, %v1616_v11  ;;  %v3134_v19 = vadd.f32 %v1686_v16, %v1358_v38  ;;  %v2091_v16 = vld [vmem:[#allocation8 + $0x840] sm:$0xff]  ;;  %v2090_v17 = vld [vmem:[#allocation8 + $0x838] sm:$0xff] }
 0x66a   :  { %v1691_v20 = vpop.f32.mrf.mxu0 }
 0x66b   :  { %v3138_v21 = vadd.f32 %v1688_v18, %v1359_v36  ;;  %v1692_v22 = vadd.f32 %v1691_v20, %v1612_v7  ;;  %v1716_v28 = vmax.f32 %v3134_v19, 0.0  ;;  %v2089_v18 = vld [vmem:[#allocation8 + $0x830] sm:$0xff]  ;;  %v2088_v20 = vld [vmem:[#allocation8 + $0x828] sm:$0xff] }
 0x66c   :  { %v1693_v23 = vpop.f32.mrf.mxu0 }
 0x66d   :  { %v1717_v25 = vmax.f32 %v3138_v21, 0.0  ;;  %v1694_v26 = vadd.f32 %v1693_v23, %v1616_v11  ;;  %v3144_v29 = vadd.f32 %v1692_v22, %v1360_v51  ;;  %v2087_v22 = vld [vmem:[#allocation8 + $0x820] sm:$0xff]  ;;  %v2086_v23 = vld [vmem:[#allocation8 + $0x818] sm:$0xff] }
 0x66e   :  { %v1697_v30 = vpop.f32.mrf.mxu0 }
 0x66f   :  { %v3148_v31 = vadd.f32 %v1694_v26, %v1361_v48  ;;  %v1698_v38 = vadd.f32 %v1697_v30, %v1612_v7  ;;  %1866 = vmatprep.mubr.f32.mxu1 %v1717_v25  ;;  %v1718_v39 = vmax.f32 %v3144_v29, 0.0  ;;  %v2085_v26 = vld [vmem:[#allocation8 + $0x810] sm:$0xff]  ;;  %v2084_v30 = vld [vmem:[#allocation8 + $0x808] sm:$0xff] }
 0x670   :  { %v1699_v33 = vpop.f32.mrf.mxu0  ;;  %1867 = vmatmul.mubr.f32.vlgmr.msra.gmra.mxu1 %v1716_v28 }
 0x671   :  { %v1719_v36 = vmax.f32 %v3148_v31, 0.0  ;;  %v1700_v32 = vadd.f32 %v1699_v33, %v1616_v11  ;;  %v3158_v51 = vadd.f32 %v1698_v38, %v1362_v1  ;;  %2161 = vmatpush1.msra.mxu1 %v2113_v53  ;;  %v2083_v38 = vld [vmem:[#allocation8 + $0x800] sm:$0xff]  ;;  %v2146_v33 = vld [vmem:[#allocation8 + $0x9f8] sm:$0xff] }
 0x672   :  { %v1703_v41 = vpop.f32.mrf.mxu0  ;;  %2162 = vmatprep.subr.mxu1 %v2112_v9  ;;  %v2131_v53 = vld [vmem:[#allocation8 + $0x980] sm:$0xff]  ;;  %v2130_v9 = vld [vmem:[#allocation8 + $0x978] sm:$0xff] }
 0x673   :  { %v3162_v48 = vadd.f32 %v1700_v32, %v1363_v49  ;;  %v1704_v34 = vadd.f32 %v1703_v41, %v1612_v7  ;;  %1872 = vmatprep.mubr.f32.mxu1 %v1719_v36  ;;  %v1720_v55 = vmax.f32 %v3158_v51, 0.0  ;;  %2163 = vmatpush1.msra.mxu1 %v2111_v4  ;;  %v2094_v7 = vld [vmem:[#allocation8 + $0x858] sm:$0xff]  ;;  %v2145_v32 = vld [vmem:[#allocation8 + $0x9f0] sm:$0xff]  ;;  %v2144_v41 = vld [vmem:[#allocation8 + $0x9e8] sm:$0xff] }
 0x674   :  { %v1705_v35 = vpop.f32.mrf.mxu0  ;;  %1873 = vmatmul.mubr.f32.gmra.mxu1 %v1718_v39  ;;  %2164 = vmatprep.subr.mxu1 %v2110_v8  ;;  %v2129_v4 = vld [vmem:[#allocation8 + $0x970] sm:$0xff]  ;;  %v2128_v8 = vld [vmem:[#allocation8 + $0x968] sm:$0xff] }
 0x675   :  { %v1721_v37 = vmax.f32 %v3162_v48, 0.0  ;;  %v1706_v40 = vadd.f32 %v1705_v35, %v1616_v11  ;;  %v3172_v1 = vadd.f32 %v1704_v34, %v1364_v54  ;;  %v1936_v54 = vld [vmem:[#allocation11 + $0x720] sm:$0xff]  ;;  %2165 = vmatpush1.msra.mxu1 %v2109_v62  ;;  %v2143_v34 = vld [vmem:[#allocation8 + $0x9e0] sm:$0xff]  ;;  %v2142_v35 = vld [vmem:[#allocation8 + $0x9d8] sm:$0xff] }
 0x676   :  { %2166 = vmatprep.subr.mxu1 %v2108_v46  ;;  %v2093_v11 = vld [vmem:[#allocation8 + $0x850] sm:$0xff]  ;;  %v2127_v62 = vld [vmem:[#allocation8 + $0x960] sm:$0xff]  ;;  %v2126_v46 = vld [vmem:[#allocation8 + $0x958] sm:$0xff] }
 0x677   :  { %v3176_v52 = vadd.f32 %v1706_v40, %v1365_v60  ;;  %1878 = vmatprep.mubr.f32.mxu1 %v1721_v37  ;;  %v1722_v50 = vmax.f32 %v3172_v1, 0.0  ;;  %v1937_v60 = vld [vmem:[#allocation11 + $0x728] sm:$0xff]  ;;  %2167 = vmatpush1.msra.mxu1 %v2107_v56  ;;  %v2297_v1 = vld [vmem:[#allocation11 + $0x938] sm:$0xff] }
 0x678   :  { %1879 = vmatmul.mubr.f32.gmra.mxu1 %v1720_v55  ;;  %2035 = vmatprep.subr.mxu0 %v1937_v60  ;;  %v2141_v40 = vld [vmem:[#allocation8 + $0x9d0] sm:$0xff]  ;;  %v2138_v60 = vld [vmem:[#allocation8 + $0x9b8] sm:$0xff] }
 0x679   :  { %v1723_v49 = vmax.f32 %v3176_v52, 0.0  ;;  %2036 = vmatpush2.msra.mxu0 %v1936_v54  ;;  %2168 = vmatprep.subr.mxu1 %v2106_v57  ;;  %v2137_v54 = vld [vmem:[#allocation8 + $0x9b0] sm:$0xff]  ;;  %v1790_v57 = vld [vmem:[#allocation10 + $0x6] sm:$0x3]  ;;  %v2296_v52 = vld [vmem:[#allocation11 + $0x930] sm:$0xff] }
 0x67a   :  { %2037 = vmatprep.subr.mxu0 %v1935_v43  ;;  %2169 = vmatpush1.msra.mxu1 %v2105_v58  ;;  %v2136_v43 = vld [vmem:[#allocation8 + $0x9a8] sm:$0xff]  ;;  %v2125_v56 = vld [vmem:[#allocation8 + $0x950] sm:$0xff]  ;;  %v1795_v58 = vrot.slane %v1790_v57, %v2962_v24 }
 0x67b   :  { %1884 = vmatprep.mubr.f32.mxu1 %v1723_v49  ;;  %2038 = vmatpush2.msra.mxu0 %v1934_v42  ;;  %v2135_v42 = vld [vmem:[#allocation8 + $0x9a0] sm:$0xff] }
 0x67c   :  { %1885 = vmatmul.mubr.f32.gmra.mxu1 %v1722_v50  ;;  %2039 = vmatprep.subr.mxu0 %v1933_v44  ;;  %v2134_v44 = vld [vmem:[#allocation8 + $0x998] sm:$0xff] }
 0x67d   :  { %2040 = vmatpush2.msra.mxu0 %v1932_v45  ;;  %2170 = vmatprep.subr.mxu1 %v2104_v59  ;;  %v2133_v45 = vld [vmem:[#allocation8 + $0x990] sm:$0xff]  ;;  %v1799_v59 = vrot.slane %v1790_v57, %v2964_v27  ;;  %v2280_v57 = vld [vmem:[#allocation11 + $0x8b0] sm:$0xff] }
 0x67e   :  { %2171 = vmatpush1.msra.mxu1 %v2103_v61 }
 0x67f   :  { %2172 = vmatprep.subr.mxu1 %v2102_v10 }
 0x680   :  { %2173 = vmatpush1.msra.mxu1 %v2101_v12 }
 0x681   :  { %2174 = vmatprep.subr.mxu1 %v2100_v13 }
 0x682   :  { %2175 = vmatpush1.msra.mxu1 %v2099_v14 }
 0x683   :  { %2176 = vmatprep.subr.mxu1 %v2098_v0 }
 0x684   :  { %2177 = vmatpush1.msra.mxu1 %v2097_v3 }
 0x685   :  { %2178 = vmatprep.subr.mxu1 %v2096_v5 }
 0x686   :  { %2179 = vmatpush1.msra.mxu1 %v2095_v6 }
 0x687   :  { %2180 = vmatprep.subr.mxu1 %v2094_v7 }
 0x688   :  { %2181 = vmatpush1.msra.mxu1 %v2093_v11 }
 0x689   :  { %2182 = vmatprep.subr.mxu1 %v2092_v15 }
 0x68a   :  { %2183 = vmatpush1.msra.mxu1 %v2091_v16 }
 0x68b   :  { %2184 = vmatprep.subr.mxu1 %v2090_v17 }
 0x68c   :  { %2185 = vmatpush1.msra.mxu1 %v2089_v18 }
 0x68d   :  { %2186 = vmatprep.subr.mxu1 %v2088_v20 }
 0x68e   :  { %2187 = vmatpush1.msra.mxu1 %v2087_v22 }
 0x68f   :  { %2188 = vmatprep.subr.mxu1 %v2086_v23 }
 0x690   :  { %2189 = vmatpush1.msra.mxu1 %v2085_v26 }
 0x691   :  { %2190 = vmatprep.subr.mxu1 %v2084_v30 }
 0x692   :  { %2191 = vmatpush1.msra.mxu1 %v2083_v38 }
 0x693   :  { %2192 = vmatprep.subr.mxu1 %v2146_v33 }
 0x694   :  { %2193 = vmatpush2.msra.mxu1 %v2145_v32 }
 0x695   :  { %2194 = vmatprep.subr.mxu1 %v2144_v41 }
 0x696   :  { %2195 = vmatpush2.msra.mxu1 %v2143_v34  ;;  %v2124_v34 = vld [vmem:[#allocation8 + $0x948] sm:$0xff] }
 0x697   :  { %2196 = vmatprep.subr.mxu1 %v2142_v35  ;;  %v2123_v35 = vld [vmem:[#allocation8 + $0x940] sm:$0xff] }
 0x698   :  { %2197 = vmatpush2.msra.mxu1 %v2141_v40  ;;  %v2122_v40 = vld [vmem:[#allocation8 + $0x938] sm:$0xff] }
 0x699   :  { %2198 = vmatprep.subr.mxu1 %v2140_v2  ;;  %v2121_v2 = vld [vmem:[#allocation8 + $0x930] sm:$0xff] }
 0x69a   :  { %2199 = vmatpush2.msra.mxu1 %v2139_v63  ;;  %v2120_v63 = vld [vmem:[#allocation8 + $0x928] sm:$0xff] }
 0x69b   :  { %2200 = vmatprep.subr.mxu1 %v2138_v60  ;;  %v2119_v60 = vld [vmem:[#allocation8 + $0x920] sm:$0xff] }
 0x69c   :  { %2201 = vmatpush2.msra.mxu1 %v2137_v54  ;;  %v2118_v54 = vld [vmem:[#allocation8 + $0x918] sm:$0xff] }
 0x69d   :  { %2202 = vmatprep.subr.mxu1 %v2136_v43  ;;  %v2117_v43 = vld [vmem:[#allocation8 + $0x910] sm:$0xff] }
 0x69e   :  { %2203 = vmatpush2.msra.mxu1 %v2135_v42  ;;  %v2116_v42 = vld [vmem:[#allocation8 + $0x908] sm:$0xff] }
 0x69f   :  { %2204 = vmatprep.subr.mxu1 %v2134_v44  ;;  %v2115_v44 = vld [vmem:[#allocation8 + $0x900] sm:$0xff] }
 0x6a0   :  { %2205 = vmatpush2.msra.mxu1 %v2133_v45  ;;  %v2289_v45 = vld [vmem:[#allocation11 + $0x8f8] sm:$0xff] }
 0x6a1   :  { %2206 = vmatprep.subr.mxu1 %v2132_v47  ;;  %v2288_v47 = vld [vmem:[#allocation11 + $0x8f0] sm:$0xff]  ;;  %2335 = vmatprep.subr.mxu0 %v2289_v45  ;;  %v2307_v45 = vld [vmem:[#allocation11 + $0x988] sm:$0xff] }
 0x6a2   :  { %2207 = vmatpush2.msra.mxu1 %v2131_v53  ;;  %v2287_v53 = vld [vmem:[#allocation11 + $0x8e8] sm:$0xff] }
 0x6a3   :  { %2208 = vmatprep.subr.mxu1 %v2130_v9  ;;  %v2286_v9 = vld [vmem:[#allocation11 + $0x8e0] sm:$0xff] }
 0x6a4   :  { %2209 = vmatpush2.msra.mxu1 %v2129_v4  ;;  %v2285_v4 = vld [vmem:[#allocation11 + $0x8d8] sm:$0xff] }
 0x6a5   :  { %2210 = vmatprep.subr.mxu1 %v2128_v8  ;;  %v2284_v8 = vld [vmem:[#allocation11 + $0x8d0] sm:$0xff] }
 0x6a6   :  { %2211 = vmatpush2.msra.mxu1 %v2127_v62  ;;  %v2283_v62 = vld [vmem:[#allocation11 + $0x8c8] sm:$0xff] }
 0x6a7   :  { %2212 = vmatprep.subr.mxu1 %v2126_v46  ;;  %v2282_v46 = vld [vmem:[#allocation11 + $0x8c0] sm:$0xff] }
 0x6a8   :  { %2213 = vmatpush2.msra.mxu1 %v2125_v56  ;;  %v2281_v56 = vld [vmem:[#allocation11 + $0x8b8] sm:$0xff] }
 0x6a9   :  { %2214 = vmatprep.subr.mxu1 %v2124_v34  ;;  %v2317_v34 = vld [vmem:[#allocation11 + $0x9d8] sm:$0xff] }
 0x6aa   :  { %2215 = vmatpush2.msra.mxu1 %v2123_v35  ;;  %v2316_v35 = vld [vmem:[#allocation11 + $0x9d0] sm:$0xff] }
 0x6ab   :  { %2216 = vmatprep.subr.mxu1 %v2122_v40  ;;  %v2315_v40 = vld [vmem:[#allocation11 + $0x9c8] sm:$0xff] }
 0x6ac   :  { %2217 = vmatpush2.msra.mxu1 %v2121_v2  ;;  %v2314_v2 = vld [vmem:[#allocation11 + $0x9c0] sm:$0xff] }
 0x6ad   :  { %2218 = vmatprep.subr.mxu1 %v2120_v63  ;;  %v2313_v63 = vld [vmem:[#allocation11 + $0x9b8] sm:$0xff] }
 0x6ae   :  { %2219 = vmatpush2.msra.mxu1 %v2119_v60  ;;  %v2312_v60 = vld [vmem:[#allocation11 + $0x9b0] sm:$0xff] }
 0x6af   :  { %2220 = vmatprep.subr.mxu1 %v2118_v54  ;;  %v2311_v54 = vld [vmem:[#allocation11 + $0x9a8] sm:$0xff] }
 0x6b0   :  { %2221 = vmatpush2.msra.mxu1 %v2117_v43  ;;  %v2310_v43 = vld [vmem:[#allocation11 + $0x9a0] sm:$0xff] }
 0x6b1   :  { %2222 = vmatprep.subr.mxu1 %v2116_v42  ;;  %v2309_v42 = vld [vmem:[#allocation11 + $0x998] sm:$0xff] }
 0x6b2   :  { %2223 = vmatpush2.msra.mxu1 %v2115_v44  ;;  %v2308_v44 = vld [vmem:[#allocation11 + $0x990] sm:$0xff] }
 0x730   :  { %v1868_v61 = vpop.f32.mrf.mxu1 }
 0x731   :  { %v1869_v10 = vadd.f32 %v1868_v61, %v1795_v58  ;;  %v2277_v61 = vld [vmem:[#allocation11 + $0x898] sm:$0xff] }
 0x732   :  { %v1870_v12 = vpop.f32.mrf.mxu1 }
 0x733   :  { %v1871_v13 = vadd.f32 %v1870_v12, %v1799_v59  ;;  %v1891_v3 = vmax.f32 %v1869_v10, 0.0  ;;  %v2276_v10 = vld [vmem:[#allocation11 + $0x890] sm:$0xff]  ;;  %v2275_v12 = vld [vmem:[#allocation11 + $0x888] sm:$0xff] }
 0x734   :  { %v1874_v14 = vpop.f32.mrf.mxu1 }
 0x735   :  { %v1892_v0 = vmax.f32 %v1871_v13, 0.0  ;;  %v1875_v5 = vadd.f32 %v1874_v14, %v1795_v58  ;;  %v2274_v13 = vld [vmem:[#allocation11 + $0x880] sm:$0xff]  ;;  %v2273_v14 = vld [vmem:[#allocation11 + $0x878] sm:$0xff] }
 0x736   :  { %v1876_v6 = vpop.f32.mrf.mxu1 }
 0x737   :  { %v1877_v7 = vadd.f32 %v1876_v6, %v1799_v59  ;;  %2041 = vmatprep.mubr.f32.mxu0 %v1892_v0  ;;  %v1893_v16 = vmax.f32 %v1875_v5, 0.0  ;;  %v2272_v0 = vld [vmem:[#allocation11 + $0x870] sm:$0xff]  ;;  %v2270_v5 = vld [vmem:[#allocation11 + $0x860] sm:$0xff]  ;;  %v2269_v6 = vld [vmem:[#allocation11 + $0x858] sm:$0xff] }
 0x738   :  { %v1880_v11 = vpop.f32.mrf.mxu1  ;;  %2042 = vmatmul.mubr.f32.vlgmr.msra.gmra.mxu0 %v1891_v3  ;;  %v2271_v3 = vld [vmem:[#allocation11 + $0x868] sm:$0xff] }
 0x739   :  { %v1894_v15 = vmax.f32 %v1877_v7, 0.0  ;;  %v1881_v17 = vadd.f32 %v1880_v11, %v1795_v58  ;;  %2336 = vmatpush1.msra.mxu0 %v2288_v47  ;;  %v2268_v7 = vld [vmem:[#allocation11 + $0x850] sm:$0xff]  ;;  %v2267_v11 = vld [vmem:[#allocation11 + $0x848] sm:$0xff]  ;;  %v2306_v47 = vld [vmem:[#allocation11 + $0x980] sm:$0xff] }
 0x73a   :  { %v1882_v18 = vpop.f32.mrf.mxu1  ;;  %2337 = vmatprep.subr.mxu0 %v2287_v53  ;;  %v2305_v53 = vld [vmem:[#allocation11 + $0x978] sm:$0xff] }
 0x73b   :  { %v1883_v20 = vadd.f32 %v1882_v18, %v1799_v59  ;;  %2047 = vmatprep.mubr.f32.mxu0 %v1894_v15  ;;  %v1895_v26 = vmax.f32 %v1881_v17, 0.0  ;;  %2338 = vmatpush1.msra.mxu0 %v2286_v9  ;;  %v2266_v15 = vld [vmem:[#allocation11 + $0x840] sm:$0xff]  ;;  %v2264_v17 = vld [vmem:[#allocation11 + $0x830] sm:$0xff]  ;;  %v2263_v18 = vld [vmem:[#allocation11 + $0x828] sm:$0xff] }
 0x73c   :  { %v1886_v22 = vpop.f32.mrf.mxu1  ;;  %2048 = vmatmul.mubr.f32.gmra.mxu0 %v1893_v16  ;;  %2339 = vmatprep.subr.mxu0 %v2285_v4  ;;  %v2265_v16 = vld [vmem:[#allocation11 + $0x838] sm:$0xff]  ;;  %v2304_v9 = vld [vmem:[#allocation11 + $0x970] sm:$0xff]  ;;  %v2303_v4 = vld [vmem:[#allocation11 + $0x968] sm:$0xff] }
 0x73d   :  { %v1896_v23 = vmax.f32 %v1883_v20, 0.0  ;;  %v1887_v30 = vadd.f32 %v1886_v22, %v1795_v58  ;;  %2340 = vmatpush1.msra.mxu0 %v2284_v8  ;;  %v2279_v58 = vld [vmem:[#allocation11 + $0x8a8] sm:$0xff]  ;;  %v2262_v20 = vld [vmem:[#allocation11 + $0x820] sm:$0xff]  ;;  %v2261_v22 = vld [vmem:[#allocation11 + $0x818] sm:$0xff] }
 0x73e   :  { %v1888_v38 = vpop.f32.mrf.mxu1  ;;  %2341 = vmatprep.subr.mxu0 %v2283_v62  ;;  %v2302_v8 = vld [vmem:[#allocation11 + $0x960] sm:$0xff]  ;;  %v2301_v62 = vld [vmem:[#allocation11 + $0x958] sm:$0xff] }
 0x73f   :  { %v1889_v33 = vadd.f32 %v1888_v38, %v1799_v59  ;;  %2053 = vmatprep.mubr.f32.mxu0 %v1896_v23  ;;  %v1897_v41 = vmax.f32 %v1887_v30, 0.0  ;;  %2342 = vmatpush1.msra.mxu0 %v2282_v46  ;;  %v2278_v59 = vld [vmem:[#allocation11 + $0x8a0] sm:$0xff]  ;;  %v2260_v23 = vld [vmem:[#allocation11 + $0x810] sm:$0xff]  ;;  %v2321_v38 = vld [vmem:[#allocation11 + $0x9f8] sm:$0xff] }
 0x740   :  { %2054 = vmatmul.mubr.f32.gmra.mxu0 %v1895_v26  ;;  %2343 = vmatprep.subr.mxu0 %v2281_v56  ;;  %v2259_v26 = vld [vmem:[#allocation11 + $0x808] sm:$0xff]  ;;  %v2258_v30 = vld [vmem:[#allocation11 + $0x800] sm:$0xff]  ;;  %v2300_v46 = vld [vmem:[#allocation11 + $0x950] sm:$0xff] }
 0x741   :  { %v1898_v32 = vmax.f32 %v1889_v33, 0.0  ;;  %2344 = vmatpush1.msra.mxu0 %v2280_v57  ;;  %v2320_v33 = vld [vmem:[#allocation11 + $0x9f0] sm:$0xff]  ;;  %v2299_v56 = vld [vmem:[#allocation11 + $0x948] sm:$0xff]  ;;  %v2298_v57 = vld [vmem:[#allocation11 + $0x940] sm:$0xff] }
 0x742   :  { %2345 = vmatprep.subr.mxu0 %v2279_v58  ;;  %v1965_v58 = vld [vmem:[#allocation13 + $0x6] sm:$0x3] }
 0x743   :  { %2059 = vmatprep.mubr.f32.mxu0 %v1898_v32  ;;  %2346 = vmatpush1.msra.mxu0 %v2278_v59  ;;  %v2319_v32 = vld [vmem:[#allocation11 + $0x9e8] sm:$0xff]  ;;  %v1970_v59 = vrot.slane %v1965_v58, %v2962_v24 }
 0x744   :  { %2060 = vmatmul.mubr.f32.gmra.mxu0 %v1897_v41  ;;  %2347 = vmatprep.subr.mxu0 %v2277_v61  ;;  %v2318_v41 = vld [vmem:[#allocation11 + $0x9e0] sm:$0xff]  ;;  %v1974_v61 = vrot.slane %v1965_v58, %v2964_v27 }
 0x745   :  { %2348 = vmatpush1.msra.mxu0 %v2276_v10  ;;  %v2446_v58 = vld [vmem:[#allocation14 + $0x30] sm:$0xff] }
 0x746   :  { %2349 = vmatprep.subr.mxu0 %v2275_v12 }
 0x747   :  { %2350 = vmatpush1.msra.mxu0 %v2274_v13 }
 0x748   :  { %2351 = vmatprep.subr.mxu0 %v2273_v14 }
 0x749   :  { %2352 = vmatpush1.msra.mxu0 %v2272_v0 }
 0x74a   :  { %2353 = vmatprep.subr.mxu0 %v2271_v3 }
 0x74b   :  { %2354 = vmatpush1.msra.mxu0 %v2270_v5 }
 0x74c   :  { %2355 = vmatprep.subr.mxu0 %v2269_v6 }
 0x74d   :  { %2356 = vmatpush1.msra.mxu0 %v2268_v7 }
 0x74e   :  { %2357 = vmatprep.subr.mxu0 %v2267_v11 }
 0x74f   :  { %2358 = vmatpush1.msra.mxu0 %v2266_v15 }
 0x750   :  { %2359 = vmatprep.subr.mxu0 %v2265_v16 }
 0x751   :  { %2360 = vmatpush1.msra.mxu0 %v2264_v17 }
 0x752   :  { %2361 = vmatprep.subr.mxu0 %v2263_v18 }
 0x753   :  { %2362 = vmatpush1.msra.mxu0 %v2262_v20 }
 0x754   :  { %2363 = vmatprep.subr.mxu0 %v2261_v22 }
 0x755   :  { %2364 = vmatpush1.msra.mxu0 %v2260_v23 }
 0x756   :  { %2365 = vmatprep.subr.mxu0 %v2259_v26 }
 0x757   :  { %2366 = vmatpush1.msra.mxu0 %v2258_v30 }
 0x758   :  { %2367 = vmatprep.subr.mxu0 %v2321_v38 }
 0x759   :  { %2368 = vmatpush2.msra.mxu0 %v2320_v33  ;;  %v2293_v33 = vld [vmem:[#allocation11 + $0x918] sm:$0xff] }
 0x75a   :  { %2369 = vmatprep.subr.mxu0 %v2319_v32  ;;  %v2292_v32 = vld [vmem:[#allocation11 + $0x910] sm:$0xff] }
 0x75b   :  { %2370 = vmatpush2.msra.mxu0 %v2318_v41  ;;  %v2291_v41 = vld [vmem:[#allocation11 + $0x908] sm:$0xff] }
 0x75c   :  { %2371 = vmatprep.subr.mxu0 %v2317_v34  ;;  %v2290_v34 = vld [vmem:[#allocation11 + $0x900] sm:$0xff] }
 0x75d   :  { %2372 = vmatpush2.msra.mxu0 %v2316_v35  ;;  %v2471_v35 = vld [vmem:[#allocation14 + $0xf8] sm:$0xff] }
 0x75e   :  { %2373 = vmatprep.subr.mxu0 %v2315_v40  ;;  %v2455_v40 = vld [vmem:[#allocation14 + $0x78] sm:$0xff]  ;;  %2590 = vmatprep.subr.mxu1 %v2471_v35 }
 0x75f   :  { %2374 = vmatpush2.msra.mxu0 %v2314_v2  ;;  %v2470_v2 = vld [vmem:[#allocation14 + $0xf0] sm:$0xff] }
 0x760   :  { %2375 = vmatprep.subr.mxu0 %v2313_v63  ;;  %v2454_v63 = vld [vmem:[#allocation14 + $0x70] sm:$0xff] }
 0x761   :  { %2376 = vmatpush2.msra.mxu0 %v2312_v60  ;;  %v2469_v60 = vld [vmem:[#allocation14 + $0xe8] sm:$0xff] }
 0x762   :  { %2377 = vmatprep.subr.mxu0 %v2311_v54  ;;  %v2453_v54 = vld [vmem:[#allocation14 + $0x68] sm:$0xff] }
 0x763   :  { %2378 = vmatpush2.msra.mxu0 %v2310_v43  ;;  %v2468_v43 = vld [vmem:[#allocation14 + $0xe0] sm:$0xff] }
 0x764   :  { %2379 = vmatprep.subr.mxu0 %v2309_v42  ;;  %v2452_v42 = vld [vmem:[#allocation14 + $0x60] sm:$0xff] }
 0x765   :  { %2380 = vmatpush2.msra.mxu0 %v2308_v44  ;;  %v2467_v44 = vld [vmem:[#allocation14 + $0xd8] sm:$0xff] }
 0x766   :  { %2381 = vmatprep.subr.mxu0 %v2307_v45  ;;  %v2451_v45 = vld [vmem:[#allocation14 + $0x58] sm:$0xff] }
 0x767   :  { %2382 = vmatpush2.msra.mxu0 %v2306_v47  ;;  %v2466_v47 = vld [vmem:[#allocation14 + $0xd0] sm:$0xff] }
 0x768   :  { %2383 = vmatprep.subr.mxu0 %v2305_v53  ;;  %v2450_v53 = vld [vmem:[#allocation14 + $0x50] sm:$0xff] }
 0x769   :  { %2384 = vmatpush2.msra.mxu0 %v2304_v9  ;;  %v2465_v9 = vld [vmem:[#allocation14 + $0xc8] sm:$0xff] }
 0x76a   :  { %2385 = vmatprep.subr.mxu0 %v2303_v4  ;;  %v2449_v4 = vld [vmem:[#allocation14 + $0x48] sm:$0xff] }
 0x76b   :  { %2386 = vmatpush2.msra.mxu0 %v2302_v8  ;;  %v2464_v8 = vld [vmem:[#allocation14 + $0xc0] sm:$0xff] }
 0x76c   :  { %2387 = vmatprep.subr.mxu0 %v2301_v62  ;;  %v2448_v62 = vld [vmem:[#allocation14 + $0x40] sm:$0xff] }
 0x76d   :  { %2388 = vmatpush2.msra.mxu0 %v2300_v46  ;;  %v2463_v46 = vld [vmem:[#allocation14 + $0xb8] sm:$0xff] }
 0x76e   :  { %2389 = vmatprep.subr.mxu0 %v2299_v56  ;;  %v2447_v56 = vld [vmem:[#allocation14 + $0x38] sm:$0xff] }
 0x76f   :  { %2390 = vmatpush2.msra.mxu0 %v2298_v57  ;;  %v2462_v57 = vld [vmem:[#allocation14 + $0xb0] sm:$0xff] }
 0x770   :  { %2391 = vmatprep.subr.mxu0 %v2297_v1 }
 0x771   :  { %2392 = vmatpush2.msra.mxu0 %v2296_v52 }
 0x7f8   :  { %v2043_v10 = vpop.f32.mrf.mxu0 }
 0x7f9   :  { %v2044_v12 = vadd.f32 %v2043_v10, %v1970_v59  ;;  %v2148_v10 = vld [vmem:[#allocation10 + $0x8] sm:$0x3] }
 0x7fa   :  { %v2045_v13 = vpop.f32.mrf.mxu0 }
 0x7fb   :  { %v2046_v14 = vadd.f32 %v2045_v13, %v1974_v61  ;;  %v3194_v0 = vadd.f32 %v2044_v12, %v1716_v28  ;;  %v2153_v12 = vrot.slane %v2148_v10, %v2962_v24  ;;  %v2157_v13 = vrot.slane %v2148_v10, %v2964_v27 }
 0x7fc   :  { %v2049_v3 = vpop.f32.mrf.mxu0 }
 0x7fd   :  { %v3198_v5 = vadd.f32 %v2046_v14, %v1717_v25  ;;  %v2050_v6 = vadd.f32 %v2049_v3, %v1970_v59  ;;  %v2074_v16 = vmax.f32 %v3194_v0, 0.0 }
 0x7fe   :  { %v2051_v7 = vpop.f32.mrf.mxu0 }
 0x7ff   :  { %v2075_v11 = vmax.f32 %v3198_v5, 0.0  ;;  %v2052_v15 = vadd.f32 %v2051_v7, %v1974_v61  ;;  %v3204_v17 = vadd.f32 %v2050_v6, %v1718_v39 }
 0x800   :  { %v2055_v18 = vpop.f32.mrf.mxu0 }
 0x801   :  { %v3208_v19 = vadd.f32 %v2052_v15, %v1719_v36  ;;  %v2056_v28 = vadd.f32 %v2055_v18, %v1970_v59  ;;  %2224 = vmatprep.mubr.f32.mxu1 %v2075_v11  ;;  %v2076_v29 = vmax.f32 %v3204_v17, 0.0 }
 0x802   :  { %v2057_v21 = vpop.f32.mrf.mxu0  ;;  %2225 = vmatmul.mubr.f32.vlgmr.msra.gmra.mxu1 %v2074_v16 }
 0x803   :  { %v2077_v25 = vmax.f32 %v3208_v19, 0.0  ;;  %v2058_v20 = vadd.f32 %v2057_v21, %v1974_v61  ;;  %v3218_v39 = vadd.f32 %v2056_v28, %v1720_v55  ;;  %2591 = vmatpush3.msra.mxu1 %v2455_v40 }
 0x804   :  { %v2061_v31 = vpop.f32.mrf.mxu0  ;;  %2592 = vmatprep.subr.mxu1 %v2470_v2 }
 0x805   :  { %v3222_v36 = vadd.f32 %v2058_v20, %v1721_v37  ;;  %v2062_v22 = vadd.f32 %v2061_v31, %v1970_v59  ;;  %2230 = vmatprep.mubr.f32.mxu1 %v2077_v25  ;;  %v2078_v51 = vmax.f32 %v3218_v39, 0.0  ;;  %2593 = vmatpush3.msra.mxu1 %v2454_v63  ;;  %v2461_v59 = vld [vmem:[#allocation14 + $0xa8] sm:$0xff]  ;;  %v2460_v63 = vld [vmem:[#allocation14 + $0xa0] sm:$0xff] }
 0x806   :  { %v2063_v23 = vpop.f32.mrf.mxu0  ;;  %2231 = vmatmul.mubr.f32.gmra.mxu1 %v2076_v29  ;;  %2594 = vmatprep.subr.mxu1 %v2469_v60  ;;  %v2444_v60 = vld [vmem:[#allocation14 + $0x20] sm:$0xff] }
 0x807   :  { %v2079_v26 = vmax.f32 %v3222_v36, 0.0  ;;  %v2064_v30 = vadd.f32 %v2063_v23, %v1974_v61  ;;  %v3232_v55 = vadd.f32 %v2062_v22, %v1722_v50  ;;  %v2294_v50 = vld [vmem:[#allocation11 + $0x920] sm:$0xff]  ;;  %2595 = vmatpush3.msra.mxu1 %v2453_v54  ;;  %v2445_v61 = vld [vmem:[#allocation14 + $0x28] sm:$0xff] }
 0x808   :  { %2596 = vmatprep.subr.mxu1 %v2468_v43  ;;  %v2459_v54 = vld [vmem:[#allocation14 + $0x98] sm:$0xff] }
 0x809   :  { %v3236_v48 = vadd.f32 %v2064_v30, %v1723_v49  ;;  %2236 = vmatprep.mubr.f32.mxu1 %v2079_v26  ;;  %v2080_v38 = vmax.f32 %v3232_v55, 0.0  ;;  %v2295_v49 = vld [vmem:[#allocation11 + $0x928] sm:$0xff]  ;;  %2597 = vmatpush3.msra.mxu1 %v2452_v42  ;;  %v2458_v42 = vld [vmem:[#allocation14 + $0x90] sm:$0xff] }
 0x80a   :  { %2237 = vmatmul.mubr.f32.gmra.mxu1 %v2078_v51  ;;  %2393 = vmatprep.subr.mxu0 %v2295_v49  ;;  %v2443_v43 = vld [vmem:[#allocation14 + $0x18] sm:$0xff] }
 0x80b   :  { %v2081_v37 = vmax.f32 %v3236_v48, 0.0  ;;  %2394 = vmatpush2.msra.mxu0 %v2294_v50  ;;  %2598 = vmatprep.subr.mxu1 %v2467_v44  ;;  %v2442_v44 = vld [vmem:[#allocation14 + $0x10] sm:$0xff] }
 0x80c   :  { %2395 = vmatprep.subr.mxu0 %v2293_v33  ;;  %2599 = vmatpush3.msra.mxu1 %v2451_v45  ;;  %v2457_v45 = vld [vmem:[#allocation14 + $0x88] sm:$0xff] }
 0x80d   :  { %2242 = vmatprep.mubr.f32.mxu1 %v2081_v37  ;;  %2396 = vmatpush2.msra.mxu0 %v2292_v32 }
 0x80e   :  { %2243 = vmatmul.mubr.f32.gmra.mxu1 %v2080_v38  ;;  %2397 = vmatprep.subr.mxu0 %v2291_v41 }
 0x80f   :  { %2398 = vmatpush2.msra.mxu0 %v2290_v34  ;;  %2600 = vmatprep.subr.mxu1 %v2466_v47  ;;  %v2441_v47 = vld [vmem:[#allocation14 + $0x8] sm:$0xff] }
 0x810   :  { %2601 = vmatpush3.msra.mxu1 %v2450_v53  ;;  %v2456_v53 = vld [vmem:[#allocation14 + $0x80] sm:$0xff] }
 0x811   :  { %2602 = vmatprep.subr.mxu1 %v2465_v9  ;;  %v2440_v9 = vld [vmem:[#allocation14] sm:$0xff] }
 0x812   :  { %2603 = vmatpush3.msra.mxu1 %v2449_v4  ;;  %v2323_v4 = vld [vmem:[#allocation13 + $0x8] sm:$0x3] }
 0x813   :  { %2604 = vmatprep.subr.mxu1 %v2464_v8  ;;  %v2328_v8 = vrot.slane %v2323_v4, %v2962_v24 }
 0x814   :  { %2605 = vmatpush3.msra.mxu1 %v2448_v62  ;;  %v2332_v62 = vrot.slane %v2323_v4, %v2964_v27 }
 0x815   :  { %2606 = vmatprep.subr.mxu1 %v2463_v46 }
 0x816   :  { %2607 = vmatpush3.msra.mxu1 %v2447_v56 }
 0x817   :  { %2608 = vmatprep.subr.mxu1 %v2462_v57 }
 0x818   :  { %2609 = vmatpush3.msra.mxu1 %v2446_v58 }
 0x819   :  { %2610 = vmatprep.subr.mxu1 %v2461_v59 }
 0x81a   :  { %2611 = vmatpush3.msra.mxu1 %v2445_v61 }
 0x81b   :  { %2612 = vmatprep.subr.mxu1 %v2460_v63 }
 0x81c   :  { %2613 = vmatpush3.msra.mxu1 %v2444_v60 }
 0x81d   :  { %2614 = vmatprep.subr.mxu1 %v2459_v54 }
 0x81e   :  { %2615 = vmatpush3.msra.mxu1 %v2443_v43 }
 0x81f   :  { %2616 = vmatprep.subr.mxu1 %v2458_v42 }
 0x820   :  { %2617 = vmatpush3.msra.mxu1 %v2442_v44 }
 0x821   :  { %2618 = vmatprep.subr.mxu1 %v2457_v45 }
 0x822   :  { %2619 = vmatpush3.msra.mxu1 %v2441_v47 }
 0x823   :  { %2620 = vmatprep.subr.mxu1 %v2456_v53 }
 0x824   :  { %2621 = vmatpush3.msra.mxu1 %v2440_v9 }
 0x8c2   :  { %v2226_v14 = vpop.f32.mrf.mxu1 }
 0x8c3   :  { %v2227_v3 = vadd.f32 %v2226_v14, %v2153_v12 }
 0x8c4   :  { %v2228_v6 = vpop.f32.mrf.mxu1 }
 0x8c5   :  { %v2229_v7 = vadd.f32 %v2228_v6, %v2157_v13  ;;  %v2249_v28 = vmax.f32 %v2227_v3, 0.0 }
 0x8c6   :  { %v2232_v15 = vpop.f32.mrf.mxu1 }
 0x8c7   :  { %v2250_v18 = vmax.f32 %v2229_v7, 0.0  ;;  %v2233_v21 = vadd.f32 %v2232_v15, %v2153_v12 }
 0x8c8   :  { %v2234_v20 = vpop.f32.mrf.mxu1 }
 0x8c9   :  { %v2235_v31 = vadd.f32 %v2234_v20, %v2157_v13  ;;  %2399 = vmatprep.mubr.f32.mxu0 %v2250_v18  ;;  %v2251_v30 = vmax.f32 %v2233_v21, 0.0 }
 0x8ca   :  { %v2238_v22 = vpop.f32.mrf.mxu1  ;;  %2400 = vmatmul.mubr.f32.vlgmr.msra.gmra.mxu0 %v2249_v28 }
 0x8cb   :  { %v2252_v23 = vmax.f32 %v2235_v31, 0.0  ;;  %v2239_v1 = vadd.f32 %v2238_v22, %v2153_v12 }
 0x8cc   :  { %v2240_v52 = vpop.f32.mrf.mxu1 }
 0x8cd   :  { %v2241_v49 = vadd.f32 %v2240_v52, %v2157_v13  ;;  %2405 = vmatprep.mubr.f32.mxu0 %v2252_v23  ;;  %v2253_v32 = vmax.f32 %v2239_v1, 0.0 }
 0x8ce   :  { %v2244_v50 = vpop.f32.mrf.mxu1  ;;  %2406 = vmatmul.mubr.f32.gmra.mxu0 %v2251_v30 }
 0x8cf   :  { %v2254_v33 = vmax.f32 %v2241_v49, 0.0  ;;  %v2245_v41 = vadd.f32 %v2244_v50, %v2153_v12 }
 0x8d0   :  { %v2246_v34 = vpop.f32.mrf.mxu1 }
 0x8d1   :  { %v2247_v35 = vadd.f32 %v2246_v34, %v2157_v13  ;;  %2411 = vmatprep.mubr.f32.mxu0 %v2254_v33  ;;  %v2255_v2 = vmax.f32 %v2245_v41, 0.0 }
 0x8d2   :  { %2412 = vmatmul.mubr.f32.gmra.mxu0 %v2253_v32 }
 0x8d3   :  { %v2256_v40 = vmax.f32 %v2247_v35, 0.0 }
 0x8d5   :  { %2417 = vmatprep.mubr.f32.mxu0 %v2256_v40 }
 0x8d6   :  { %2418 = vmatmul.mubr.f32.gmra.mxu0 %v2255_v2 }
 0x98a   :  { %v2401_v46 = vpop.f32.mrf.mxu0 }
 0x98b   :  { %v2402_v56 = vadd.f32 %v2401_v46, %v2328_v8 }
 0x98c   :  { %v2403_v57 = vpop.f32.mrf.mxu0 }
 0x98d   :  { %v2404_v58 = vadd.f32 %v2403_v57, %v2332_v62  ;;  %v2424_v59 = vadd.f32 %v2402_v56, %v2074_v16 }
 0x98e   :  { %v2407_v61 = vpop.f32.mrf.mxu0 }
 0x98f   :  { %v2425_v10 = vadd.f32 %v2404_v58, %v2075_v11  ;;  %v2408_v12 = vadd.f32 %v2407_v61, %v2328_v8  ;;  %v2432_v6 = vmax.f32 %v2424_v59, 0.0 }
 0x990   :  { %v2409_v13 = vpop.f32.mrf.mxu0 }
 0x991   :  { %v2433_v14 = vmax.f32 %v2425_v10, 0.0  ;;  %v2410_v3 = vadd.f32 %v2409_v13, %v2332_v62  ;;  %v2426_v24 = vadd.f32 %v2408_v12, %v2076_v29 }
 0x992   :  { %v2413_v27 = vpop.f32.mrf.mxu0 }
 0x993   :  { %v2427_v7 = vadd.f32 %v2410_v3, %v2077_v25  ;;  %v2414_v15 = vadd.f32 %v2413_v27, %v2328_v8  ;;  %2543 = vmatprep.mubr.f32.mxu1 %v2433_v14  ;;  %v2434_v5 = vmax.f32 %v2426_v24, 0.0 }
 0x994   :  { %v2415_v0 = vpop.f32.mrf.mxu0  ;;  %2544 = vmatmul.mubr.f32.vlgmr.msra.gmra.mxu1 %v2432_v6 }
 0x995   :  { %v2435_v16 = vmax.f32 %v2427_v7, 0.0  ;;  %v2416_v18 = vadd.f32 %v2415_v0, %v2332_v62  ;;  %v2428_v11 = vadd.f32 %v2414_v15, %v2078_v51 }
 0x996   :  { %v2419_v28 = vpop.f32.mrf.mxu0 }
 0x997   :  { %v2429_v21 = vadd.f32 %v2416_v18, %v2079_v26  ;;  %v2420_v17 = vadd.f32 %v2419_v28, %v2328_v8  ;;  %2548 = vmatprep.mubr.f32.mxu1 %v2435_v16  ;;  %v2436_v20 = vmax.f32 %v2428_v11, 0.0  ;;  %v2589_v26 = vld [vmem:[#allocation16] ss:$0 sm:$0xff] }
 0x998   :  { %v2421_v29 = vpop.f32.mrf.mxu0  ;;  %2549 = vmatmul.mubr.f32.gmra.mxu1 %v2434_v5 }
 0x999   :  { %v2437_v19 = vmax.f32 %v2429_v21, 0.0  ;;  %v2422_v25 = vadd.f32 %v2421_v29, %v2332_v62  ;;  %v2430_v31 = vadd.f32 %v2420_v17, %v2080_v38 }
 0x99b   :  { %v2431_v22 = vadd.f32 %v2422_v25, %v2081_v37  ;;  %2553 = vmatprep.mubr.f32.mxu1 %v2437_v19  ;;  %v2438_v51 = vmax.f32 %v2430_v31, 0.0 }
 0x99c   :  { %2554 = vmatmul.mubr.f32.gmra.mxu1 %v2436_v20 }
 0x99d   :  { %v2439_v39 = vmax.f32 %v2431_v22, 0.0 }
 0x99f   :  { %2558 = vmatprep.mubr.f32.mxu1 %v2439_v39 }
 0x9a0   :  { %2559 = vmatmul.mubr.f32.gmra.mxu1 %v2438_v51 }
 0xa54   :  { %v2622_v36 = vpop.f32.mrf.mxu1 }
 0xa56   :  { %v2623_v23 = vpop.f32.mrf.mxu1 }
 0xa57   :  { %v2624_v30 = vadd.f32 %v2623_v23, %v2622_v36 }
 0xa58   :  { %v2625_v1 = vpop.f32.mrf.mxu1 }
 0xa59   :  { %v2546_v52 = vadd.f32 %v2624_v30, %v2589_v26 }
 0xa5a   :  { %v2626_v49 = vpop.f32.mrf.mxu1 }
 0xa5b   :  { %2564 = vst [vmem:[#allocation17] sm:$0xff] %v2546_v52  ;;  %v2627_v50 = vadd.f32 %v2626_v49, %v2625_v1 }
 0xa5c   :  { %v2628_v55 = vpop.f32.mrf.mxu1 }
 0xa5d   :  { %v2551_v38 = vadd.f32 %v2627_v50, %v2589_v26 }
 0xa5e   :  { %v2629_v33 = vpop.f32.mrf.mxu1 }
 0xa5f   :  { %2565 = vst [vmem:[#allocation17 + $0x8] sm:$0xff] %v2551_v38  ;;  %v2630_v48 = vadd.f32 %v2629_v33, %v2628_v55 }
 0xa60   :  { %v2631_v37 = vpop.f32.mrf.mxu1 }
 0xa61   :  { %v2556_v32 = vadd.f32 %v2630_v48, %v2589_v26 }
 0xa62   :  { %v2632_v41 = vpop.f32.mrf.mxu1 }
 0xa63   :  { %2566 = vst [vmem:[#allocation17 + $0x10] sm:$0xff] %v2556_v32  ;;  %v2633_v34 = vadd.f32 %v2632_v41, %v2631_v37 }
 0xa65   :  { %v2561_v35 = vadd.f32 %v2633_v34, %v2589_v26 }
 0xa67   :  { %2567 = vst [vmem:[#allocation17 + $0x18] sm:$0xff] %v2561_v35 }
 0xa68   :  { %2843 = shalt.err (!%p2840_p7)
}
 0xa69   :  { %2579 = dma.vmem_to_hbm [thread:$0]  %s2574_s8, 512, %s3283_s9, [#allocation4], %s2870_s3, %s2870_s3, %s2871_s28  }
 0xa6a   :  { %2862 = dma.done.wait [#allocation4], 512  }
 0xa6b   :  { %2863 = vsyncadd [#allocation4], 4294966784 }
 0xa6c   :  { %2583 = vsyncpa [#allocation3], 1 }
 0xa6d   :  { %2584 = vsyncpa [#allocation6], 1 }
 0xa6e   :  { %2585 = vsyncpa [#allocation9], 1 }
 0xa6f   :  { %2586 = vsyncpa [#allocation12], 1 }
 0xa70   :  { %2587 = vsyncpa [#allocation15], 1 }
 0xa71   :  { %2588 = vsyncpa [#allocation4], 1 }

</bundles_post_ra>
